<compile_context>
chip_gen: v6e
topology: v6e:2x2x1
jax: 0.10.0
libtpu: 0.0.40
codegen_flags: <defaults>
</compile_context>

<pallas_src>
import functools

import jax
import jax.numpy as jnp
from jax.experimental import pallas as pl
from jax.experimental.pallas import tpu as pltpu

_EPS = 1e-5
_TILE_N = 1  # batch tile per grid step (samples are conv-independent -> no halo)


# --------------------------------------------------------------------------- #
# In-kernel helpers
# --------------------------------------------------------------------------- #
def _halo_masks(W):
    """Two reusable boolean masks for the W (sublane) halo of pltpu.roll."""
    j = jax.lax.broadcasted_iota(jnp.int32, (1, 1, W, 1), 2)
    return j >= 1, j < W - 1          # (mask for dw=-1, mask for dw=+1)


def _shift2d(x, dh, dw, mask_m1, mask_p1):
    """result[n, i, j, :] = x[n, i+dh, j+dw, :], zero outside the image."""
    N, H, W, C = x.shape
    y = x
    if dh != 0:
        # H is a major (untiled) axis: slicing / concatenating is vreg
        # selection only, no sublane/lane relayout.
        zrow = jnp.zeros((N, 1, W, C), x.dtype)
        y = (jnp.concatenate([y[:, 1:], zrow], axis=1) if dh > 0
             else jnp.concatenate([zrow, y[:, :H - 1]], axis=1))
    if dw != 0:
        # W is the sublane axis: rotate on the (otherwise idle) XLU and mask
        # the wrapped-around column with a precomputed (1,1,W,1) mask.
        y = pltpu.roll(y, shift=(-dw) % W, axis=2)
        y = jnp.where(mask_p1 if dw > 0 else mask_m1, y, 0.0)
    return y


def _conv3x3(x, w_flat_bf16, masks):
    """3x3 same-conv as a single MXU matmul: im2col (M, 9C) x (9C, Cout).

    Each shifted tap is cast to bf16 *before* the lane-axis concatenate, so
    the dominant im2col intermediate is built directly in bf16.
    """
    N, H, W, C = x.shape
    taps = [_shift2d(x, kh - 1, kw - 1, *masks).astype(jnp.bfloat16)
            for kh in range(3) for kw in range(3)]
    cols = jnp.concatenate(taps, axis=-1)                     # (N, H, W, 9C) bf16
    out = jnp.dot(cols.reshape(N * H * W, 9 * C), w_flat_bf16,
                  preferred_element_type=jnp.float32)
    return out.reshape(N, H, W, w_flat_bf16.shape[-1])


def _partial_stats(y):
    """Per-tile [sum, sum-of-squares] over (N, H, W): shape (1, 2, 1, C)."""
    s = jnp.sum(y, axis=(0, 1, 2), keepdims=True)             # (1,1,1,C)
    sq = jnp.sum(y * y, axis=(0, 1, 2), keepdims=True)        # (1,1,1,C)
    return jnp.concatenate([s, sq], axis=1)                   # (1,2,1,C)


# --------------------------------------------------------------------------- #
# Stage kernels (each runs per batch tile)
# --------------------------------------------------------------------------- #
def _stage1_kernel(*refs, proj):
    """conv1 (+ 1x1 projection) on one tile; raw outputs + BN partial sums."""
    if proj:
        x_ref, w1_ref, ws_ref, y1_ref, st1_ref, sc_ref, sts_ref = refs
    else:
        x_ref, w1_ref, y1_ref, st1_ref = refs

    x = x_ref[...]                                            # (tile,H,W,Cin) f32
    masks = _halo_masks(x.shape[2])

    y1 = _conv3x3(x, w1_ref[...], masks)
    y1_ref[...] = y1
    st1_ref[...] = _partial_stats(y1)

    if proj:
        N, H, W, Cin = x.shape
        cout = ws_ref.shape[-1]
        sc = jnp.dot(x.reshape(N * H * W, Cin).astype(jnp.bfloat16),
                     ws_ref[...],
                     preferred_element_type=jnp.float32).reshape(N, H, W, cout)
        sc_ref[...] = sc
        sts_ref[...] = _partial_stats(sc)


def _stage2_kernel(y1_ref, w2_ref, a1_ref, b1_ref, y2_ref, st2_ref):
    """BN1-apply + ReLU + conv2 on one tile; raw conv2 + BN2 partial sums."""
    h1 = jnp.maximum(y1_ref[...] * a1_ref[...] + b1_ref[...], 0.0)
    masks = _halo_masks(h1.shape[2])
    y2 = _conv3x3(h1, w2_ref[...], masks)
    y2_ref[...] = y2
    st2_ref[...] = _partial_stats(y2)


def _stage3_kernel(y2_ref, sc_ref, a2_ref, b2_ref, as_ref, bs_ref, o_ref):
    """BN2-apply + shortcut-BN-apply + residual add + ReLU."""
    out = (y2_ref[...] * a2_ref[...] + b2_ref[...]
           + sc_ref[...] * as_ref[...] + bs_ref[...])
    o_ref[...] = jnp.maximum(out, 0.0).astype(o_ref.dtype)


# --------------------------------------------------------------------------- #
# Wrapper
# --------------------------------------------------------------------------- #
def _tile_spec(shape, tile_n):
    nd = len(shape)
    return pl.BlockSpec((tile_n,) + tuple(shape[1:]),
                        lambda i, nd=nd: (i,) + (0,) * (nd - 1))


def _rep_spec(shape):
    # Constant index_map -> block stays resident in VMEM across grid steps.
    nd = len(shape)
    return pl.BlockSpec(tuple(shape), lambda i, nd=nd: (0,) * nd)


def _stats_spec(cout):
    return pl.BlockSpec((1, 2, 1, cout), lambda i: (i, 0, 0, 0))


_COMPILER_PARAMS = pltpu.CompilerParams(
    # "parallel" lets v7x's two TensorCores split the batch tiles;
    # harmless (single TC) on v5e/v6e.
    dimension_semantics=("parallel",),
    vmem_limit_bytes=64 * 1024 * 1024,
)


def _finalize_bn(stats, gamma, beta, count, eps):
    """Reduce per-tile partial sums -> BN scale/shift (training-mode stats)."""
    s = jnp.sum(stats[:, 0, 0, :], axis=0)                    # (C,)
    sq = jnp.sum(stats[:, 1, 0, :], axis=0)                   # (C,)
    mean = s / count
    var = jnp.maximum(sq / count - mean * mean, 0.0)          # clamp >= 0
    scale = gamma * jax.lax.rsqrt(var + eps)                  # (1,C)
    shift = beta - mean * scale                               # (1,C)
    return scale.astype(jnp.float32), shift.astype(jnp.float32)


def residual_block_forward(x_nchw, params, stride=1):
    if stride != 1:
        # TODO(synk): strided conv1 / strided 1x1 shortcut not implemented in-kernel.
        raise NotImplementedError("only stride=1 is supported")

    x = jnp.transpose(x_nchw, (0, 2, 3, 1)).astype(jnp.float32)   # NCHW -> NHWC
    N, H, W, Cin = x.shape
    w1 = params["w1"]                                             # (3,3,Cin,Cout) HWIO
    Cout = w1.shape[-1]
    proj = (stride != 1) or (Cin != Cout)
    count = float(N * H * W)

    assert N % _TILE_N == 0
    n_tiles = N // _TILE_N
    grid = (n_tiles,)

    # Flatten + cast conv weights once; row order (kh, kw, cin) matches the
    # in-kernel im2col concatenation order.
    w1_flat = w1.reshape(9 * Cin, Cout).astype(jnp.bfloat16)
    w2_flat = params["w2"].reshape(9 * Cout, Cout).astype(jnp.bfloat16)

    act_shape = (N, H, W, Cout)
    act_sd = jax.ShapeDtypeStruct(act_shape, jnp.float32)
    st_sd = jax.ShapeDtypeStruct((n_tiles, 2, 1, Cout), jnp.float32)

    # ----- stage 1: conv1 (+ 1x1 projection) + BN partial stats ------------ #
    s1_inputs = [x, w1_flat]
    s1_in_specs = [_tile_spec(x.shape, _TILE_N), _rep_spec(w1_flat.shape)]
    s1_out_shape = [act_sd, st_sd]
    s1_out_specs = [_tile_spec(act_shape, _TILE_N), _stats_spec(Cout)]
    if proj:
        ws = params["ws"].astype(jnp.bfloat16)
        s1_inputs.append(ws)
        s1_in_specs.append(_rep_spec(ws.shape))
        s1_out_shape += [act_sd, st_sd]
        s1_out_specs += [_tile_spec(act_shape, _TILE_N), _stats_spec(Cout)]

    s1_outs = pl.pallas_call(
        functools.partial(_stage1_kernel, proj=proj),
        out_shape=tuple(s1_out_shape),
        grid_spec=pltpu.PrefetchScalarGridSpec(
            num_scalar_prefetch=0, grid=grid,
            in_specs=s1_in_specs, out_specs=s1_out_specs),
        compiler_params=_COMPILER_PARAMS,
    )(*s1_inputs)

    if proj:
        y1, st1, sc, sts = s1_outs
        a_s, b_s = _finalize_bn(sts, params["gs"], params["bs"], count, _EPS)
    else:
        y1, st1 = s1_outs
        sc = x                                                   # identity shortcut
        a_s = jnp.ones((1, Cout), jnp.float32)
        b_s = jnp.zeros((1, Cout), jnp.float32)

    a1, b1 = _finalize_bn(st1, params["g1"], params["b1"], count, _EPS)

    # ----- stage 2: BN1-apply + ReLU + conv2 + BN2 partial stats ----------- #
    y2, st2 = pl.pallas_call(
        _stage2_kernel,
        out_shape=(act_sd, st_sd),
        grid_spec=pltpu.PrefetchScalarGridSpec(
            num_scalar_prefetch=0, grid=grid,
            in_specs=[_tile_spec(act_shape, _TILE_N), _rep_spec(w2_flat.shape),
                      _rep_spec(a1.shape), _rep_spec(b1.shape)],
            out_specs=[_tile_spec(act_shape, _TILE_N), _stats_spec(Cout)]),
        compiler_params=_COMPILER_PARAMS,
    )(y1, w2_flat, a1, b1)

    a2, b2 = _finalize_bn(st2, params["g2"], params["b2"], count, _EPS)

    # ----- stage 3: BN2-apply + shortcut BN + add + ReLU ------------------- #
    out_nhwc = pl.pallas_call(
        _stage3_kernel,
        out_shape=act_sd,
        grid_spec=pltpu.PrefetchScalarGridSpec(
            num_scalar_prefetch=0, grid=grid,
            in_specs=[_tile_spec(act_shape, _TILE_N),
                      _tile_spec(act_shape, _TILE_N),
                      _rep_spec(a2.shape), _rep_spec(b2.shape),
                      _rep_spec(a_s.shape), _rep_spec(b_s.shape)],
            out_specs=_tile_spec(act_shape, _TILE_N)),
        compiler_params=_COMPILER_PARAMS,
    )(y2, sc, a2, b2, a_s, b_s)

    return jnp.transpose(out_nhwc, (0, 3, 1, 2))                  # NHWC -> NCHW


# --------------------------------------------------------------------------- #
# Params + pure-JAX reference (mirrors the PyTorch forward)
# --------------------------------------------------------------------------- #
def init_params(key, cin, cout):
    ks = jax.random.split(key, 9)
    scale = 0.1
    return {
        "w1": scale * jax.random.normal(ks[0], (3, 3, cin, cout), jnp.float32),
        "w2": scale * jax.random.normal(ks[1], (3, 3, cout, cout), jnp.float32),
        "ws": scale * jax.random.normal(ks[2], (cin, cout), jnp.float32),  # 1x1 proj
        "g1": jax.random.uniform(ks[3], (1, cout), jnp.float32, 0.5, 1.5),
        "b1": 0.1 * jax.random.normal(ks[4], (1, cout), jnp.float32),
        "g2": jax.random.uniform(ks[5], (1, cout), jnp.float32, 0.5, 1.5),
        "b2": 0.1 * jax.random.normal(ks[6], (1, cout), jnp.float32),
        "gs": jax.random.uniform(ks[7], (1, cout), jnp.float32, 0.5, 1.5),
        "bs": 0.1 * jax.random.normal(ks[8], (1, cout), jnp.float32),
    }


def _bn_ref(x, gamma, beta, eps):
    mean = jnp.mean(x, axis=(0, 1, 2), keepdims=True)
    var = jnp.mean(jnp.square(x - mean), axis=(0, 1, 2), keepdims=True)
    return (x - mean) * jax.lax.rsqrt(var + eps) * gamma + beta


def reference_forward(x_nchw, params, eps=_EPS):
    x = jnp.transpose(x_nchw, (0, 2, 3, 1)).astype(jnp.float32)

    def conv(h, w, pad):
        return jax.lax.conv_general_dilated(
            h, w, window_strides=(1, 1), padding=((pad, pad), (pad, pad)),
            dimension_numbers=("NHWC", "HWIO", "NHWC"))

    h = jnp.maximum(_bn_ref(conv(x, params["w1"], 1), params["g1"], params["b1"], eps), 0.0)
    h = _bn_ref(conv(h, params["w2"], 1), params["g2"], params["b2"], eps)
    cin, cout = params["ws"].shape
    if cin != cout:
        s = conv(x, params["ws"].reshape(1, 1, cin, cout), 0)
        s = _bn_ref(s, params["gs"], params["bs"], eps)
    else:
        s = x
    out = jnp.maximum(h + s, 0.0)
    return jnp.transpose(out, (0, 3, 1, 2))


if __name__ == "__main__":
    key = jax.random.PRNGKey(0)
    kx1, kp1, kx2, kp2 = jax.random.split(key, 4)
    run = jax.jit(residual_block_forward)

    # Projection shortcut path (Cin != Cout) — matches the spec's non-identity case.
    N, Cin, Cout, H, W = 2, 4, 8, 16, 16
    x1 = jax.random.normal(kx1, (N, Cin, H, W), jnp.float32)
    p1 = init_params(kp1, Cin, Cout)
    out1 = jax.block_until_ready(run(x1, p1))
    ref1 = reference_forward(x1, p1)
    assert out1.shape == (N, Cout, H, W), out1.shape
    err1 = float(jnp.max(jnp.abs(out1 - ref1)))
    # bf16 MXU operands -> tolerance slightly looser than a pure-f32 compare.
    if not bool(jnp.allclose(out1, ref1, atol=2e-2, rtol=2e-2)):
        raise AssertionError(f"projection path mismatch vs reference, max abs err={err1}")

    # Identity shortcut path (Cin == Cout).
    x2 = jax.random.normal(kx2, (N, Cout, H, W), jnp.float32)
    p2 = init_params(kp2, Cout, Cout)
    out2 = jax.block_until_ready(run(x2, p2))
    ref2 = reference_forward(x2, p2)
    err2 = float(jnp.max(jnp.abs(out2 - ref2)))
    if not bool(jnp.allclose(out2, ref2, atol=2e-2, rtol=2e-2)):
        raise AssertionError(f"identity path mismatch vs reference, max abs err={err2}")

    print("KERNEL_OK")
</pallas_src>

<mosaic_0001>
module attributes {stable_mosaic.version = 11 : i64} {
  func.func @_stage1_kernel(%arg0: i32, %arg1: memref<1x16x16x4xf32, #tpu.memory_space<vmem>>, %arg2: memref<36x8xbf16, #tpu.memory_space<vmem>>, %arg3: memref<4x8xbf16, #tpu.memory_space<vmem>>, %arg4: memref<1x16x16x8xf32, #tpu.memory_space<vmem>>, %arg5: memref<1x2x1x8xf32, #tpu.memory_space<vmem>>, %arg6: memref<1x16x16x8xf32, #tpu.memory_space<vmem>>, %arg7: memref<1x2x1x8xf32, #tpu.memory_space<vmem>>) attributes {dimension_semantics = [#tpu.dimension_semantics<parallel>], iteration_bounds = array<i64: 2>, scalar_prefetch = 0 : i64, scratch_operands = 0 : i64, tpu.core_type = #tpu.core_type<tc>, window_params = [{transform_indices = @transform_0, window_bounds = array<i64: 1, 16, 16, 4>}, {pipeline_mode = #tpu.pipeline_mode<synchronous>, transform_indices = @transform_1, window_bounds = array<i64: 36, 8>}, {pipeline_mode = #tpu.pipeline_mode<synchronous>, transform_indices = @transform_2, window_bounds = array<i64: 4, 8>}, {transform_indices = @transform_3, window_bounds = array<i64: 1, 16, 16, 8>}, {transform_indices = @transform_4, window_bounds = array<i64: 1, 2, 1, 8>}, {transform_indices = @transform_5, window_bounds = array<i64: 1, 16, 16, 8>}, {transform_indices = @transform_6, window_bounds = array<i64: 1, 2, 1, 8>}]} {
    %c0 = arith.constant 0 : index
    %c0_0 = arith.constant 0 : index
    %c0_1 = arith.constant 0 : index
    %c0_2 = arith.constant 0 : index
    %0 = vector.load %arg1[%c0, %c0_0, %c0_1, %c0_2] : memref<1x16x16x4xf32, #tpu.memory_space<vmem>>, vector<1x16x16x4xf32>
    %1 = tpu.iota {dimensions = array<i32: 2>} : vector<1x1x16x1xi32>
    %c1_i32 = arith.constant 1 : i32
    %2 = vector.broadcast %c1_i32 : i32 to vector<1x1x16x1xi32>
    %3 = arith.cmpi sge, %1, %2 : vector<1x1x16x1xi32>
    %c15_i32 = arith.constant 15 : i32
    %4 = vector.broadcast %c15_i32 : i32 to vector<1x1x16x1xi32>
    %5 = arith.cmpi slt, %1, %4 : vector<1x1x16x1xi32>
    %c0_3 = arith.constant 0 : index
    %c0_4 = arith.constant 0 : index
    %6 = vector.load %arg2[%c0_3, %c0_4] : memref<36x8xbf16, #tpu.memory_space<vmem>>, vector<36x8xbf16>
    %cst = arith.constant 0.000000e+00 : f32
    %7 = vector.broadcast %cst : f32 to vector<1x1x16x4xf32>
    %8 = vector.extract_strided_slice %0 {offsets = [0, 0, 0, 0], sizes = [1, 15, 16, 4], strides = [1, 1, 1, 1]} : vector<1x16x16x4xf32> to vector<1x15x16x4xf32>
    %9 = tpu.concatenate %7, %8 in 1 : vector<1x1x16x4xf32>, vector<1x15x16x4xf32> -> vector<1x16x16x4xf32>
    %c1_i32_5 = arith.constant 1 : i32
    %10 = tpu.dynamic_rotate %9 by %c1_i32_5 dim 2 : vector<1x16x16x4xf32>, i32 -> vector<1x16x16x4xf32>
    %cst_6 = arith.constant 0.000000e+00 : f32
    %11 = vector.shape_cast %3 : vector<1x1x16x1xi1> to vector<1x1x16x1xi1>
    %12 = vector.broadcast %11 : vector<1x1x16x1xi1> to vector<1x16x16x4xi1>
    %13 = vector.broadcast %cst_6 : f32 to vector<1x16x16x4xf32>
    %14 = arith.select %12, %10, %13 : vector<1x16x16x4xi1>, vector<1x16x16x4xf32>
    %15 = arith.truncf %14 : vector<1x16x16x4xf32> to vector<1x16x16x4xbf16>
    %cst_7 = arith.constant 0.000000e+00 : f32
    %16 = vector.broadcast %cst_7 : f32 to vector<1x1x16x4xf32>
    %17 = vector.extract_strided_slice %0 {offsets = [0, 0, 0, 0], sizes = [1, 15, 16, 4], strides = [1, 1, 1, 1]} : vector<1x16x16x4xf32> to vector<1x15x16x4xf32>
    %18 = tpu.concatenate %16, %17 in 1 : vector<1x1x16x4xf32>, vector<1x15x16x4xf32> -> vector<1x16x16x4xf32>
    %19 = arith.truncf %18 : vector<1x16x16x4xf32> to vector<1x16x16x4xbf16>
    %cst_8 = arith.constant 0.000000e+00 : f32
    %20 = vector.broadcast %cst_8 : f32 to vector<1x1x16x4xf32>
    %21 = vector.extract_strided_slice %0 {offsets = [0, 0, 0, 0], sizes = [1, 15, 16, 4], strides = [1, 1, 1, 1]} : vector<1x16x16x4xf32> to vector<1x15x16x4xf32>
    %22 = tpu.concatenate %20, %21 in 1 : vector<1x1x16x4xf32>, vector<1x15x16x4xf32> -> vector<1x16x16x4xf32>
    %c15_i32_9 = arith.constant 15 : i32
    %23 = tpu.dynamic_rotate %22 by %c15_i32_9 dim 2 : vector<1x16x16x4xf32>, i32 -> vector<1x16x16x4xf32>
    %cst_10 = arith.constant 0.000000e+00 : f32
    %24 = vector.shape_cast %5 : vector<1x1x16x1xi1> to vector<1x1x16x1xi1>
    %25 = vector.broadcast %24 : vector<1x1x16x1xi1> to vector<1x16x16x4xi1>
    %26 = vector.broadcast %cst_10 : f32 to vector<1x16x16x4xf32>
    %27 = arith.select %25, %23, %26 : vector<1x16x16x4xi1>, vector<1x16x16x4xf32>
    %28 = arith.truncf %27 : vector<1x16x16x4xf32> to vector<1x16x16x4xbf16>
    %c1_i32_11 = arith.constant 1 : i32
    %29 = tpu.dynamic_rotate %0 by %c1_i32_11 dim 2 : vector<1x16x16x4xf32>, i32 -> vector<1x16x16x4xf32>
    %cst_12 = arith.constant 0.000000e+00 : f32
    %30 = vector.shape_cast %3 : vector<1x1x16x1xi1> to vector<1x1x16x1xi1>
    %31 = vector.broadcast %30 : vector<1x1x16x1xi1> to vector<1x16x16x4xi1>
    %32 = vector.broadcast %cst_12 : f32 to vector<1x16x16x4xf32>
    %33 = arith.select %31, %29, %32 : vector<1x16x16x4xi1>, vector<1x16x16x4xf32>
    %34 = arith.truncf %33 : vector<1x16x16x4xf32> to vector<1x16x16x4xbf16>
    %35 = arith.truncf %0 : vector<1x16x16x4xf32> to vector<1x16x16x4xbf16>
    %c15_i32_13 = arith.constant 15 : i32
    %36 = tpu.dynamic_rotate %0 by %c15_i32_13 dim 2 : vector<1x16x16x4xf32>, i32 -> vector<1x16x16x4xf32>
    %cst_14 = arith.constant 0.000000e+00 : f32
    %37 = vector.shape_cast %5 : vector<1x1x16x1xi1> to vector<1x1x16x1xi1>
    %38 = vector.broadcast %37 : vector<1x1x16x1xi1> to vector<1x16x16x4xi1>
    %39 = vector.broadcast %cst_14 : f32 to vector<1x16x16x4xf32>
    %40 = arith.select %38, %36, %39 : vector<1x16x16x4xi1>, vector<1x16x16x4xf32>
    %41 = arith.truncf %40 : vector<1x16x16x4xf32> to vector<1x16x16x4xbf16>
    %cst_15 = arith.constant 0.000000e+00 : f32
    %42 = vector.broadcast %cst_15 : f32 to vector<1x1x16x4xf32>
    %43 = vector.extract_strided_slice %0 {offsets = [0, 1, 0, 0], sizes = [1, 15, 16, 4], strides = [1, 1, 1, 1]} : vector<1x16x16x4xf32> to vector<1x15x16x4xf32>
    %44 = tpu.concatenate %43, %42 in 1 : vector<1x15x16x4xf32>, vector<1x1x16x4xf32> -> vector<1x16x16x4xf32>
    %c1_i32_16 = arith.constant 1 : i32
    %45 = tpu.dynamic_rotate %44 by %c1_i32_16 dim 2 : vector<1x16x16x4xf32>, i32 -> vector<1x16x16x4xf32>
    %cst_17 = arith.constant 0.000000e+00 : f32
    %46 = vector.shape_cast %3 : vector<1x1x16x1xi1> to vector<1x1x16x1xi1>
    %47 = vector.broadcast %46 : vector<1x1x16x1xi1> to vector<1x16x16x4xi1>
    %48 = vector.broadcast %cst_17 : f32 to vector<1x16x16x4xf32>
    %49 = arith.select %47, %45, %48 : vector<1x16x16x4xi1>, vector<1x16x16x4xf32>
    %50 = arith.truncf %49 : vector<1x16x16x4xf32> to vector<1x16x16x4xbf16>
    %cst_18 = arith.constant 0.000000e+00 : f32
    %51 = vector.broadcast %cst_18 : f32 to vector<1x1x16x4xf32>
    %52 = vector.extract_strided_slice %0 {offsets = [0, 1, 0, 0], sizes = [1, 15, 16, 4], strides = [1, 1, 1, 1]} : vector<1x16x16x4xf32> to vector<1x15x16x4xf32>
    %53 = tpu.concatenate %52, %51 in 1 : vector<1x15x16x4xf32>, vector<1x1x16x4xf32> -> vector<1x16x16x4xf32>
    %54 = arith.truncf %53 : vector<1x16x16x4xf32> to vector<1x16x16x4xbf16>
    %cst_19 = arith.constant 0.000000e+00 : f32
    %55 = vector.broadcast %cst_19 : f32 to vector<1x1x16x4xf32>
    %56 = vector.extract_strided_slice %0 {offsets = [0, 1, 0, 0], sizes = [1, 15, 16, 4], strides = [1, 1, 1, 1]} : vector<1x16x16x4xf32> to vector<1x15x16x4xf32>
    %57 = tpu.concatenate %56, %55 in 1 : vector<1x15x16x4xf32>, vector<1x1x16x4xf32> -> vector<1x16x16x4xf32>
    %c15_i32_20 = arith.constant 15 : i32
    %58 = tpu.dynamic_rotate %57 by %c15_i32_20 dim 2 : vector<1x16x16x4xf32>, i32 -> vector<1x16x16x4xf32>
    %cst_21 = arith.constant 0.000000e+00 : f32
    %59 = vector.shape_cast %5 : vector<1x1x16x1xi1> to vector<1x1x16x1xi1>
    %60 = vector.broadcast %59 : vector<1x1x16x1xi1> to vector<1x16x16x4xi1>
    %61 = vector.broadcast %cst_21 : f32 to vector<1x16x16x4xf32>
    %62 = arith.select %60, %58, %61 : vector<1x16x16x4xi1>, vector<1x16x16x4xf32>
    %63 = arith.truncf %62 : vector<1x16x16x4xf32> to vector<1x16x16x4xbf16>
    %64 = tpu.concatenate %15, %19, %28, %34, %35, %41, %50, %54, %63 in 3 : vector<1x16x16x4xbf16>, vector<1x16x16x4xbf16>, vector<1x16x16x4xbf16>, vector<1x16x16x4xbf16>, vector<1x16x16x4xbf16>, vector<1x16x16x4xbf16>, vector<1x16x16x4xbf16>, vector<1x16x16x4xbf16>, vector<1x16x16x4xbf16> -> vector<1x16x16x36xbf16>
    %65 = vector.shape_cast %64 : vector<1x16x16x36xbf16> to vector<256x36xbf16>
    %cst_22 = arith.constant dense<0.000000e+00> : vector<256x8xf32>
    %66 = tpu.matmul %65, %6, %cst_22 {dimension_numbers = #tpu.dot_dimension_numbers<[1], [0], [0], [1], [0, 0, 1, 1], [], []>} : vector<256x36xbf16>, vector<36x8xbf16>, vector<256x8xf32> -> vector<256x8xf32>
    %67 = vector.shape_cast %66 : vector<256x8xf32> to vector<1x16x16x8xf32>
    %c0_23 = arith.constant 0 : index
    %c0_24 = arith.constant 0 : index
    %c0_25 = arith.constant 0 : index
    %c0_26 = arith.constant 0 : index
    %68 = vector.load %arg4[%c0_23, %c0_24, %c0_25, %c0_26] : memref<1x16x16x8xf32, #tpu.memory_space<vmem>>, vector<1x16x16x8xf32>
    tpu.vector_store %arg4[%c0_23, %c0_24, %c0_25, %c0_26], %67 {strides = array<i32>} : memref<1x16x16x8xf32, #tpu.memory_space<vmem>>, vector<1x16x16x8xf32>,
    %cst_27 = arith.constant dense<0.000000e+00> : vector<8xf32>
    %69 = vector.multi_reduction <add>, %67, %cst_27 [0, 1, 2] : vector<1x16x16x8xf32> to vector<8xf32>
    %70 = vector.shape_cast %69 : vector<8xf32> to vector<1x1x1x8xf32>
    %71 = arith.mulf %67, %67 : vector<1x16x16x8xf32>
    %cst_28 = arith.constant dense<0.000000e+00> : vector<8xf32>
    %72 = vector.multi_reduction <add>, %71, %cst_28 [0, 1, 2] : vector<1x16x16x8xf32> to vector<8xf32>
    %73 = vector.shape_cast %72 : vector<8xf32> to vector<1x1x1x8xf32>
    %74 = tpu.concatenate %70, %73 in 1 : vector<1x1x1x8xf32>, vector<1x1x1x8xf32> -> vector<1x2x1x8xf32>
    %c0_29 = arith.constant 0 : index
    %c0_30 = arith.constant 0 : index
    %c0_31 = arith.constant 0 : index
    %c0_32 = arith.constant 0 : index
    %75 = vector.load %arg5[%c0_29, %c0_30, %c0_31, %c0_32] : memref<1x2x1x8xf32, #tpu.memory_space<vmem>>, vector<1x2x1x8xf32>
    tpu.vector_store %arg5[%c0_29, %c0_30, %c0_31, %c0_32], %74 {strides = array<i32>} : memref<1x2x1x8xf32, #tpu.memory_space<vmem>>, vector<1x2x1x8xf32>,
    %76 = vector.shape_cast %0 : vector<1x16x16x4xf32> to vector<256x4xf32>
    %77 = arith.truncf %76 : vector<256x4xf32> to vector<256x4xbf16>
    %c0_33 = arith.constant 0 : index
    %c0_34 = arith.constant 0 : index
    %78 = vector.load %arg3[%c0_33, %c0_34] : memref<4x8xbf16, #tpu.memory_space<vmem>>, vector<4x8xbf16>
    %cst_35 = arith.constant dense<0.000000e+00> : vector<256x8xf32>
    %79 = tpu.matmul %77, %78, %cst_35 {dimension_numbers = #tpu.dot_dimension_numbers<[1], [0], [0], [1], [0, 0, 1, 1], [], []>} : vector<256x4xbf16>, vector<4x8xbf16>, vector<256x8xf32> -> vector<256x8xf32>
    %80 = vector.shape_cast %79 : vector<256x8xf32> to vector<1x16x16x8xf32>
    %c0_36 = arith.constant 0 : index
    %c0_37 = arith.constant 0 : index
    %c0_38 = arith.constant 0 : index
    %c0_39 = arith.constant 0 : index
    %81 = vector.load %arg6[%c0_36, %c0_37, %c0_38, %c0_39] : memref<1x16x16x8xf32, #tpu.memory_space<vmem>>, vector<1x16x16x8xf32>
    tpu.vector_store %arg6[%c0_36, %c0_37, %c0_38, %c0_39], %80 {strides = array<i32>} : memref<1x16x16x8xf32, #tpu.memory_space<vmem>>, vector<1x16x16x8xf32>,
    %cst_40 = arith.constant dense<0.000000e+00> : vector<8xf32>
    %82 = vector.multi_reduction <add>, %80, %cst_40 [0, 1, 2] : vector<1x16x16x8xf32> to vector<8xf32>
    %83 = vector.shape_cast %82 : vector<8xf32> to vector<1x1x1x8xf32>
    %84 = arith.mulf %80, %80 : vector<1x16x16x8xf32>
    %cst_41 = arith.constant dense<0.000000e+00> : vector<8xf32>
    %85 = vector.multi_reduction <add>, %84, %cst_41 [0, 1, 2] : vector<1x16x16x8xf32> to vector<8xf32>
    %86 = vector.shape_cast %85 : vector<8xf32> to vector<1x1x1x8xf32>
    %87 = tpu.concatenate %83, %86 in 1 : vector<1x1x1x8xf32>, vector<1x1x1x8xf32> -> vector<1x2x1x8xf32>
    %c0_42 = arith.constant 0 : index
    %c0_43 = arith.constant 0 : index
    %c0_44 = arith.constant 0 : index
    %c0_45 = arith.constant 0 : index
    %88 = vector.load %arg7[%c0_42, %c0_43, %c0_44, %c0_45] : memref<1x2x1x8xf32, #tpu.memory_space<vmem>>, vector<1x2x1x8xf32>
    tpu.vector_store %arg7[%c0_42, %c0_43, %c0_44, %c0_45], %87 {strides = array<i32>} : memref<1x2x1x8xf32, #tpu.memory_space<vmem>>, vector<1x2x1x8xf32>,
    return
  }
  func.func @transform_0(%arg0: i32) -> (i32, i32, i32, i32) {
    %c0_i32 = arith.constant 0 : i32
    %c0_i32_0 = arith.constant 0 : i32
    %c0_i32_1 = arith.constant 0 : i32
    %c0_i32_2 = arith.constant 0 : i32
    return %arg0, %c0_i32, %c0_i32_0, %c0_i32_1 : i32, i32, i32, i32
  }
  func.func @transform_1(%arg0: i32) -> (i32, i32) {
    %c0_i32 = arith.constant 0 : i32
    %c0_i32_0 = arith.constant 0 : i32
    %c0_i32_1 = arith.constant 0 : i32
    return %c0_i32, %c0_i32_0 : i32, i32
  }
  func.func @transform_2(%arg0: i32) -> (i32, i32) {
    %c0_i32 = arith.constant 0 : i32
    %c0_i32_0 = arith.constant 0 : i32
    %c0_i32_1 = arith.constant 0 : i32
    return %c0_i32, %c0_i32_0 : i32, i32
  }
  func.func @transform_3(%arg0: i32) -> (i32, i32, i32, i32) {
    %c0_i32 = arith.constant 0 : i32
    %c0_i32_0 = arith.constant 0 : i32
    %c0_i32_1 = arith.constant 0 : i32
    %c0_i32_2 = arith.constant 0 : i32
    return %arg0, %c0_i32, %c0_i32_0, %c0_i32_1 : i32, i32, i32, i32
  }
  func.func @transform_4(%arg0: i32) -> (i32, i32, i32, i32) {
    %c0_i32 = arith.constant 0 : i32
    %c0_i32_0 = arith.constant 0 : i32
    %c0_i32_1 = arith.constant 0 : i32
    %c0_i32_2 = arith.constant 0 : i32
    return %arg0, %c0_i32, %c0_i32_0, %c0_i32_1 : i32, i32, i32, i32
  }
  func.func @transform_5(%arg0: i32) -> (i32, i32, i32, i32) {
    %c0_i32 = arith.constant 0 : i32
    %c0_i32_0 = arith.constant 0 : i32
    %c0_i32_1 = arith.constant 0 : i32
    %c0_i32_2 = arith.constant 0 : i32
    return %arg0, %c0_i32, %c0_i32_0, %c0_i32_1 : i32, i32, i32, i32
  }
  func.func @transform_6(%arg0: i32) -> (i32, i32, i32, i32) {
    %c0_i32 = arith.constant 0 : i32
    %c0_i32_0 = arith.constant 0 : i32
    %c0_i32_1 = arith.constant 0 : i32
    %c0_i32_2 = arith.constant 0 : i32
    return %arg0, %c0_i32, %c0_i32_0, %c0_i32_1 : i32, i32, i32, i32
  }
}

module attributes {stable_mosaic.version = 11 : i64} {
  func.func @_stage2_kernel(%arg0: i32, %arg1: memref<1x16x16x8xf32, #tpu.memory_space<vmem>>, %arg2: memref<72x8xbf16, #tpu.memory_space<vmem>>, %arg3: memref<1x8xf32, #tpu.memory_space<vmem>>, %arg4: memref<1x8xf32, #tpu.memory_space<vmem>>, %arg5: memref<1x16x16x8xf32, #tpu.memory_space<vmem>>, %arg6: memref<1x2x1x8xf32, #tpu.memory_space<vmem>>) attributes {dimension_semantics = [#tpu.dimension_semantics<parallel>], iteration_bounds = array<i64: 2>, scalar_prefetch = 0 : i64, scratch_operands = 0 : i64, tpu.core_type = #tpu.core_type<tc>, window_params = [{transform_indices = @transform_0, window_bounds = array<i64: 1, 16, 16, 8>}, {pipeline_mode = #tpu.pipeline_mode<synchronous>, transform_indices = @transform_1, window_bounds = array<i64: 72, 8>}, {pipeline_mode = #tpu.pipeline_mode<synchronous>, transform_indices = @transform_2, window_bounds = array<i64: 1, 8>}, {pipeline_mode = #tpu.pipeline_mode<synchronous>, transform_indices = @transform_3, window_bounds = array<i64: 1, 8>}, {transform_indices = @transform_4, window_bounds = array<i64: 1, 16, 16, 8>}, {transform_indices = @transform_5, window_bounds = array<i64: 1, 2, 1, 8>}]} {
    %c0 = arith.constant 0 : index
    %c0_0 = arith.constant 0 : index
    %c0_1 = arith.constant 0 : index
    %c0_2 = arith.constant 0 : index
    %0 = vector.load %arg1[%c0, %c0_0, %c0_1, %c0_2] : memref<1x16x16x8xf32, #tpu.memory_space<vmem>>, vector<1x16x16x8xf32>
    %c0_3 = arith.constant 0 : index
    %c0_4 = arith.constant 0 : index
    %1 = vector.load %arg3[%c0_3, %c0_4] : memref<1x8xf32, #tpu.memory_space<vmem>>, vector<1x8xf32>
    %2 = vector.shape_cast %1 : vector<1x8xf32> to vector<1x1x1x8xf32>
    %3 = vector.broadcast %2 : vector<1x1x1x8xf32> to vector<1x16x16x8xf32>
    %4 = arith.mulf %0, %3 : vector<1x16x16x8xf32>
    %c0_5 = arith.constant 0 : index
    %c0_6 = arith.constant 0 : index
    %5 = vector.load %arg4[%c0_5, %c0_6] : memref<1x8xf32, #tpu.memory_space<vmem>>, vector<1x8xf32>
    %6 = vector.shape_cast %5 : vector<1x8xf32> to vector<1x1x1x8xf32>
    %7 = vector.broadcast %6 : vector<1x1x1x8xf32> to vector<1x16x16x8xf32>
    %8 = arith.addf %4, %7 : vector<1x16x16x8xf32>
    %cst = arith.constant 0.000000e+00 : f32
    %9 = vector.broadcast %cst : f32 to vector<1x16x16x8xf32>
    %10 = arith.maximumf %8, %9 : vector<1x16x16x8xf32>
    %11 = tpu.iota {dimensions = array<i32: 2>} : vector<1x1x16x1xi32>
    %c1_i32 = arith.constant 1 : i32
    %12 = vector.broadcast %c1_i32 : i32 to vector<1x1x16x1xi32>
    %13 = arith.cmpi sge, %11, %12 : vector<1x1x16x1xi32>
    %c15_i32 = arith.constant 15 : i32
    %14 = vector.broadcast %c15_i32 : i32 to vector<1x1x16x1xi32>
    %15 = arith.cmpi slt, %11, %14 : vector<1x1x16x1xi32>
    %c0_7 = arith.constant 0 : index
    %c0_8 = arith.constant 0 : index
    %16 = vector.load %arg2[%c0_7, %c0_8] : memref<72x8xbf16, #tpu.memory_space<vmem>>, vector<72x8xbf16>
    %cst_9 = arith.constant 0.000000e+00 : f32
    %17 = vector.broadcast %cst_9 : f32 to vector<1x1x16x8xf32>
    %18 = vector.extract_strided_slice %10 {offsets = [0, 0, 0, 0], sizes = [1, 15, 16, 8], strides = [1, 1, 1, 1]} : vector<1x16x16x8xf32> to vector<1x15x16x8xf32>
    %19 = tpu.concatenate %17, %18 in 1 : vector<1x1x16x8xf32>, vector<1x15x16x8xf32> -> vector<1x16x16x8xf32>
    %c1_i32_10 = arith.constant 1 : i32
    %20 = tpu.dynamic_rotate %19 by %c1_i32_10 dim 2 : vector<1x16x16x8xf32>, i32 -> vector<1x16x16x8xf32>
    %cst_11 = arith.constant 0.000000e+00 : f32
    %21 = vector.shape_cast %13 : vector<1x1x16x1xi1> to vector<1x1x16x1xi1>
    %22 = vector.broadcast %21 : vector<1x1x16x1xi1> to vector<1x16x16x8xi1>
    %23 = vector.broadcast %cst_11 : f32 to vector<1x16x16x8xf32>
    %24 = arith.select %22, %20, %23 : vector<1x16x16x8xi1>, vector<1x16x16x8xf32>
    %25 = arith.truncf %24 : vector<1x16x16x8xf32> to vector<1x16x16x8xbf16>
    %cst_12 = arith.constant 0.000000e+00 : f32
    %26 = vector.broadcast %cst_12 : f32 to vector<1x1x16x8xf32>
    %27 = vector.extract_strided_slice %10 {offsets = [0, 0, 0, 0], sizes = [1, 15, 16, 8], strides = [1, 1, 1, 1]} : vector<1x16x16x8xf32> to vector<1x15x16x8xf32>
    %28 = tpu.concatenate %26, %27 in 1 : vector<1x1x16x8xf32>, vector<1x15x16x8xf32> -> vector<1x16x16x8xf32>
    %29 = arith.truncf %28 : vector<1x16x16x8xf32> to vector<1x16x16x8xbf16>
    %cst_13 = arith.constant 0.000000e+00 : f32
    %30 = vector.broadcast %cst_13 : f32 to vector<1x1x16x8xf32>
    %31 = vector.extract_strided_slice %10 {offsets = [0, 0, 0, 0], sizes = [1, 15, 16, 8], strides = [1, 1, 1, 1]} : vector<1x16x16x8xf32> to vector<1x15x16x8xf32>
    %32 = tpu.concatenate %30, %31 in 1 : vector<1x1x16x8xf32>, vector<1x15x16x8xf32> -> vector<1x16x16x8xf32>
    %c15_i32_14 = arith.constant 15 : i32
    %33 = tpu.dynamic_rotate %32 by %c15_i32_14 dim 2 : vector<1x16x16x8xf32>, i32 -> vector<1x16x16x8xf32>
    %cst_15 = arith.constant 0.000000e+00 : f32
    %34 = vector.shape_cast %15 : vector<1x1x16x1xi1> to vector<1x1x16x1xi1>
    %35 = vector.broadcast %34 : vector<1x1x16x1xi1> to vector<1x16x16x8xi1>
    %36 = vector.broadcast %cst_15 : f32 to vector<1x16x16x8xf32>
    %37 = arith.select %35, %33, %36 : vector<1x16x16x8xi1>, vector<1x16x16x8xf32>
    %38 = arith.truncf %37 : vector<1x16x16x8xf32> to vector<1x16x16x8xbf16>
    %c1_i32_16 = arith.constant 1 : i32
    %39 = tpu.dynamic_rotate %10 by %c1_i32_16 dim 2 : vector<1x16x16x8xf32>, i32 -> vector<1x16x16x8xf32>
    %cst_17 = arith.constant 0.000000e+00 : f32
    %40 = vector.shape_cast %13 : vector<1x1x16x1xi1> to vector<1x1x16x1xi1>
    %41 = vector.broadcast %40 : vector<1x1x16x1xi1> to vector<1x16x16x8xi1>
    %42 = vector.broadcast %cst_17 : f32 to vector<1x16x16x8xf32>
    %43 = arith.select %41, %39, %42 : vector<1x16x16x8xi1>, vector<1x16x16x8xf32>
    %44 = arith.truncf %43 : vector<1x16x16x8xf32> to vector<1x16x16x8xbf16>
    %45 = arith.truncf %10 : vector<1x16x16x8xf32> to vector<1x16x16x8xbf16>
    %c15_i32_18 = arith.constant 15 : i32
    %46 = tpu.dynamic_rotate %10 by %c15_i32_18 dim 2 : vector<1x16x16x8xf32>, i32 -> vector<1x16x16x8xf32>
    %cst_19 = arith.constant 0.000000e+00 : f32
    %47 = vector.shape_cast %15 : vector<1x1x16x1xi1> to vector<1x1x16x1xi1>
    %48 = vector.broadcast %47 : vector<1x1x16x1xi1> to vector<1x16x16x8xi1>
    %49 = vector.broadcast %cst_19 : f32 to vector<1x16x16x8xf32>
    %50 = arith.select %48, %46, %49 : vector<1x16x16x8xi1>, vector<1x16x16x8xf32>
    %51 = arith.truncf %50 : vector<1x16x16x8xf32> to vector<1x16x16x8xbf16>
    %cst_20 = arith.constant 0.000000e+00 : f32
    %52 = vector.broadcast %cst_20 : f32 to vector<1x1x16x8xf32>
    %53 = vector.extract_strided_slice %10 {offsets = [0, 1, 0, 0], sizes = [1, 15, 16, 8], strides = [1, 1, 1, 1]} : vector<1x16x16x8xf32> to vector<1x15x16x8xf32>
    %54 = tpu.concatenate %53, %52 in 1 : vector<1x15x16x8xf32>, vector<1x1x16x8xf32> -> vector<1x16x16x8xf32>
    %c1_i32_21 = arith.constant 1 : i32
    %55 = tpu.dynamic_rotate %54 by %c1_i32_21 dim 2 : vector<1x16x16x8xf32>, i32 -> vector<1x16x16x8xf32>
    %cst_22 = arith.constant 0.000000e+00 : f32
    %56 = vector.shape_cast %13 : vector<1x1x16x1xi1> to vector<1x1x16x1xi1>
    %57 = vector.broadcast %56 : vector<1x1x16x1xi1> to vector<1x16x16x8xi1>
    %58 = vector.broadcast %cst_22 : f32 to vector<1x16x16x8xf32>
    %59 = arith.select %57, %55, %58 : vector<1x16x16x8xi1>, vector<1x16x16x8xf32>
    %60 = arith.truncf %59 : vector<1x16x16x8xf32> to vector<1x16x16x8xbf16>
    %cst_23 = arith.constant 0.000000e+00 : f32
    %61 = vector.broadcast %cst_23 : f32 to vector<1x1x16x8xf32>
    %62 = vector.extract_strided_slice %10 {offsets = [0, 1, 0, 0], sizes = [1, 15, 16, 8], strides = [1, 1, 1, 1]} : vector<1x16x16x8xf32> to vector<1x15x16x8xf32>
    %63 = tpu.concatenate %62, %61 in 1 : vector<1x15x16x8xf32>, vector<1x1x16x8xf32> -> vector<1x16x16x8xf32>
    %64 = arith.truncf %63 : vector<1x16x16x8xf32> to vector<1x16x16x8xbf16>
    %cst_24 = arith.constant 0.000000e+00 : f32
    %65 = vector.broadcast %cst_24 : f32 to vector<1x1x16x8xf32>
    %66 = vector.extract_strided_slice %10 {offsets = [0, 1, 0, 0], sizes = [1, 15, 16, 8], strides = [1, 1, 1, 1]} : vector<1x16x16x8xf32> to vector<1x15x16x8xf32>
    %67 = tpu.concatenate %66, %65 in 1 : vector<1x15x16x8xf32>, vector<1x1x16x8xf32> -> vector<1x16x16x8xf32>
    %c15_i32_25 = arith.constant 15 : i32
    %68 = tpu.dynamic_rotate %67 by %c15_i32_25 dim 2 : vector<1x16x16x8xf32>, i32 -> vector<1x16x16x8xf32>
    %cst_26 = arith.constant 0.000000e+00 : f32
    %69 = vector.shape_cast %15 : vector<1x1x16x1xi1> to vector<1x1x16x1xi1>
    %70 = vector.broadcast %69 : vector<1x1x16x1xi1> to vector<1x16x16x8xi1>
    %71 = vector.broadcast %cst_26 : f32 to vector<1x16x16x8xf32>
    %72 = arith.select %70, %68, %71 : vector<1x16x16x8xi1>, vector<1x16x16x8xf32>
    %73 = arith.truncf %72 : vector<1x16x16x8xf32> to vector<1x16x16x8xbf16>
    %74 = tpu.concatenate %25, %29, %38, %44, %45, %51, %60, %64, %73 in 3 : vector<1x16x16x8xbf16>, vector<1x16x16x8xbf16>, vector<1x16x16x8xbf16>, vector<1x16x16x8xbf16>, vector<1x16x16x8xbf16>, vector<1x16x16x8xbf16>, vector<1x16x16x8xbf16>, vector<1x16x16x8xbf16>, vector<1x16x16x8xbf16> -> vector<1x16x16x72xbf16>
    %75 = vector.shape_cast %74 : vector<1x16x16x72xbf16> to vector<256x72xbf16>
    %cst_27 = arith.constant dense<0.000000e+00> : vector<256x8xf32>
    %76 = tpu.matmul %75, %16, %cst_27 {dimension_numbers = #tpu.dot_dimension_numbers<[1], [0], [0], [1], [0, 0, 1, 1], [], []>} : vector<256x72xbf16>, vector<72x8xbf16>, vector<256x8xf32> -> vector<256x8xf32>
    %77 = vector.shape_cast %76 : vector<256x8xf32> to vector<1x16x16x8xf32>
    %c0_28 = arith.constant 0 : index
    %c0_29 = arith.constant 0 : index
    %c0_30 = arith.constant 0 : index
    %c0_31 = arith.constant 0 : index
    %78 = vector.load %arg5[%c0_28, %c0_29, %c0_30, %c0_31] : memref<1x16x16x8xf32, #tpu.memory_space<vmem>>, vector<1x16x16x8xf32>
    tpu.vector_store %arg5[%c0_28, %c0_29, %c0_30, %c0_31], %77 {strides = array<i32>} : memref<1x16x16x8xf32, #tpu.memory_space<vmem>>, vector<1x16x16x8xf32>,
    %cst_32 = arith.constant dense<0.000000e+00> : vector<8xf32>
    %79 = vector.multi_reduction <add>, %77, %cst_32 [0, 1, 2] : vector<1x16x16x8xf32> to vector<8xf32>
    %80 = vector.shape_cast %79 : vector<8xf32> to vector<1x1x1x8xf32>
    %81 = arith.mulf %77, %77 : vector<1x16x16x8xf32>
    %cst_33 = arith.constant dense<0.000000e+00> : vector<8xf32>
    %82 = vector.multi_reduction <add>, %81, %cst_33 [0, 1, 2] : vector<1x16x16x8xf32> to vector<8xf32>
    %83 = vector.shape_cast %82 : vector<8xf32> to vector<1x1x1x8xf32>
    %84 = tpu.concatenate %80, %83 in 1 : vector<1x1x1x8xf32>, vector<1x1x1x8xf32> -> vector<1x2x1x8xf32>
    %c0_34 = arith.constant 0 : index
    %c0_35 = arith.constant 0 : index
    %c0_36 = arith.constant 0 : index
    %c0_37 = arith.constant 0 : index
    %85 = vector.load %arg6[%c0_34, %c0_35, %c0_36, %c0_37] : memref<1x2x1x8xf32, #tpu.memory_space<vmem>>, vector<1x2x1x8xf32>
    tpu.vector_store %arg6[%c0_34, %c0_35, %c0_36, %c0_37], %84 {strides = array<i32>} : memref<1x2x1x8xf32, #tpu.memory_space<vmem>>, vector<1x2x1x8xf32>,
    return
  }
  func.func @transform_0(%arg0: i32) -> (i32, i32, i32, i32) {
    %c0_i32 = arith.constant 0 : i32
    %c0_i32_0 = arith.constant 0 : i32
    %c0_i32_1 = arith.constant 0 : i32
    %c0_i32_2 = arith.constant 0 : i32
    return %arg0, %c0_i32, %c0_i32_0, %c0_i32_1 : i32, i32, i32, i32
  }
  func.func @transform_1(%arg0: i32) -> (i32, i32) {
    %c0_i32 = arith.constant 0 : i32
    %c0_i32_0 = arith.constant 0 : i32
    %c0_i32_1 = arith.constant 0 : i32
    return %c0_i32, %c0_i32_0 : i32, i32
  }
  func.func @transform_2(%arg0: i32) -> (i32, i32) {
    %c0_i32 = arith.constant 0 : i32
    %c0_i32_0 = arith.constant 0 : i32
    %c0_i32_1 = arith.constant 0 : i32
    return %c0_i32, %c0_i32_0 : i32, i32
  }
  func.func @transform_3(%arg0: i32) -> (i32, i32) {
    %c0_i32 = arith.constant 0 : i32
    %c0_i32_0 = arith.constant 0 : i32
    %c0_i32_1 = arith.constant 0 : i32
    return %c0_i32, %c0_i32_0 : i32, i32
  }
  func.func @transform_4(%arg0: i32) -> (i32, i32, i32, i32) {
    %c0_i32 = arith.constant 0 : i32
    %c0_i32_0 = arith.constant 0 : i32
    %c0_i32_1 = arith.constant 0 : i32
    %c0_i32_2 = arith.constant 0 : i32
    return %arg0, %c0_i32, %c0_i32_0, %c0_i32_1 : i32, i32, i32, i32
  }
  func.func @transform_5(%arg0: i32) -> (i32, i32, i32, i32) {
    %c0_i32 = arith.constant 0 : i32
    %c0_i32_0 = arith.constant 0 : i32
    %c0_i32_1 = arith.constant 0 : i32
    %c0_i32_2 = arith.constant 0 : i32
    return %arg0, %c0_i32, %c0_i32_0, %c0_i32_1 : i32, i32, i32, i32
  }
}

module attributes {stable_mosaic.version = 11 : i64} {
  func.func @_stage3_kernel(%arg0: i32, %arg1: memref<1x16x16x8xf32, #tpu.memory_space<vmem>>, %arg2: memref<1x16x16x8xf32, #tpu.memory_space<vmem>>, %arg3: memref<1x8xf32, #tpu.memory_space<vmem>>, %arg4: memref<1x8xf32, #tpu.memory_space<vmem>>, %arg5: memref<1x8xf32, #tpu.memory_space<vmem>>, %arg6: memref<1x8xf32, #tpu.memory_space<vmem>>, %arg7: memref<1x16x16x8xf32, #tpu.memory_space<vmem>>) attributes {dimension_semantics = [#tpu.dimension_semantics<parallel>], iteration_bounds = array<i64: 2>, scalar_prefetch = 0 : i64, scratch_operands = 0 : i64, tpu.core_type = #tpu.core_type<tc>, window_params = [{transform_indices = @transform_0, window_bounds = array<i64: 1, 16, 16, 8>}, {transform_indices = @transform_1, window_bounds = array<i64: 1, 16, 16, 8>}, {pipeline_mode = #tpu.pipeline_mode<synchronous>, transform_indices = @transform_2, window_bounds = array<i64: 1, 8>}, {pipeline_mode = #tpu.pipeline_mode<synchronous>, transform_indices = @transform_3, window_bounds = array<i64: 1, 8>}, {pipeline_mode = #tpu.pipeline_mode<synchronous>, transform_indices = @transform_4, window_bounds = array<i64: 1, 8>}, {pipeline_mode = #tpu.pipeline_mode<synchronous>, transform_indices = @transform_5, window_bounds = array<i64: 1, 8>}, {transform_indices = @transform_6, window_bounds = array<i64: 1, 16, 16, 8>}]} {
    %c0 = arith.constant 0 : index
    %c0_0 = arith.constant 0 : index
    %c0_1 = arith.constant 0 : index
    %c0_2 = arith.constant 0 : index
    %0 = vector.load %arg1[%c0, %c0_0, %c0_1, %c0_2] : memref<1x16x16x8xf32, #tpu.memory_space<vmem>>, vector<1x16x16x8xf32>
    %c0_3 = arith.constant 0 : index
    %c0_4 = arith.constant 0 : index
    %1 = vector.load %arg3[%c0_3, %c0_4] : memref<1x8xf32, #tpu.memory_space<vmem>>, vector<1x8xf32>
    %2 = vector.shape_cast %1 : vector<1x8xf32> to vector<1x1x1x8xf32>
    %3 = vector.broadcast %2 : vector<1x1x1x8xf32> to vector<1x16x16x8xf32>
    %4 = arith.mulf %0, %3 : vector<1x16x16x8xf32>
    %c0_5 = arith.constant 0 : index
    %c0_6 = arith.constant 0 : index
    %5 = vector.load %arg4[%c0_5, %c0_6] : memref<1x8xf32, #tpu.memory_space<vmem>>, vector<1x8xf32>
    %6 = vector.shape_cast %5 : vector<1x8xf32> to vector<1x1x1x8xf32>
    %7 = vector.broadcast %6 : vector<1x1x1x8xf32> to vector<1x16x16x8xf32>
    %8 = arith.addf %4, %7 : vector<1x16x16x8xf32>
    %c0_7 = arith.constant 0 : index
    %c0_8 = arith.constant 0 : index
    %c0_9 = arith.constant 0 : index
    %c0_10 = arith.constant 0 : index
    %9 = vector.load %arg2[%c0_7, %c0_8, %c0_9, %c0_10] : memref<1x16x16x8xf32, #tpu.memory_space<vmem>>, vector<1x16x16x8xf32>
    %c0_11 = arith.constant 0 : index
    %c0_12 = arith.constant 0 : index
    %10 = vector.load %arg5[%c0_11, %c0_12] : memref<1x8xf32, #tpu.memory_space<vmem>>, vector<1x8xf32>
    %11 = vector.shape_cast %10 : vector<1x8xf32> to vector<1x1x1x8xf32>
    %12 = vector.broadcast %11 : vector<1x1x1x8xf32> to vector<1x16x16x8xf32>
    %13 = arith.mulf %9, %12 : vector<1x16x16x8xf32>
    %14 = arith.addf %8, %13 : vector<1x16x16x8xf32>
    %c0_13 = arith.constant 0 : index
    %c0_14 = arith.constant 0 : index
    %15 = vector.load %arg6[%c0_13, %c0_14] : memref<1x8xf32, #tpu.memory_space<vmem>>, vector<1x8xf32>
    %16 = vector.shape_cast %15 : vector<1x8xf32> to vector<1x1x1x8xf32>
    %17 = vector.broadcast %16 : vector<1x1x1x8xf32> to vector<1x16x16x8xf32>
    %18 = arith.addf %14, %17 : vector<1x16x16x8xf32>
    %cst = arith.constant 0.000000e+00 : f32
    %19 = vector.broadcast %cst : f32 to vector<1x16x16x8xf32>
    %20 = arith.maximumf %18, %19 : vector<1x16x16x8xf32>
    %c0_15 = arith.constant 0 : index
    %c0_16 = arith.constant 0 : index
    %c0_17 = arith.constant 0 : index
    %c0_18 = arith.constant 0 : index
    %21 = vector.load %arg7[%c0_15, %c0_16, %c0_17, %c0_18] : memref<1x16x16x8xf32, #tpu.memory_space<vmem>>, vector<1x16x16x8xf32>
    tpu.vector_store %arg7[%c0_15, %c0_16, %c0_17, %c0_18], %20 {strides = array<i32>} : memref<1x16x16x8xf32, #tpu.memory_space<vmem>>, vector<1x16x16x8xf32>,
    return
  }
  func.func @transform_0(%arg0: i32) -> (i32, i32, i32, i32) {
    %c0_i32 = arith.constant 0 : i32
    %c0_i32_0 = arith.constant 0 : i32
    %c0_i32_1 = arith.constant 0 : i32
    %c0_i32_2 = arith.constant 0 : i32
    return %arg0, %c0_i32, %c0_i32_0, %c0_i32_1 : i32, i32, i32, i32
  }
  func.func @transform_1(%arg0: i32) -> (i32, i32, i32, i32) {
    %c0_i32 = arith.constant 0 : i32
    %c0_i32_0 = arith.constant 0 : i32
    %c0_i32_1 = arith.constant 0 : i32
    %c0_i32_2 = arith.constant 0 : i32
    return %arg0, %c0_i32, %c0_i32_0, %c0_i32_1 : i32, i32, i32, i32
  }
  func.func @transform_2(%arg0: i32) -> (i32, i32) {
    %c0_i32 = arith.constant 0 : i32
    %c0_i32_0 = arith.constant 0 : i32
    %c0_i32_1 = arith.constant 0 : i32
    return %c0_i32, %c0_i32_0 : i32, i32
  }
  func.func @transform_3(%arg0: i32) -> (i32, i32) {
    %c0_i32 = arith.constant 0 : i32
    %c0_i32_0 = arith.constant 0 : i32
    %c0_i32_1 = arith.constant 0 : i32
    return %c0_i32, %c0_i32_0 : i32, i32
  }
  func.func @transform_4(%arg0: i32) -> (i32, i32) {
    %c0_i32 = arith.constant 0 : i32
    %c0_i32_0 = arith.constant 0 : i32
    %c0_i32_1 = arith.constant 0 : i32
    return %c0_i32, %c0_i32_0 : i32, i32
  }
  func.func @transform_5(%arg0: i32) -> (i32, i32) {
    %c0_i32 = arith.constant 0 : i32
    %c0_i32_0 = arith.constant 0 : i32
    %c0_i32_1 = arith.constant 0 : i32
    return %c0_i32, %c0_i32_0 : i32, i32
  }
  func.func @transform_6(%arg0: i32) -> (i32, i32, i32, i32) {
    %c0_i32 = arith.constant 0 : i32
    %c0_i32_0 = arith.constant 0 : i32
    %c0_i32_1 = arith.constant 0 : i32
    %c0_i32_2 = arith.constant 0 : i32
    return %arg0, %c0_i32, %c0_i32_0, %c0_i32_1 : i32, i32, i32, i32
  }
}

</mosaic_0001>

<bundles_post_ra>
// kernel: residual_block_forward.5
= control target key start
LH: loop header
LB: loop body
LE: loop exit
PB: predicated region body
PF: predicated region fallthrough
CT: control target
= control target key end

     0   :  { %s727_s21 = smov 0   ;;  %s1034_s0 = inlined_call_operand.vmem [shape: f32[2,16,16,8], index: 0, kind: input, shape index: {}]   ;;  %s1035_s1 = inlined_call_operand.vmem [shape: f32[2,16,16,8], index: 1, kind: input, shape index: {}]   ;;  %s1036_s2 = inlined_call_operand.vmem [shape: f32[1,8], index: 2, kind: input, shape index: {}]   ;;  %s1037_s3 = inlined_call_operand.vmem [shape: f32[1,8], index: 3, kind: input, shape index: {}]   ;;  %s1038_s4 = inlined_call_operand.vmem [shape: f32[1,8], index: 4, kind: input, shape index: {}]   ;;  %s1039_s5 = inlined_call_operand.vmem [shape: f32[1,8], index: 5, kind: input, shape index: {}]   ;;  %s1040_s6 = inlined_call_operand.vmem [shape: f32[2,16,16,8], index: 6, kind: output, shape index: {}]  }
   0x1 LB: > { %s656_s22 = sadd.s32 4294967295, %s690_s21   ;;  %p660_p0 = scmp.ge.s32.totalorder %s690_s21, 1  ;;  %s690_s21 = sphi %s727_s21, %s16_s21  }
   0x2   : > { %p222_p1 = scmp.lt.s32.totalorder %s690_s21, 3 }
   0x4   : > { %p223_p2 = pnand %p660_p0, %p222_p1 }
   0x5   : > { %p257_p3 = scmp.lt.s32.totalorder (!%p223_p2), %s656_s22, 1 }
   0x6   : > { %226 = sbr.rel (%p223_p2) target bundleno = 70 (0x46), region = 44 }
   0xb   : > { %s1042_s22 = smov (!%p257_p3, %s656_s22), 1  ;;  %v740_v0 = vld [vmem:[%s1036_s2] ss:$0 sm:$0xff]  ;;  %vm556_vm0 = vcmask 64512  }
   0xc   : > { %s735_s23 = sshll.u32 %s1042_s22, 8  ;;  %v745_v1 = vld [vmem:[%s1038_s4] ss:$0 sm:$0xff] }
   0xd   : > { %s751_s30 = scalar_lea.vmem %s1034_s0, %s735_s23  ;;  %s757_s9 = scalar_lea.vmem %s1035_s1, %s735_s23  ;;  %v762_v2 = vld [vmem:[%s1037_s3] ss:$0 sm:$0xff] }
   0xe   : > { %v272_v3 = vld [vmem:[%s751_s30] sm:$0xff]  ;;  %v273_v5 = vld [vmem:[%s751_s30 + $0x8] sm:$0xff]  ;;  %v274_v10 = vld [vmem:[%s751_s30 + $0x10] sm:$0xff]  ;;  %s810_s16 = scalar_lea.vmem %s1040_s6, %s735_s23 }
   0xf   : > { %v382_v4 = vld [vmem:[%s757_s9] sm:$0xff]  ;;  %v311_v6 = vmul.f32 %v740_v0, %v272_v3  ;;  %v312_v8 = vmul.f32 %v740_v0, %v273_v5  ;;  %v383_v9 = vld [vmem:[%s757_s9 + $0x8] sm:$0xff]  ;;  %v384_v11 = vld [vmem:[%s757_s9 + $0x10] sm:$0xff]  ;;  %v313_v13 = vmul.f32 %v740_v0, %v274_v10 }
  0x10   : > { %v421_v7 = vmul.f32 %v745_v1, %v382_v4  ;;  %v422_v12 = vmul.f32 %v745_v1, %v383_v9  ;;  %v423_v14 = vmul.f32 %v745_v1, %v384_v11  ;;  %v275_v15 = vld [vmem:[%s751_s30 + $0x18] sm:$0xff]  ;;  %v276_v17 = vld [vmem:[%s751_s30 + $0x20] sm:$0xff]  ;;  %v277_v23 = vld [vmem:[%s751_s30 + $0x28] sm:$0xff] }
  0x11   : > { %v385_v16 = vld [vmem:[%s757_s9 + $0x18] sm:$0xff]  ;;  %v350_v18 = vadd.f32 %v762_v2, %v311_v6  ;;  %v351_v19 = vadd.f32 %v762_v2, %v312_v8  ;;  %v314_v20 = vmul.f32 %v740_v0, %v275_v15  ;;  %v386_v22 = vld [vmem:[%s757_s9 + $0x20] sm:$0xff]  ;;  %v387_v24 = vld [vmem:[%s757_s9 + $0x28] sm:$0xff]  ;;  %v352_v26 = vadd.f32 %v762_v2, %v313_v13 }
  0x12   : > { %v424_v21 = vmul.f32 %v745_v1, %v385_v16  ;;  %v789_v25 = vld [vmem:[%s1039_s5] ss:$0 sm:$0xff]  ;;  %v315_v27 = vmul.f32 %v740_v0, %v276_v17  ;;  %v425_v28 = vmul.f32 %v745_v1, %v386_v22  ;;  %v316_v29 = vmul.f32 %v740_v0, %v277_v23  ;;  %v278_v30 = vld [vmem:[%s751_s30 + $0x30] sm:$0xff]  ;;  %v279_v40 = vld [vmem:[%s751_s30 + $0x38] sm:$0xff] }
  0x13   : > { %v388_v31 = vld [vmem:[%s757_s9 + $0x30] sm:$0xff]  ;;  %v453_v32 = vadd.f32 %v421_v7, %v350_v18  ;;  %v454_v33 = vadd.f32 %v422_v12, %v351_v19  ;;  %v353_v34 = vadd.f32 %v762_v2, %v314_v20  ;;  %v426_v35 = vmul.f32 %v745_v1, %v387_v24  ;;  %v389_v49 = vld [vmem:[%s757_s9 + $0x38] sm:$0xff]  ;;  %v280_v50 = vld [vmem:[%s751_s30 + $0x40] sm:$0xff] }
  0x14   : > { %v455_v36 = vadd.f32 %v423_v14, %v352_v26  ;;  %v354_v37 = vadd.f32 %v762_v2, %v315_v27  ;;  %v355_v38 = vadd.f32 %v762_v2, %v316_v29  ;;  %v317_v39 = vmul.f32 %v740_v0, %v278_v30  ;;  %v390_v55 = vld [vmem:[%s757_s9 + $0x40] sm:$0xff]  ;;  %v281_v60 = vld [vmem:[%s751_s30 + $0x48] sm:$0xff]  ;;  %v282_v5 = vld [vmem:[%s751_s30 + $0x50] sm:$0xff] }
  0x15   : > { %v492_v41 = vadd.f32 %v789_v25, %v453_v32  ;;  %v493_v42 = vadd.f32 %v789_v25, %v454_v33  ;;  %v456_v43 = vadd.f32 %v424_v21, %v353_v34  ;;  %v427_v44 = vmul.f32 %v745_v1, %v388_v31  ;;  %v391_v61 = vld [vmem:[%s757_s9 + $0x48] sm:$0xff]  ;;  %v392_v6 = vld [vmem:[%s757_s9 + $0x50] sm:$0xff]  ;;  %v283_v7 = vld [vmem:[%s751_s30 + $0x58] sm:$0xff] }
  0x16   : > { %v494_v45 = vadd.f32 %v789_v25, %v455_v36  ;;  %v457_v46 = vadd.f32 %v425_v28, %v354_v37  ;;  %v458_v47 = vadd.f32 %v426_v35, %v355_v38  ;;  %v356_v48 = vadd.f32 %v762_v2, %v317_v39  ;;  %v393_v12 = vld [vmem:[%s757_s9 + $0x58] sm:$0xff]  ;;  %v284_v17 = vld [vmem:[%s751_s30 + $0x60] sm:$0xff]  ;;  %v285_v23 = vld [vmem:[%s751_s30 + $0x68] sm:$0xff] }
  0x17   : > { %v524_v51 = vmax.f32 %v492_v41, 0.0  ;;  %v525_v52 = vmax.f32 %v493_v42, 0.0  ;;  %v495_v53 = vadd.f32 %v789_v25, %v456_v43  ;;  %v318_v54 = vmul.f32 %v740_v0, %v279_v40  ;;  %v394_v18 = vld [vmem:[%s757_s9 + $0x60] sm:$0xff]  ;;  %v395_v29 = vld [vmem:[%s757_s9 + $0x68] sm:$0xff]  ;;  %v286_v34 = vld [vmem:[%s751_s30 + $0x70] sm:$0xff] }
  0x18   : > { %v526_v56 = vmax.f32 %v494_v45, 0.0  ;;  %v496_v57 = vadd.f32 %v789_v25, %v457_v46  ;;  %v497_v58 = vadd.f32 %v789_v25, %v458_v47  ;;  %v459_v59 = vadd.f32 %v427_v44, %v356_v48  ;;  %v396_v39 = vld [vmem:[%s757_s9 + $0x70] sm:$0xff]  ;;  %v287_v44 = vld [vmem:[%s751_s30 + $0x78] sm:$0xff] }
  0x19   : > { %557 = vst.msk [vmem:[%s810_s16] sm:$0xff] %vm556_vm0, %v524_v51  ;;  %558 = vst.msk [vmem:[%s810_s16 + $0x8] sm:$0xff] %vm556_vm0, %v525_v52  ;;  %v527_v62 = vmax.f32 %v495_v53, 0.0  ;;  %v357_v63 = vadd.f32 %v762_v2, %v318_v54  ;;  %v428_v3 = vmul.f32 %v745_v1, %v389_v49  ;;  %v319_v4 = vmul.f32 %v740_v0, %v280_v50  ;;  %v397_v49 = vld [vmem:[%s757_s9 + $0x78] sm:$0xff]  ;;  %v288_v54 = vld [vmem:[%s751_s30 + $0x80] sm:$0xff] }
  0x1a   : > { %559 = vst.msk [vmem:[%s810_s16 + $0x10] sm:$0xff] %vm556_vm0, %v526_v56  ;;  %v528_v8 = vmax.f32 %v496_v57, 0.0  ;;  %v529_v9 = vmax.f32 %v497_v58, 0.0  ;;  %v498_v10 = vadd.f32 %v789_v25, %v459_v59  ;;  %v429_v11 = vmul.f32 %v745_v1, %v390_v55  ;;  %v398_v59 = vld [vmem:[%s757_s9 + $0x80] sm:$0xff] }
  0x1b   : > { %560 = vst.msk [vmem:[%s810_s16 + $0x18] sm:$0xff] %vm556_vm0, %v527_v62  ;;  %v460_v13 = vadd.f32 %v428_v3, %v357_v63  ;;  %v358_v14 = vadd.f32 %v762_v2, %v319_v4  ;;  %v320_v15 = vmul.f32 %v740_v0, %v281_v60  ;;  %v430_v16 = vmul.f32 %v745_v1, %v391_v61  ;;  %v289_v60 = vld [vmem:[%s751_s30 + $0x88] sm:$0xff] }
  0x1c   : > { %561 = vst.msk [vmem:[%s810_s16 + $0x20] sm:$0xff] %vm556_vm0, %v528_v8  ;;  %562 = vst.msk [vmem:[%s810_s16 + $0x28] sm:$0xff] %vm556_vm0, %v529_v9  ;;  %v530_v19 = vmax.f32 %v498_v10, 0.0  ;;  %v321_v20 = vmul.f32 %v740_v0, %v282_v5  ;;  %v431_v21 = vmul.f32 %v745_v1, %v392_v6  ;;  %v322_v22 = vmul.f32 %v740_v0, %v283_v7  ;;  %v399_v61 = vld [vmem:[%s757_s9 + $0x88] sm:$0xff]  ;;  %v290_v9 = vld [vmem:[%s751_s30 + $0x90] sm:$0xff] }
  0x1d   : > { %v499_v24 = vadd.f32 %v789_v25, %v460_v13  ;;  %v461_v26 = vadd.f32 %v429_v11, %v358_v14  ;;  %v359_v27 = vadd.f32 %v762_v2, %v320_v15  ;;  %v432_v28 = vmul.f32 %v745_v1, %v393_v12  ;;  %v400_v10 = vld [vmem:[%s757_s9 + $0x90] sm:$0xff]  ;;  %v291_v11 = vld [vmem:[%s751_s30 + $0x98] sm:$0xff] }
  0x1e   : > { %563 = vst.msk [vmem:[%s810_s16 + $0x30] sm:$0xff] %vm556_vm0, %v530_v19  ;;  %v360_v30 = vadd.f32 %v762_v2, %v321_v20  ;;  %v361_v31 = vadd.f32 %v762_v2, %v322_v22  ;;  %v323_v32 = vmul.f32 %v740_v0, %v284_v17  ;;  %v433_v33 = vmul.f32 %v745_v1, %v394_v18 }
  0x1f   : > { %v531_v35 = vmax.f32 %v499_v24, 0.0  ;;  %v500_v36 = vadd.f32 %v789_v25, %v461_v26  ;;  %v462_v37 = vadd.f32 %v430_v16, %v359_v27  ;;  %v324_v38 = vmul.f32 %v740_v0, %v285_v23  ;;  %v401_v16 = vld [vmem:[%s757_s9 + $0x98] sm:$0xff]  ;;  %v402_v27 = vld [vmem:[%s757_s9 + $0xa0] sm:$0xff] }
  0x20   : > { %v463_v40 = vadd.f32 %v431_v21, %v360_v30  ;;  %v464_v41 = vadd.f32 %v432_v28, %v361_v31  ;;  %v362_v42 = vadd.f32 %v762_v2, %v323_v32  ;;  %v434_v43 = vmul.f32 %v745_v1, %v395_v29  ;;  %v292_v21 = vld [vmem:[%s751_s30 + $0xa0] sm:$0xff]  ;;  %v293_v28 = vld [vmem:[%s751_s30 + $0xa8] sm:$0xff] }
  0x21   : > { %564 = vst.msk [vmem:[%s810_s16 + $0x38] sm:$0xff] %vm556_vm0, %v531_v35  ;;  %v532_v45 = vmax.f32 %v500_v36, 0.0  ;;  %v501_v46 = vadd.f32 %v789_v25, %v462_v37  ;;  %v363_v47 = vadd.f32 %v762_v2, %v324_v38  ;;  %v325_v48 = vmul.f32 %v740_v0, %v286_v34  ;;  %v403_v37 = vld [vmem:[%s757_s9 + $0xa8] sm:$0xff]  ;;  %v294_v38 = vld [vmem:[%s751_s30 + $0xb0] sm:$0xff] }
  0x22   : > { %v502_v50 = vadd.f32 %v789_v25, %v463_v40  ;;  %v503_v51 = vadd.f32 %v789_v25, %v464_v41  ;;  %v465_v52 = vadd.f32 %v433_v33, %v362_v42  ;;  %v435_v53 = vmul.f32 %v745_v1, %v396_v39 }
  0x23   : > { %565 = vst.msk [vmem:[%s810_s16 + $0x40] sm:$0xff] %vm556_vm0, %v532_v45  ;;  %v533_v55 = vmax.f32 %v501_v46, 0.0  ;;  %v466_v56 = vadd.f32 %v434_v43, %v363_v47  ;;  %v364_v57 = vadd.f32 %v762_v2, %v325_v48  ;;  %v326_v58 = vmul.f32 %v740_v0, %v287_v44  ;;  %v404_v47 = vld [vmem:[%s757_s9 + $0xb0] sm:$0xff]  ;;  %v295_v48 = vld [vmem:[%s751_s30 + $0xb8] sm:$0xff] }
  0x24   : > { %v534_v62 = vmax.f32 %v502_v50, 0.0  ;;  %v535_v63 = vmax.f32 %v503_v51, 0.0  ;;  %v504_v3 = vadd.f32 %v789_v25, %v465_v52  ;;  %v436_v4 = vmul.f32 %v745_v1, %v397_v49 }
  0x25   : > { %566 = vst.msk [vmem:[%s810_s16 + $0x48] sm:$0xff] %vm556_vm0, %v533_v55  ;;  %v505_v5 = vadd.f32 %v789_v25, %v466_v56  ;;  %v467_v6 = vadd.f32 %v435_v53, %v364_v57  ;;  %v365_v7 = vadd.f32 %v762_v2, %v326_v58  ;;  %v327_v8 = vmul.f32 %v740_v0, %v288_v54  ;;  %v405_v53 = vld [vmem:[%s757_s9 + $0xb8] sm:$0xff]  ;;  %v296_v58 = vld [vmem:[%s751_s30 + $0xc0] sm:$0xff] }
  0x26   : > { %567 = vst.msk [vmem:[%s810_s16 + $0x50] sm:$0xff] %vm556_vm0, %v534_v62  ;;  %568 = vst.msk [vmem:[%s810_s16 + $0x58] sm:$0xff] %vm556_vm0, %v535_v63  ;;  %v536_v12 = vmax.f32 %v504_v3, 0.0  ;;  %v437_v13 = vmul.f32 %v745_v1, %v398_v59  ;;  %v328_v14 = vmul.f32 %v740_v0, %v289_v60  ;;  %v438_v15 = vmul.f32 %v745_v1, %v399_v61  ;;  %v406_v63 = vld [vmem:[%s757_s9 + $0xc0] sm:$0xff]  ;;  %v297_v3 = vld [vmem:[%s751_s30 + $0xc8] sm:$0xff] }
  0x27   : > { %v537_v17 = vmax.f32 %v505_v5, 0.0  ;;  %v506_v18 = vadd.f32 %v789_v25, %v467_v6  ;;  %v468_v19 = vadd.f32 %v436_v4, %v365_v7  ;;  %v366_v20 = vadd.f32 %v762_v2, %v327_v8  ;;  %v407_v4 = vld [vmem:[%s757_s9 + $0xc8] sm:$0xff] }
  0x28   : > { %569 = vst.msk [vmem:[%s810_s16 + $0x60] sm:$0xff] %vm556_vm0, %v536_v12  ;;  %v367_v22 = vadd.f32 %v762_v2, %v328_v14  ;;  %v329_v23 = vmul.f32 %v740_v0, %v290_v9  ;;  %v439_v24 = vmul.f32 %v745_v1, %v400_v10  ;;  %v330_v26 = vmul.f32 %v740_v0, %v291_v11  ;;  %v408_v14 = vld [vmem:[%s757_s9 + $0xd0] sm:$0xff] }
  0x29   : > { %570 = vst.msk [vmem:[%s810_s16 + $0x68] sm:$0xff] %vm556_vm0, %v537_v17  ;;  %v538_v29 = vmax.f32 %v506_v18, 0.0  ;;  %v507_v30 = vadd.f32 %v789_v25, %v468_v19  ;;  %v469_v31 = vadd.f32 %v437_v13, %v366_v20  ;;  %v440_v32 = vmul.f32 %v745_v1, %v401_v16  ;;  %v298_v13 = vld [vmem:[%s751_s30 + $0xd0] sm:$0xff]  ;;  %v409_v20 = vld [vmem:[%s757_s9 + $0xd8] sm:$0xff] }
  0x2a   : > { %v470_v33 = vadd.f32 %v438_v15, %v367_v22  ;;  %v368_v34 = vadd.f32 %v762_v2, %v329_v23  ;;  %v369_v35 = vadd.f32 %v762_v2, %v330_v26  ;;  %v331_v36 = vmul.f32 %v740_v0, %v292_v21  ;;  %v299_v15 = vld [vmem:[%s751_s30 + $0xd8] sm:$0xff]  ;;  %v300_v26 = vld [vmem:[%s751_s30 + $0xe0] sm:$0xff] }
  0x2b   : > { %571 = vst.msk [vmem:[%s810_s16 + $0x70] sm:$0xff] %vm556_vm0, %v538_v29  ;;  %v539_v39 = vmax.f32 %v507_v30, 0.0  ;;  %v508_v40 = vadd.f32 %v789_v25, %v469_v31  ;;  %v441_v41 = vmul.f32 %v745_v1, %v402_v27  ;;  %v332_v42 = vmul.f32 %v740_v0, %v293_v28  ;;  %v410_v31 = vld [vmem:[%s757_s9 + $0xe0] sm:$0xff] }
  0x2c   : > { %v509_v43 = vadd.f32 %v789_v25, %v470_v33  ;;  %v471_v44 = vadd.f32 %v439_v24, %v368_v34  ;;  %v472_v45 = vadd.f32 %v440_v32, %v369_v35  ;;  %v370_v46 = vadd.f32 %v762_v2, %v331_v36  ;;  %v301_v32 = vld [vmem:[%s751_s30 + $0xe8] sm:$0xff] }
  0x2d   : > { %572 = vst.msk [vmem:[%s810_s16 + $0x78] sm:$0xff] %vm556_vm0, %v539_v39  ;;  %v540_v49 = vmax.f32 %v508_v40, 0.0  ;;  %v371_v50 = vadd.f32 %v762_v2, %v332_v42  ;;  %v442_v51 = vmul.f32 %v745_v1, %v403_v37  ;;  %v333_v52 = vmul.f32 %v740_v0, %v294_v38  ;;  %v302_v42 = vld [vmem:[%s751_s30 + $0xf0] sm:$0xff] }
  0x2e   : > { %v541_v54 = vmax.f32 %v509_v43, 0.0  ;;  %v510_v55 = vadd.f32 %v789_v25, %v471_v44  ;;  %v511_v56 = vadd.f32 %v789_v25, %v472_v45  ;;  %v473_v57 = vadd.f32 %v441_v41, %v370_v46  ;;  %v411_v41 = vld [vmem:[%s757_s9 + $0xe8] sm:$0xff] }
  0x2f   : > { %573 = vst.msk [vmem:[%s810_s16 + $0x80] sm:$0xff] %vm556_vm0, %v540_v49  ;;  %v474_v59 = vadd.f32 %v442_v51, %v371_v50  ;;  %v372_v60 = vadd.f32 %v762_v2, %v333_v52  ;;  %v443_v61 = vmul.f32 %v745_v1, %v404_v47  ;;  %v334_v62 = vmul.f32 %v740_v0, %v295_v48  ;;  %v412_v51 = vld [vmem:[%s757_s9 + $0xf0] sm:$0xff]  ;;  %v303_v52 = vld [vmem:[%s751_s30 + $0xf8] sm:$0xff] }
  0x30   : > { %574 = vst.msk [vmem:[%s810_s16 + $0x88] sm:$0xff] %vm556_vm0, %v541_v54  ;;  %v542_v5 = vmax.f32 %v510_v55, 0.0  ;;  %v543_v6 = vmax.f32 %v511_v56, 0.0  ;;  %v512_v7 = vadd.f32 %v789_v25, %v473_v57  ;;  %v444_v8 = vmul.f32 %v745_v1, %v405_v53  ;;  %v413_v57 = vld [vmem:[%s757_s9 + $0xf8] sm:$0xff] }
  0x31   : > { %v513_v9 = vadd.f32 %v789_v25, %v474_v59  ;;  %v475_v10 = vadd.f32 %v443_v61, %v372_v60  ;;  %v373_v11 = vadd.f32 %v762_v2, %v334_v62  ;;  %v335_v12 = vmul.f32 %v740_v0, %v296_v58 }
  0x32   : > { %575 = vst.msk [vmem:[%s810_s16 + $0x90] sm:$0xff] %vm556_vm0, %v542_v5  ;;  %576 = vst.msk [vmem:[%s810_s16 + $0x98] sm:$0xff] %vm556_vm0, %v543_v6  ;;  %v544_v16 = vmax.f32 %v512_v7, 0.0  ;;  %v445_v17 = vmul.f32 %v745_v1, %v406_v63  ;;  %v336_v18 = vmul.f32 %v740_v0, %v297_v3  ;;  %v446_v19 = vmul.f32 %v745_v1, %v407_v4 }
  0x33   : > { %v545_v21 = vmax.f32 %v513_v9, 0.0  ;;  %v514_v22 = vadd.f32 %v789_v25, %v475_v10  ;;  %v476_v23 = vadd.f32 %v444_v8, %v373_v11  ;;  %v374_v24 = vadd.f32 %v762_v2, %v335_v12 }
  0x34   : > { %577 = vst.msk [vmem:[%s810_s16 + $0xa0] sm:$0xff] %vm556_vm0, %v544_v16  ;;  %v375_v27 = vadd.f32 %v762_v2, %v336_v18  ;;  %v337_v28 = vmul.f32 %v740_v0, %v298_v13  ;;  %v447_v29 = vmul.f32 %v745_v1, %v408_v14  ;;  %v338_v30 = vmul.f32 %v740_v0, %v299_v15 }
  0x35   : > { %578 = vst.msk [vmem:[%s810_s16 + $0xa8] sm:$0xff] %vm556_vm0, %v545_v21  ;;  %v546_v33 = vmax.f32 %v514_v22, 0.0  ;;  %v515_v34 = vadd.f32 %v789_v25, %v476_v23  ;;  %v477_v35 = vadd.f32 %v445_v17, %v374_v24  ;;  %v448_v36 = vmul.f32 %v745_v1, %v409_v20 }
  0x36   : > { %v478_v37 = vadd.f32 %v446_v19, %v375_v27  ;;  %v376_v38 = vadd.f32 %v762_v2, %v337_v28  ;;  %v377_v39 = vadd.f32 %v762_v2, %v338_v30  ;;  %v339_v40 = vmul.f32 %v740_v0, %v300_v26 }
  0x37   : > { %579 = vst.msk [vmem:[%s810_s16 + $0xb0] sm:$0xff] %vm556_vm0, %v546_v33  ;;  %v547_v43 = vmax.f32 %v515_v34, 0.0  ;;  %v516_v44 = vadd.f32 %v789_v25, %v477_v35  ;;  %v449_v45 = vmul.f32 %v745_v1, %v410_v31  ;;  %v340_v46 = vmul.f32 %v740_v0, %v301_v32 }
  0x38   : > { %v517_v47 = vadd.f32 %v789_v25, %v478_v37  ;;  %v479_v48 = vadd.f32 %v447_v29, %v376_v38  ;;  %v480_v49 = vadd.f32 %v448_v36, %v377_v39  ;;  %v378_v50 = vadd.f32 %v762_v2, %v339_v40 }
  0x39   : > { %580 = vst.msk [vmem:[%s810_s16 + $0xb8] sm:$0xff] %vm556_vm0, %v547_v43  ;;  %v548_v53 = vmax.f32 %v516_v44, 0.0  ;;  %v379_v54 = vadd.f32 %v762_v2, %v340_v46  ;;  %v450_v55 = vmul.f32 %v745_v1, %v411_v41  ;;  %v341_v56 = vmul.f32 %v740_v0, %v302_v42 }
  0x3a   : > { %v549_v58 = vmax.f32 %v517_v47, 0.0  ;;  %v518_v59 = vadd.f32 %v789_v25, %v479_v48  ;;  %v519_v60 = vadd.f32 %v789_v25, %v480_v49  ;;  %v481_v61 = vadd.f32 %v449_v45, %v378_v50 }
  0x3b   : > { %581 = vst.msk [vmem:[%s810_s16 + $0xc0] sm:$0xff] %vm556_vm0, %v548_v53  ;;  %v482_v62 = vadd.f32 %v450_v55, %v379_v54  ;;  %v380_v63 = vadd.f32 %v762_v2, %v341_v56  ;;  %v451_v3 = vmul.f32 %v745_v1, %v412_v51  ;;  %v342_v4 = vmul.f32 %v740_v0, %v303_v52 }
  0x3c   : > { %582 = vst.msk [vmem:[%s810_s16 + $0xc8] sm:$0xff] %vm556_vm0, %v549_v58  ;;  %v550_v5 = vmax.f32 %v518_v59, 0.0  ;;  %v551_v6 = vmax.f32 %v519_v60, 0.0  ;;  %v520_v7 = vadd.f32 %v789_v25, %v481_v61  ;;  %v452_v8 = vmul.f32 %v745_v1, %v413_v57 }
  0x3d   : > { %v521_v9 = vadd.f32 %v789_v25, %v482_v62  ;;  %v483_v10 = vadd.f32 %v451_v3, %v380_v63  ;;  %v381_v11 = vadd.f32 %v762_v2, %v342_v4 }
  0x3e   : > { %583 = vst.msk [vmem:[%s810_s16 + $0xd0] sm:$0xff] %vm556_vm0, %v550_v5  ;;  %584 = vst.msk [vmem:[%s810_s16 + $0xd8] sm:$0xff] %vm556_vm0, %v551_v6  ;;  %v552_v0 = vmax.f32 %v520_v7, 0.0 }
  0x3f   : > { %v553_v12 = vmax.f32 %v521_v9, 0.0  ;;  %v522_v13 = vadd.f32 %v789_v25, %v483_v10  ;;  %v484_v14 = vadd.f32 %v452_v8, %v381_v11 }
  0x40   : > { %585 = vst.msk [vmem:[%s810_s16 + $0xe0] sm:$0xff] %vm556_vm0, %v552_v0 }
  0x41   : > { %586 = vst.msk [vmem:[%s810_s16 + $0xe8] sm:$0xff] %vm556_vm0, %v553_v12  ;;  %v554_v1 = vmax.f32 %v522_v13, 0.0  ;;  %v523_v15 = vadd.f32 %v789_v25, %v484_v14 }
  0x43   : > { %587 = vst.msk [vmem:[%s810_s16 + $0xf0] sm:$0xff] %vm556_vm0, %v554_v1  ;;  %v555_v16 = vmax.f32 %v523_v15, 0.0 }
  0x45   : > { %588 = vst.msk [vmem:[%s810_s16 + $0xf8] sm:$0xff] %vm556_vm0, %v555_v16 }
  0x46 PF: > { %s16_s21 = sadd.s32 1, %s690_s21  }
  0x47   : > { %p13_p4 = scmp.ge.s32.totalorder %s16_s21, 4  }
  0x49   :  { %15 = sbr.rel (!%p13_p4) target bundleno = 1 (0x1), region = 77 }

// kernel: residual_block_forward.4
= control target key start
LH: loop header
LB: loop body
LE: loop exit
PB: predicated region body
PF: predicated region fallthrough
CT: control target
= control target key end

     0   :  { %s1938_s18 = smov 0   ;;  %s2869_s0 = inlined_call_operand.vmem [shape: f32[2,16,16,8], index: 0, kind: input, shape index: {}]   ;;  %s2870_s1 = inlined_call_operand.vmem [shape: bf16[72,8], index: 1, kind: input, shape index: {}]   ;;  %s2871_s2 = inlined_call_operand.vmem [shape: f32[1,8], index: 2, kind: input, shape index: {}]   ;;  %s2872_s3 = inlined_call_operand.vmem [shape: f32[1,8], index: 3, kind: input, shape index: {}]   ;;  %s2873_s4 = inlined_call_operand.vmem [shape: f32[2,16,16,8], index: 4, kind: output, shape index: {0}]   ;;  %s2874_s5 = inlined_call_operand.vmem [shape: f32[2,2,1,8], index: 5, kind: output, shape index: {1}]  }
   0x1 LB: > { %s1755_s19 = sadd.s32 4294967295, %s1897_s18   ;;  %p1759_p0 = scmp.ge.s32.totalorder %s1897_s18, 1  ;;  %s1897_s18 = sphi %s1938_s18, %s16_s18  }
   0x2   : > { %p190_p1 = scmp.lt.s32.totalorder %s1897_s18, 3 }
   0x4   : > { %p191_p2 = pnand %p1759_p0, %p190_p1 }
   0x5   : > { %s1900_s20 = smov (!%p191_p2), 16   ;;  %s1901_s21 = smov (!%p191_p2), 8  }
   0x6   : > { %194 = sbr.rel (%p191_p2) target bundleno = 610 (0x262), region = 36  ;;  %p222_p3 = scmp.lt.s32.totalorder (!%p191_p2), %s1755_s19, 1 }
   0x7   : > { %s1902_s30 = smov (!%p191_p2), 32   ;;  %s1903_s6 = smov (!%p191_p2), 24  }
   0x8   : > { %s1904_s7 = smov (!%p191_p2), 40   ;;  %s1905_s8 = smov (!%p191_p2), 48  }
   0x9   : > { %s1906_s9 = smov (!%p191_p2), 56   ;;  %s1907_s12 = smov (!%p191_p2), 64  }
   0xb   : > { %v1899_v0 = vmov 0.0|0.0   ;;  %v379_v1 = vlaneseq  ;;  %s2876_s19 = smov (!%p222_p3, %s1755_s19), 1  ;;  %v1955_v2 = vld [vmem:[%s2871_s2] ss:$0 sm:$0xff]  ;;  %vm1299_vm4 = vcmask 1043456   ;;  %vm959_vm5 = vcmask 64512  }
   0xc   : > { %716 = vrot.lane.b32.xlu1 %v1899_v0, %s1900_s20  ;;  %668 = vrot.lane.b32.xlu0 %v1899_v0, %s1901_s21  ;;  %s1790_s24 = sshll.u32 %s2876_s19, 8  ;;  %v1970_v4 = vld [vmem:[%s2872_s3] ss:$0 sm:$0xff]  ;;  %vm1008_vm6 = vcmask 130048   ;;  %vm1041_vm7 = vcmask 195584   ;;  %vm1074_vm8 = vcmask 261120  }
   0xd   : > { %v1958_v3 = vshrl.u32 %v379_v1, 7  ;;  %s1965_s27 = scalar_lea.vmem %s2869_s0, %s1790_s24  ;;  %vm1107_vm9 = vcmask 326656   ;;  %vm1140_vm10 = vcmask 392192   ;;  %vm1173_vm11 = vcmask 457728  }
   0xe   : > { %v239_v5 = vld [vmem:[%s1965_s27 + $0x10] sm:$0xff]  ;;  %v240_v6 = vld [vmem:[%s1965_s27 + $0x18] sm:$0xff]  ;;  %v237_v7 = vld [vmem:[%s1965_s27] sm:$0xff]  ;;  %vm1206_vm12 = vcmask 523264   ;;  %vm1266_vm13 = vcmask 588800   ;;  %vm1666_vm14 = vcmask 57344  }
   0xf   : > { %v278_v8 = vmul.f32 %v1955_v2, %v239_v5  ;;  %v279_v9 = vmul.f32 %v1955_v2, %v240_v6  ;;  %v238_v10 = vld [vmem:[%s1965_s27 + $0x8] sm:$0xff]  ;;  %v276_v11 = vmul.f32 %v1955_v2, %v237_v7  ;;  %v241_v12 = vld [vmem:[%s1965_s27 + $0x20] sm:$0xff]  ;;  %v1983_v15 = vadd.s32 8, %v1958_v3  ;;  %v243_v58 = vld [vmem:[%s1965_s27 + $0x30] sm:$0xff] }
  0x10   : > { %v242_v13 = vld [vmem:[%s1965_s27 + $0x28] sm:$0xff]  ;;  %v277_v14 = vmul.f32 %v1955_v2, %v238_v10  ;;  %v280_v16 = vmul.f32 %v1955_v2, %v241_v12  ;;  %vm425_vm0 = vcmp.lt.s32.totalorder %v1958_v3, 1  ;;  %vm554_vm1 = vcmp.lt.s32.totalorder %v1958_v3, 7  ;;  %v244_v59 = vld [vmem:[%s1965_s27 + $0x38] sm:$0xff] }
  0x11   : > { %v281_v17 = vmul.f32 %v1955_v2, %v242_v13  ;;  %v317_v18 = vadd.f32 %v1970_v4, %v278_v8  ;;  %v318_v19 = vadd.f32 %v1970_v4, %v279_v9  ;;  %v315_v20 = vadd.f32 %v1970_v4, %v276_v11 }
  0x12   : > { %v316_v21 = vadd.f32 %v1970_v4, %v277_v14  ;;  %v319_v22 = vadd.f32 %v1970_v4, %v280_v16  ;;  %vm385_vm2 = vcmp.lt.s32.totalorder %v1983_v15, 15  ;;  %vm382_vm3 = vcmp.ge.s32.totalorder %v1958_v3, 1  ;;  %v245_v14 = vld [vmem:[%s1965_s27 + $0x40] sm:$0xff]  ;;  %v246_v16 = vld [vmem:[%s1965_s27 + $0x48] sm:$0xff] }
  0x13   : > { %v349_v23 = vmax.f32 %v317_v18, 0.0  ;;  %v350_v24 = vmax.f32 %v318_v19, 0.0  ;;  %v347_v25 = vmax.f32 %v315_v20, 0.0  ;;  %v320_v26 = vadd.f32 %v1970_v4, %v281_v17  ;;  %v1884_v19 = vld [vmem:[%s2870_s1 + $0x20] ss:$0 sps:$4 sm:$0xff]  }
  0x14   : > { %v348_v27 = vmax.f32 %v316_v21, 0.0  ;;  %v1997_v28 = vmax.f32 %v319_v22, 0.0  ;;  %v282_v63 = vmul.f32 %v1955_v2, %v243_v58  ;;  %v283_v1 = vmul.f32 %v1955_v2, %v244_v59  ;;  %1865 = vmatprep.subr.msk.bf16.mxu0 %vm1299_vm4, %v1884_v19  ;;  %1866 = vmatprep.subr.msk.bf16.mxu1 %vm1299_vm4, %v1884_v19 }
  0x15   : > { %v1999_v29 = vpack.c.bf16 %v350_v24, %v349_v23  ;;  %v524_v30 = vrot.slane %v347_v25, 1  ;;  %v396_v31 = vrot.slane %v349_v23, 7  ;;  %v411_v32 = vrot.slane %v350_v24, 7 }
  0x16   : > { %v509_v33 = vpack.c.bf16 %v348_v27, %v347_v25  ;;  %v539_v34 = vrot.slane %v348_v27, 1  ;;  %v395_v35 = vrot.slane %v347_v25, 7  ;;  %v410_v36 = vrot.slane %v348_v27, 7 }
  0x17   : > { %799 = vrot.lane.b32.xlu1 %v1999_v29, %s1902_s30  ;;  %v442_v37 = vsel %vm425_vm0, %v411_v32, %v396_v31  ;;  %v525_v38 = vrot.slane %v349_v23, 1  ;;  %v540_v39 = vrot.slane %v350_v24, 1  ;;  %v352_v40 = vmax.f32 %v320_v26, 0.0 }
  0x18   : > { %670 = vrot.lane.b32.xlu0 %v509_v33, %s1901_s21  ;;  %v555_v41 = vsel %vm554_vm1, %v524_v30, %v539_v34  ;;  %v570_v42 = vsel %vm554_vm1, %v539_v34, %v524_v30  ;;  %v427_v43 = vsel %vm425_vm0, %v396_v31, %v411_v32  ;;  %v464_v45 = vsel %vm382_vm3, %v442_v37, 0.0 }
  0x19   : > { %v592_v44 = vsel %vm385_vm2, %v570_v42, 0.0  ;;  %v426_v46 = vsel %vm425_vm0, %v395_v35, %v410_v36  ;;  %v441_v47 = vsel %vm425_vm0, %v410_v36, %v395_v35  ;;  %v571_v50 = vsel %vm554_vm1, %v540_v39, %v525_v38  ;;  %v1886_v36 = vld [vmem:[%s2870_s1 + $0x10] sm:$0xff]  }
  0x1a   : > { %v622_v48 = vpack.c.bf16 %v592_v44, %v555_v41  ;;  %v462_v49 = vsel %vm382_vm3, %v441_v47, 0.0  ;;  %v397_v51 = vrot.slane %v1997_v28, 7  ;;  %v412_v52 = vrot.slane %v352_v40, 7  ;;  %v1887_v41 = vld [vmem:[%s2870_s1 + $0x8] sm:$0xff]   ;;  %v247_v47 = vld [vmem:[%s1965_s27 + $0x50] sm:$0xff] }
  0x1b   : > { %v2027_v53 = vpack.c.bf16 %v427_v43, %v464_v45  ;;  %v2029_v54 = vpack.c.bf16 %v426_v46, %v462_v49  ;;  %v556_v55 = vsel %vm554_vm1, %v525_v38, %v540_v39  ;;  %v594_v56 = vsel %vm385_vm2, %v571_v50, 0.0  ;;  %v1888_v46 = vld [vmem:[%s2870_s1] sm:$0xff]  }
  0x1c   : > { %718 = vrot.lane.b32.xlu1 %v622_v48, %s1900_s20  ;;  %797 = vrot.lane.b32.xlu0 %v509_v33, %s1902_s30  ;;  %v443_v57 = vsel %vm425_vm0, %v412_v52, %v397_v51  ;;  %v623_v60 = vpack.c.bf16 %v594_v56, %v556_v55  ;;  %v428_v61 = vsel %vm425_vm0, %v397_v51, %v412_v52  ;;  %v526_v6 = vrot.slane %v1997_v28, 1 }
  0x1d   : > { %v466_v62 = vsel %vm382_vm3, %v443_v57, 0.0  ;;  %v541_v7 = vrot.slane %v352_v40, 1  ;;  %v321_v8 = vadd.f32 %v1970_v4, %v282_v63  ;;  %v322_v9 = vadd.f32 %v1970_v4, %v283_v1 }
  0x1e   : > { %v2051_v5 = vpack.c.bf16 %v428_v61, %v466_v62  ;;  %v2061_v10 = vpack.c.bf16 %v352_v40, %v1997_v28  ;;  %v284_v22 = vmul.f32 %v1955_v2, %v245_v14  ;;  %v285_v23 = vmul.f32 %v1955_v2, %v246_v16  ;;  %v1885_v28 = vld [vmem:[%s2870_s1 + $0x18] sm:$0xff]  }
  0x1f   : > { %v572_v11 = vsel %vm554_vm1, %v541_v7, %v526_v6  ;;  %v353_v12 = vmax.f32 %v321_v8, 0.0  ;;  %v354_v13 = vmax.f32 %v322_v9, 0.0  ;;  %v557_v17 = vsel %vm554_vm1, %v526_v6, %v541_v7  ;;  %v249_v6 = vld [vmem:[%s1965_s27 + $0x60] sm:$0xff]  ;;  %v250_v7 = vld [vmem:[%s1965_s27 + $0x68] sm:$0xff] }
  0x20   : > { %766 = vrot.lane.b32.xlu1 %v2027_v53, %s1903_s6  ;;  %764 = vrot.lane.b32.xlu0 %v2029_v54, %s1903_s6  ;;  %v596_v18 = vsel %vm385_vm2, %v572_v11, 0.0  ;;  %v323_v26 = vadd.f32 %v1970_v4, %v284_v22  ;;  %v324_v27 = vadd.f32 %v1970_v4, %v285_v23  ;;  %v286_v52 = vmul.f32 %v1955_v2, %v247_v47 }
  0x21   : > { %v398_v20 = vrot.slane %v353_v12, 7  ;;  %v413_v21 = vrot.slane %v354_v13, 7  ;;  %v624_v24 = vpack.c.bf16 %v596_v18, %v557_v17  ;;  %v527_v32 = vrot.slane %v353_v12, 1 }
  0x22   : > { %v542_v33 = vrot.slane %v354_v13, 1  ;;  %v355_v34 = vmax.f32 %v323_v26, 0.0  ;;  %v356_v35 = vmax.f32 %v324_v27, 0.0  ;;  %v512_v42 = vpack.c.bf16 %v354_v13, %v353_v12 }
  0x23   : > { %v444_v25 = vsel %vm425_vm0, %v413_v21, %v398_v20  ;;  %v429_v30 = vsel %vm425_vm0, %v398_v20, %v413_v21  ;;  %v325_v59 = vadd.f32 %v1970_v4, %v286_v52  ;;  %v288_v12 = vmul.f32 %v1955_v2, %v249_v6 }
  0x24   : > { %832 = vrot.lane.b32.xlu1 %v623_v60, %s1904_s7  ;;  %830 = vrot.lane.b32.xlu0 %v622_v48, %s1904_s7  ;;  %v468_v31 = vsel %vm382_vm3, %v444_v25, 0.0  ;;  %v573_v38 = vsel %vm554_vm1, %v542_v33, %v527_v32  ;;  %v399_v39 = vrot.slane %v355_v34, 7  ;;  %v414_v40 = vrot.slane %v356_v35, 7  ;;  %v248_v48 = vld [vmem:[%s1965_s27 + $0x58] sm:$0xff] }
  0x25   : > { %v2102_v37 = vpack.c.bf16 %v429_v30, %v468_v31  ;;  %v558_v43 = vsel %vm554_vm1, %v527_v32, %v542_v33  ;;  %v598_v44 = vsel %vm385_vm2, %v573_v38, 0.0  ;;  %v287_v55 = vmul.f32 %v1955_v2, %v248_v48  ;;  %v251_v33 = vld [vmem:[%s1965_s27 + $0x70] sm:$0xff] }
  0x26   : > { %v445_v45 = vsel %vm425_vm0, %v414_v40, %v399_v39  ;;  %v625_v49 = vpack.c.bf16 %v598_v44, %v558_v43  ;;  %v430_v50 = vsel %vm425_vm0, %v399_v39, %v414_v40  ;;  %v528_v57 = vrot.slane %v355_v34, 1 }
  0x27   : > { %v470_v51 = vsel %vm382_vm3, %v445_v45, 0.0  ;;  %v543_v58 = vrot.slane %v356_v35, 1  ;;  %v513_v61 = vpack.c.bf16 %v356_v35, %v355_v34  ;;  %v357_v63 = vmax.f32 %v325_v59, 0.0  ;;  %v252_v34 = vld [vmem:[%s1965_s27 + $0x78] sm:$0xff] }
  0x28   : > { %865 = vrot.lane.b32.xlu1 %v2051_v5, %s1905_s8  ;;  %863 = vrot.lane.b32.xlu0 %v2027_v53, %s1905_s8  ;;  %v2135_v56 = vpack.c.bf16 %v430_v50, %v470_v51  ;;  %v289_v13 = vmul.f32 %v1955_v2, %v250_v7  ;;  %v327_v17 = vadd.f32 %v1970_v4, %v288_v12  ;;  %v253_v50 = vld [vmem:[%s1965_s27 + $0x80] sm:$0xff]  ;;  %v254_v51 = vld [vmem:[%s1965_s27 + $0x88] sm:$0xff] }
  0x29   : > { %v574_v62 = vsel %vm554_vm1, %v543_v58, %v528_v57  ;;  %v559_v8 = vsel %vm554_vm1, %v528_v57, %v543_v58  ;;  %v529_v21 = vrot.slane %v357_v63, 1  ;;  %v290_v39 = vmul.f32 %v1955_v2, %v251_v33 }
  0x2a   : > { %v600_v9 = vsel %vm385_vm2, %v574_v62, 0.0  ;;  %v328_v18 = vadd.f32 %v1970_v4, %v289_v13  ;;  %v359_v23 = vmax.f32 %v327_v17, 0.0  ;;  %v291_v40 = vmul.f32 %v1955_v2, %v252_v34 }
  0x2b   : > { %v626_v14 = vpack.c.bf16 %v600_v9, %v559_v8  ;;  %v329_v44 = vadd.f32 %v1970_v4, %v290_v39  ;;  %v292_v59 = vmul.f32 %v1955_v2, %v253_v50 }
  0x2c   : > { %897 = vrot.lane.b32.xlu1 %v2061_v10, %s1906_s9  ;;  %895 = vrot.lane.b32.xlu0 %v1999_v29, %s1906_s9  ;;  %v401_v27 = vrot.slane %v359_v23, 7  ;;  %v330_v45 = vadd.f32 %v1970_v4, %v291_v40 }
  0x2d   : > { %v361_v48 = vmax.f32 %v329_v44, 0.0  ;;  %v257_v44 = vld [vmem:[%s1965_s27 + $0xa0] sm:$0xff] }
  0x2f   : > { %v402_v57 = vrot.slane %v361_v48, 7  ;;  %v531_v8 = vrot.slane %v361_v48, 1 }
  0x30   : > { %672 = vrot.lane.b32.xlu1 %v1999_v29, %s1901_s21  ;;  %927 = vrot.lane.b32.xlu0 %v623_v60, %s1907_s12  ;;  %v1301_v29 = vsel %vm1299_vm4, %v1884_v19, 0 }
  0x31   : > { %1814 = vmatpush3.bf16.msra.mxu0 %v1301_v29  ;;  %1860 = vmatpush3.bf16.msra.mxu1 %v1301_v29 }
  0x32   : > { %1815 = vmatprep.subr.bf16.mxu0 %v1885_v28  ;;  %1856 = vmatprep.subr.bf16.mxu1 %v1885_v28 }
  0x34   : > { %674 = vrot.lane.b32.xlu1 %v2061_v10, %s1901_s21  ;;  %929 = vrot.lane.b32.xlu0 %v624_v24, %s1907_s12 }
  0x35   : > { %1816 = vmatpush3.bf16.msra.mxu0 %v1885_v28  ;;  %1861 = vmatpush3.bf16.msra.mxu1 %v1885_v28 }
  0x36   : > { %1817 = vmatprep.subr.bf16.mxu0 %v1886_v36  ;;  %1857 = vmatprep.subr.bf16.mxu1 %v1886_v36 }
  0x38   : > { %722 = vrot.lane.b32.xlu1 %v624_v24, %s1900_s20  ;;  %720 = vrot.lane.b32.xlu0 %v623_v60, %s1900_s20  ;;  %v326_v60 = vadd.f32 %v1970_v4, %v287_v55 }
  0x39   : > { %1818 = vmatpush3.bf16.msra.mxu0 %v1886_v36  ;;  %1862 = vmatpush3.bf16.msra.mxu1 %v1886_v36 }
  0x3a   : > { %1819 = vmatprep.subr.bf16.mxu0 %v1887_v41  ;;  %1858 = vmatprep.subr.bf16.mxu1 %v1887_v41  ;;  %v358_v1 = vmax.f32 %v326_v60, 0.0  ;;  %v293_v60 = vmul.f32 %v1955_v2, %v254_v51 }
  0x3c   : > { %770 = vrot.lane.b32.xlu1 %v2102_v37, %s1903_s6  ;;  %768 = vrot.lane.b32.xlu0 %v2051_v5, %s1903_s6  ;;  %v415_v11 = vrot.slane %v358_v1, 7  ;;  %v544_v22 = vrot.slane %v358_v1, 1  ;;  %v514_v29 = vpack.c.bf16 %v358_v1, %v357_v63  ;;  %v332_v1 = vadd.f32 %v1970_v4, %v293_v60 }
  0x3d   : > { %1820 = vmatpush3.bf16.msra.mxu0 %v1887_v41  ;;  %1863 = vmatpush3.bf16.msra.mxu1 %v1887_v41 }
  0x3e   : > { %1821 = vmatprep.subr.bf16.mxu0 %v1888_v46  ;;  %1859 = vmatprep.subr.bf16.mxu1 %v1888_v46  ;;  %v575_v26 = vsel %vm554_vm1, %v544_v22, %v529_v21  ;;  %v560_v30 = vsel %vm554_vm1, %v529_v21, %v544_v22  ;;  %v255_v21 = vld [vmem:[%s1965_s27 + $0x90] sm:$0xff]  ;;  %v256_v22 = vld [vmem:[%s1965_s27 + $0x98] sm:$0xff] }
  0x3f   : > { %v602_v31 = vsel %vm385_vm2, %v575_v26, 0.0 }
  0x40   : > { %803 = vrot.lane.b32.xlu1 %v512_v42, %s1902_s30  ;;  %801 = vrot.lane.b32.xlu0 %v2061_v10, %s1902_s30  ;;  %v400_v10 = vrot.slane %v357_v63, 7  ;;  %v627_v35 = vpack.c.bf16 %v602_v31, %v560_v30  ;;  %v331_v63 = vadd.f32 %v1970_v4, %v292_v59 }
  0x41   : > { %1822 = vmatpush3.bf16.msra.mxu0 %v1888_v46  ;;  %1864 = vmatpush3.bf16.msra.mxu1 %v1888_v46 }
  0x42   : > { %v446_v16 = vsel %vm425_vm0, %v415_v11, %v400_v10  ;;  %v431_v19 = vsel %vm425_vm0, %v400_v10, %v415_v11  ;;  %v363_v10 = vmax.f32 %v331_v63, 0.0  ;;  %v364_v11 = vmax.f32 %v332_v1, 0.0 }
  0x43   : > { %v472_v20 = vsel %vm382_vm3, %v446_v16, 0.0 }
  0x44   : > { %836 = vrot.lane.b32.xlu1 %v625_v49, %s1904_s7  ;;  %834 = vrot.lane.b32.xlu0 %v624_v24, %s1904_s7  ;;  %v360_v24 = vmax.f32 %v328_v18, 0.0  ;;  %v2169_v25 = vpack.c.bf16 %v431_v19, %v472_v20  ;;  %v418_v16 = vrot.slane %v364_v11, 7  ;;  %v547_v33 = vrot.slane %v364_v11, 1 }
  0x46   : > { %v416_v28 = vrot.slane %v360_v24, 7  ;;  %v545_v43 = vrot.slane %v360_v24, 1  ;;  %v515_v46 = vpack.c.bf16 %v360_v24, %v359_v23 }
  0x48   : > { %869 = vrot.lane.b32.xlu1 %v2135_v56, %s1905_s8  ;;  %867 = vrot.lane.b32.xlu0 %v2102_v37, %s1905_s8  ;;  %v447_v32 = vsel %vm425_vm0, %v416_v28, %v401_v27  ;;  %v432_v36 = vsel %vm425_vm0, %v401_v27, %v416_v28  ;;  %v294_v27 = vmul.f32 %v1955_v2, %v255_v21 }
  0x49   : > { %v474_v38 = vsel %vm382_vm3, %v447_v32, 0.0  ;;  %v295_v28 = vmul.f32 %v1955_v2, %v256_v22  ;;  %v532_v32 = vrot.slane %v363_v10, 1 }
  0x4a   : > { %v2195_v41 = vpack.c.bf16 %v432_v36, %v474_v38  ;;  %v333_v34 = vadd.f32 %v1970_v4, %v294_v27  ;;  %v2263_v36 = vpack.c.bf16 %v364_v11, %v363_v10 }
  0x4b   : > { %v578_v40 = vsel %vm554_vm1, %v547_v33, %v532_v32 }
  0x4c   : > { %901 = vrot.lane.b32.xlu1 %v513_v61, %s1906_s9  ;;  %899 = vrot.lane.b32.xlu0 %v512_v42, %s1906_s9 }
  0x50   : > { %676 = vrot.lane.b32.xlu1 %v512_v42, %s1901_s21  ;;  %931 = vrot.lane.b32.xlu0 %v625_v49, %s1907_s12  ;;  %v530_v42 = vrot.slane %v359_v23, 1 }
  0x52   : > { %v576_v47 = vsel %vm554_vm1, %v545_v43, %v530_v42  ;;  %v561_v52 = vsel %vm554_vm1, %v530_v42, %v545_v43  ;;  %v365_v42 = vmax.f32 %v333_v34, 0.0 }
  0x53   : > { %v604_v55 = vsel %vm385_vm2, %v576_v47, 0.0  ;;  %v608_v47 = vsel %vm385_vm2, %v578_v40, 0.0 }
  0x54   : > { %678 = vrot.lane.b32.xlu1 %v513_v61, %s1901_s21  ;;  %933 = vrot.lane.b32.xlu0 %v626_v14, %s1907_s12  ;;  %v404_v50 = vrot.slane %v365_v42, 7 }
  0x58   : > { %726 = vrot.lane.b32.xlu1 %v626_v14, %s1900_s20  ;;  %724 = vrot.lane.b32.xlu0 %v625_v49, %s1900_s20  ;;  %v362_v49 = vmax.f32 %v330_v45, 0.0  ;;  %v258_v45 = vld [vmem:[%s1965_s27 + $0xa8] sm:$0xff] }
  0x5a   : > { %v417_v58 = vrot.slane %v362_v49, 7  ;;  %v546_v9 = vrot.slane %v362_v49, 1  ;;  %v516_v17 = vpack.c.bf16 %v362_v49, %v361_v48 }
  0x5c   : > { %774 = vrot.lane.b32.xlu1 %v2169_v25, %s1903_s6  ;;  %772 = vrot.lane.b32.xlu0 %v2135_v56, %s1903_s6  ;;  %v448_v62 = vsel %vm425_vm0, %v417_v58, %v402_v57  ;;  %v433_v6 = vsel %vm425_vm0, %v402_v57, %v417_v58  ;;  %v577_v13 = vsel %vm554_vm1, %v546_v9, %v531_v8 }
  0x5d   : > { %v476_v7 = vsel %vm382_vm3, %v448_v62, 0.0  ;;  %v562_v18 = vsel %vm554_vm1, %v531_v8, %v546_v9  ;;  %v606_v19 = vsel %vm385_vm2, %v577_v13, 0.0  ;;  %v533_v8 = vrot.slane %v365_v42, 1 }
  0x5e   : > { %v2229_v12 = vpack.c.bf16 %v433_v6, %v476_v7  ;;  %v629_v23 = vpack.c.bf16 %v606_v19, %v562_v18 }
  0x60   : > { %807 = vrot.lane.b32.xlu1 %v514_v29, %s1902_s30  ;;  %805 = vrot.lane.b32.xlu0 %v513_v61, %s1902_s30  ;;  %v628_v61 = vpack.c.bf16 %v604_v55, %v561_v52  ;;  %v296_v52 = vmul.f32 %v1955_v2, %v257_v44  ;;  %v297_v55 = vmul.f32 %v1955_v2, %v258_v45 }
  0x62   : > { %v336_v62 = vadd.f32 %v1970_v4, %v297_v55 }
  0x64   : > { %840 = vrot.lane.b32.xlu1 %v627_v35, %s1904_s7  ;;  %838 = vrot.lane.b32.xlu0 %v626_v14, %s1904_s7  ;;  %v403_v14 = vrot.slane %v363_v10, 7  ;;  %v2298_v11 = vmax.f32 %v336_v62, 0.0 }
  0x66   : > { %v449_v20 = vsel %vm425_vm0, %v418_v16, %v403_v14  ;;  %v434_v24 = vsel %vm425_vm0, %v403_v14, %v418_v16  ;;  %v549_v62 = vrot.slane %v2298_v11, 1 }
  0x67   : > { %v478_v26 = vsel %vm382_vm3, %v449_v20, 0.0  ;;  %v420_v20 = vrot.slane %v2298_v11, 7 }
  0x68   : > { %873 = vrot.lane.b32.xlu1 %v2195_v41, %s1905_s8  ;;  %871 = vrot.lane.b32.xlu0 %v2169_v25, %s1905_s8  ;;  %v2255_v31 = vpack.c.bf16 %v434_v24, %v478_v26 }
  0x6c   : > { %905 = vrot.lane.b32.xlu1 %v515_v46, %s1906_s9  ;;  %903 = vrot.lane.b32.xlu0 %v514_v29, %s1906_s9 }
  0x70   : > { %680 = vrot.lane.b32.xlu1 %v514_v29, %s1901_s21  ;;  %935 = vrot.lane.b32.xlu0 %v627_v35, %s1907_s12 }
  0x74   : > { %682 = vrot.lane.b32.xlu1 %v515_v46, %s1901_s21  ;;  %937 = vrot.lane.b32.xlu0 %v628_v61, %s1907_s12 }
  0x78   : > { %730 = vrot.lane.b32.xlu1 %v628_v61, %s1900_s20  ;;  %728 = vrot.lane.b32.xlu0 %v627_v35, %s1900_s20  ;;  %v334_v35 = vadd.f32 %v1970_v4, %v295_v28 }
  0x7a   : > { %v366_v43 = vmax.f32 %v334_v35, 0.0  ;;  %v260_v35 = vld [vmem:[%s1965_s27 + $0xb8] sm:$0xff] }
  0x7c   : > { %778 = vrot.lane.b32.xlu1 %v2229_v12, %s1903_s6  ;;  %776 = vrot.lane.b32.xlu0 %v2195_v41, %s1903_s6  ;;  %v419_v51 = vrot.slane %v366_v43, 7  ;;  %v548_v9 = vrot.slane %v366_v43, 1 }
  0x7e   : > { %v717_v29 = vpop.permute.xlu1 %716  ;;  %v669_v30 = vpop.permute.xlu0 %668  ;;  %v450_v60 = vsel %vm425_vm0, %v419_v51, %v404_v50  ;;  %v435_v63 = vsel %vm425_vm0, %v404_v50, %v419_v51  ;;  %v579_v18 = vsel %vm554_vm1, %v548_v9, %v533_v8  ;;  %v564_v24 = vsel %vm554_vm1, %v533_v8, %v548_v9 }
  0x7f   : > { %v480_v1 = vsel %vm382_vm3, %v450_v60, 0.0  ;;  %v962_v13 = vsel %vm959_vm5, 0.0|0.0, %v669_v30  ;;  %v610_v26 = vsel %vm385_vm2, %v579_v18, 0.0 }
  0x80   : > { %811 = vrot.lane.b32.xlu1 %v516_v17, %s1902_s30  ;;  %809 = vrot.lane.b32.xlu0 %v515_v46, %s1902_s30  ;;  %v563_v46 = vsel %vm554_vm1, %v532_v32, %v547_v33  ;;  %v2304_v14 = vpack.c.bf16 %v435_v63, %v480_v1  ;;  %v1010_v21 = vsel %vm1008_vm6, %v962_v13, %v717_v29  ;;  %v259_v32 = vld [vmem:[%s1965_s27 + $0xb0] sm:$0xff] }
  0x81   : > { %v2282_v57 = vpack.c.bf16 %v608_v47, %v563_v46  ;;  %v298_v45 = vmul.f32 %v1955_v2, %v259_v32 }
  0x84   : > { %844 = vrot.lane.b32.xlu1 %v629_v23, %s1904_s7  ;;  %842 = vrot.lane.b32.xlu0 %v628_v61, %s1904_s7  ;;  %v335_v61 = vadd.f32 %v1970_v4, %v296_v52 }
  0x86   : > { %v2296_v10 = vmax.f32 %v335_v61, 0.0 }
  0x88   : > { %877 = vrot.lane.b32.xlu1 %v2255_v31, %s1905_s8  ;;  %875 = vrot.lane.b32.xlu0 %v2229_v12, %s1905_s8  ;;  %v405_v19 = vrot.slane %v2296_v10, 7  ;;  %v534_v61 = vrot.slane %v2296_v10, 1  ;;  %v519_v1 = vpack.c.bf16 %v2298_v11, %v2296_v10 }
  0x89   : > { %v2265_v38 = vpop.permute.xlu1 %799 }
  0x8a   : > { %v671_v39 = vpop.permute.xlu0 %670  ;;  %v451_v30 = vsel %vm425_vm0, %v420_v20, %v405_v19  ;;  %v580_v8 = vsel %vm554_vm1, %v549_v62, %v534_v61  ;;  %v565_v10 = vsel %vm554_vm1, %v534_v61, %v549_v62  ;;  %v263_v62 = vld [vmem:[%s1965_s27 + $0xd0] sm:$0xff] }
  0x8b   : > { %v965_v27 = vsel %vm959_vm5, %v2029_v54, %v671_v39  ;;  %v2336_v54 = vpack.c.bf16 %v610_v26, %v564_v24  ;;  %v482_v44 = vsel %vm382_vm3, %v451_v30, 0.0  ;;  %v612_v11 = vsel %vm385_vm2, %v580_v8, 0.0 }
  0x8c   : > { %909 = vrot.lane.b32.xlu1 %v2263_v36, %s1906_s9  ;;  %907 = vrot.lane.b32.xlu0 %v516_v17, %s1906_s9  ;;  %v632_v26 = vpack.c.bf16 %v612_v11, %v565_v10  ;;  %v302_v11 = vmul.f32 %v1955_v2, %v263_v62 }
  0x8e   : > { %v719_v48 = vpop.permute.xlu1 %718  ;;  %v798_v49 = vpop.permute.xlu0 %797 }
  0x8f   : > { %v1012_v33 = vsel %vm1008_vm6, %v965_v27, %v719_v48 }
  0x90   : > { %684 = vrot.lane.b32.xlu1 %v516_v17, %s1901_s21  ;;  %939 = vrot.lane.b32.xlu0 %v629_v23, %s1907_s12 }
  0x92   : > { %v767_v58 = vpop.permute.xlu1 %766  ;;  %v765_v59 = vpop.permute.xlu0 %764 }
  0x93   : > { %v1043_v22 = vsel %vm1041_vm7, %v1010_v21, %v765_v59  ;;  %v1045_v40 = vsel %vm1041_vm7, %v1012_v33, %v767_v58  ;;  %v337_v58 = vadd.f32 %v1970_v4, %v298_v45 }
  0x94   : > { %686 = vrot.lane.b32.xlu1 %v2263_v36, %s1901_s21  ;;  %941 = vrot.lane.b32.xlu0 %v2282_v57, %s1907_s12  ;;  %v1076_v34 = vsel %vm1074_vm8, %v1043_v22, %v798_v49  ;;  %v1078_v49 = vsel %vm1074_vm8, %v1045_v40, %v2265_v38 }
  0x95   : > { %v369_v9 = vmax.f32 %v337_v58, 0.0 }
  0x96   : > { %v833_v6 = vpop.permute.xlu1 %832  ;;  %v831_v7 = vpop.permute.xlu0 %830 }
  0x97   : > { %v1111_v51 = vsel %vm1107_vm9, %v1078_v49, %v833_v6  ;;  %v535_v40 = vrot.slane %v369_v9, 1 }
  0x98   : > { %734 = vrot.lane.b32.xlu1 %v2282_v57, %s1900_s20  ;;  %732 = vrot.lane.b32.xlu0 %v629_v23, %s1900_s20  ;;  %v2316_v23 = vpack.c.bf16 %v366_v43, %v365_v42  ;;  %v1109_v42 = vsel %vm1107_vm9, %v1076_v34, %v831_v7  ;;  %v436_v43 = vsel %vm425_vm0, %v405_v19, %v420_v20  ;;  %v406_v20 = vrot.slane %v369_v9, 7 }
  0x99   : > { %v2356_v52 = vpack.c.bf16 %v436_v43, %v482_v44 }
  0x9a   : > { %v866_v16 = vpop.permute.xlu1 %865  ;;  %v864_v17 = vpop.permute.xlu0 %863 }
  0x9b   : > { %v1142_v39 = vsel %vm1140_vm10, %v1109_v42, %v864_v17  ;;  %v1144_v55 = vsel %vm1140_vm10, %v1111_v51, %v866_v16  ;;  %v261_v16 = vld [vmem:[%s1965_s27 + $0xc0] sm:$0xff]  ;;  %v262_v17 = vld [vmem:[%s1965_s27 + $0xc8] sm:$0xff] }
  0x9c   : > { %782 = vrot.lane.b32.xlu1 %v2304_v14, %s1903_s6  ;;  %780 = vrot.lane.b32.xlu0 %v2255_v31, %s1903_s6  ;;  %v300_v22 = vmul.f32 %v1955_v2, %v261_v16  ;;  %v301_v24 = vmul.f32 %v1955_v2, %v262_v17 }
  0x9e   : > { %v898_v28 = vpop.permute.xlu1 %897  ;;  %v896_v29 = vpop.permute.xlu0 %895  ;;  %v339_v30 = vadd.f32 %v1970_v4, %v300_v22  ;;  %v340_v32 = vadd.f32 %v1970_v4, %v301_v24 }
  0x9f   : > { %v1175_v46 = vsel %vm1173_vm11, %v1142_v39, %v896_v29  ;;  %v1177_v38 = vsel %vm1173_vm11, %v1144_v55, %v898_v28 }
  0xa0   : > { %815 = vrot.lane.b32.xlu1 %v2316_v23, %s1902_s30  ;;  %813 = vrot.lane.b32.xlu0 %v2263_v36, %s1902_s30  ;;  %v299_v36 = vmul.f32 %v1955_v2, %v260_v35  ;;  %v2404_v39 = vmax.f32 %v339_v30, 0.0  ;;  %v2406_v43 = vmax.f32 %v340_v32, 0.0  ;;  %v341_v32 = vadd.f32 %v1970_v4, %v302_v11 }
  0xa2   : > { %v2345_v47 = vpop.permute.xlu1 %672  ;;  %v928_v48 = vpop.permute.xlu0 %927  ;;  %v422_v49 = vrot.slane %v2406_v43, 7  ;;  %v536_v24 = vrot.slane %v2404_v39, 1  ;;  %v551_v30 = vrot.slane %v2406_v43, 1 }
  0xa3   : > { %v1208_v50 = vsel %vm1206_vm12, %v1175_v46, %v928_v48 }
  0xa4   : > { %848 = vrot.lane.b32.xlu1 %v2336_v54, %s1904_s7  ;;  %846 = vrot.lane.b32.xlu0 %v2282_v57, %s1904_s7  ;;  %v338_v57 = vadd.f32 %v1970_v4, %v299_v36  ;;  %v407_v36 = vrot.slane %v2404_v39, 7 }
  0xa5   : > { %1823 = vmatprep.mubr.msk.bf16.mxu0 %vm1266_vm13, %v1208_v50  ;;  %v968_v50 = vsel %vm959_vm5, %v2027_v53, %v2345_v47 }
  0xa6   : > { %v2362_v59 = vpop.permute.xlu1 %674  ;;  %v930_v60 = vpop.permute.xlu0 %929  ;;  %v370_v13 = vmax.f32 %v338_v57, 0.0  ;;  %v453_v47 = vsel %vm425_vm0, %v422_v49, %v407_v36  ;;  %v264_v57 = vld [vmem:[%s1965_s27 + $0xd8] sm:$0xff]  ;;  %v438_v16 = vsel %vm425_vm0, %v407_v36, %v422_v49 }
  0xa7   : > { %v1210_v63 = vsel %vm1206_vm12, %v1177_v38, %v930_v60 }
  0xa8   : > { %881 = vrot.lane.b32.xlu1 %v2356_v52, %s1905_s8  ;;  %879 = vrot.lane.b32.xlu0 %v2304_v14, %s1905_s8  ;;  %v421_v21 = vrot.slane %v370_v13, 7  ;;  %v550_v42 = vrot.slane %v370_v13, 1 }
  0xa9   : > { %1824 = vmatmul.mubr.msk.bf16.vlgmr.msra.gmra.mxu0 %vm1266_vm13, %v1210_v63  ;;  %v971_v63 = vsel %vm959_vm5, %v2051_v5, %v2362_v59  ;;  %v486_v5 = vsel %vm382_vm3, %v453_v47, 0.0 }
  0xaa   : > { %v2375_v6 = vpop.permute.xlu1 %722  ;;  %v721_v7 = vpop.permute.xlu0 %720  ;;  %v452_v29 = vsel %vm425_vm0, %v421_v21, %v406_v20  ;;  %v581_v48 = vsel %vm554_vm1, %v550_v42, %v535_v40  ;;  %v566_v55 = vsel %vm554_vm1, %v535_v40, %v550_v42  ;;  %v582_v40 = vsel %vm554_vm1, %v551_v30, %v536_v24 }
  0xab   : > { %v484_v33 = vsel %vm382_vm3, %v452_v29, 0.0  ;;  %v1014_v51 = vsel %vm1008_vm6, %v968_v50, %v721_v7  ;;  %v614_v58 = vsel %vm385_vm2, %v581_v48, 0.0  ;;  %v373_v42 = vmax.f32 %v341_v32, 0.0  ;;  %v266_v48 = vld [vmem:[%s1965_s27 + $0xe8] sm:$0xff] }
  0xac   : > { %913 = vrot.lane.b32.xlu1 %v519_v1, %s1906_s9  ;;  %911 = vrot.lane.b32.xlu0 %v2316_v23, %s1906_s9  ;;  %v2444_v8 = vpack.c.bf16 %v614_v58, %v566_v55  ;;  %v305_v58 = vmul.f32 %v1955_v2, %v266_v48 }
  0xad   : > { %v408_v50 = vrot.slane %v373_v42, 7 }
  0xae   : > { %v771_v18 = vpop.permute.xlu1 %770  ;;  %v769_v19 = vpop.permute.xlu0 %768  ;;  %v344_v62 = vadd.f32 %v1970_v4, %v305_v58 }
  0xaf   : > { %v1047_v38 = vsel %vm1041_vm7, %v1014_v51, %v769_v19  ;;  %v303_v19 = vmul.f32 %v1955_v2, %v264_v57 }
  0xb0   : > { %688 = vrot.lane.b32.xlu1 %v2316_v23, %s1901_s21  ;;  %943 = vrot.lane.b32.xlu0 %v2336_v54, %s1907_s12  ;;  %v437_v23 = vsel %vm425_vm0, %v406_v20, %v421_v21 }
  0xb1   : > { %v2411_v44 = vpack.c.bf16 %v437_v23, %v484_v33  ;;  %v521_v33 = vpack.c.bf16 %v2406_v43, %v2404_v39  ;;  %v567_v39 = vsel %vm554_vm1, %v536_v24, %v551_v30  ;;  %v616_v43 = vsel %vm385_vm2, %v582_v40, 0.0  ;;  %v268_v30 = vld [vmem:[%s1965_s27 + $0xf8] sm:$0xff] }
  0xb2   : > { %v804_v27 = vpop.permute.xlu1 %803  ;;  %v802_v28 = vpop.permute.xlu0 %801 }
  0xb3   : > { %v1080_v61 = vsel %vm1074_vm8, %v1047_v38, %v802_v28  ;;  %v634_v38 = vpack.c.bf16 %v616_v43, %v567_v39 }
  0xb4   : > { %690 = vrot.lane.b32.xlu1 %v519_v1, %s1901_s21  ;;  %945 = vrot.lane.b32.xlu0 %v632_v26, %s1907_s12 }
  0xb6   : > { %v837_v34 = vpop.permute.xlu1 %836  ;;  %v835_v35 = vpop.permute.xlu0 %834 }
  0xb7   : > { %v1113_v7 = vsel %vm1107_vm9, %v1080_v61, %v835_v35 }
  0xb8   : > { %738 = vrot.lane.b32.xlu1 %v632_v26, %s1900_s20  ;;  %736 = vrot.lane.b32.xlu0 %v2336_v54, %s1900_s20  ;;  %v2424_v54 = vpack.c.bf16 %v370_v13, %v369_v9  ;;  %v1016_v9 = vsel %vm1008_vm6, %v971_v63, %v2375_v6 }
  0xb9   : > { %v1049_v59 = vsel %vm1041_vm7, %v1016_v9, %v771_v18  ;;  %v2465_v18 = vpack.c.bf16 %v438_v16, %v486_v5  ;;  %v2515_v16 = vmax.f32 %v344_v62, 0.0 }
  0xba   : > { %v870_v45 = vpop.permute.xlu1 %869  ;;  %v868_v46 = vpop.permute.xlu0 %867  ;;  %v1082_v6 = vsel %vm1074_vm8, %v1049_v59, %v804_v27 }
  0xbb   : > { %v1146_v13 = vsel %vm1140_vm10, %v1113_v7, %v868_v46  ;;  %v1115_v21 = vsel %vm1107_vm9, %v1082_v6, %v837_v34  ;;  %v265_v46 = vld [vmem:[%s1965_s27 + $0xe0] sm:$0xff]  ;;  %v537_v7 = vrot.slane %v373_v42, 1  ;;  %v424_v11 = vrot.slane %v2515_v16, 7 }
  0xbc   : > { %786 = vrot.lane.b32.xlu1 %v2411_v44, %s1903_s6  ;;  %784 = vrot.lane.b32.xlu0 %v2356_v52, %s1903_s6  ;;  %v1148_v22 = vsel %vm1140_vm10, %v1115_v21, %v870_v45  ;;  %v304_v55 = vmul.f32 %v1955_v2, %v265_v46 }
  0xbe   : > { %v902_v60 = vpop.permute.xlu1 %901  ;;  %v900_v53 = vpop.permute.xlu0 %899  ;;  %v343_v61 = vadd.f32 %v1970_v4, %v304_v55 }
  0xbf   : > { %v1179_v17 = vsel %vm1173_vm11, %v1146_v13, %v900_v53  ;;  %v1181_v28 = vsel %vm1173_vm11, %v1148_v22, %v902_v60 }
  0xc0   : > { %819 = vrot.lane.b32.xlu1 %v2424_v54, %s1902_s30  ;;  %817 = vrot.lane.b32.xlu0 %v519_v1, %s1902_s30  ;;  %v2513_v13 = vmax.f32 %v343_v61, 0.0  ;;  %v1890_v61 = vld [vmem:[%s2872_s3] ss:$0 sm:$0xff] }
  0xc2   : > { %v2455_v10 = vpop.permute.xlu1 %676  ;;  %v932_v1 = vpop.permute.xlu0 %931  ;;  %v538_v55 = vrot.slane %v2513_v13, 1 }
  0xc3   : > { %v1212_v20 = vsel %vm1206_vm12, %v1179_v17, %v932_v1  ;;  %v409_v1 = vrot.slane %v2513_v13, 7 }
  0xc4   : > { %852 = vrot.lane.b32.xlu1 %v2444_v8, %s1904_s7  ;;  %850 = vrot.lane.b32.xlu0 %v632_v26, %s1904_s7  ;;  %v342_v26 = vadd.f32 %v1970_v4, %v303_v19  ;;  %v974_v19 = vsel %vm959_vm5, %v2102_v37, %v2455_v10 }
  0xc5   : > { %1827 = vmatprep.mubr.msk.bf16.mxu0 %vm1266_vm13, %v1212_v20  ;;  %v455_v37 = vsel %vm425_vm0, %v424_v11, %v409_v1 }
  0xc6   : > { %v2471_v27 = vpop.permute.xlu1 %678  ;;  %v934_v29 = vpop.permute.xlu0 %933  ;;  %v374_v45 = vmax.f32 %v342_v26, 0.0 }
  0xc7   : > { %v1214_v23 = vsel %vm1206_vm12, %v1181_v28, %v934_v29  ;;  %v267_v29 = vld [vmem:[%s1965_s27 + $0xf0] sm:$0xff]  ;;  %v977_v32 = vsel %vm959_vm5, %v2135_v56, %v2471_v27 }
  0xc8   : > { %885 = vrot.lane.b32.xlu1 %v2465_v18, %s1905_s8  ;;  %883 = vrot.lane.b32.xlu0 %v2411_v44, %s1905_s8  ;;  %v423_v51 = vrot.slane %v374_v45, 7  ;;  %v552_v9 = vrot.slane %v374_v45, 1 }
  0xc9   : > { %1828 = vmatmul.mubr.msk.bf16.gmra.mxu0 %vm1266_vm13, %v1214_v23 }
  0xca   : > { %v2484_v34 = vpop.permute.xlu1 %726  ;;  %v725_v35 = vpop.permute.xlu0 %724  ;;  %v454_v47 = vsel %vm425_vm0, %v423_v51, %v408_v50  ;;  %v439_v2 = vsel %vm425_vm0, %v408_v50, %v423_v51  ;;  %v583_v17 = vsel %vm554_vm1, %v552_v9, %v537_v7  ;;  %v568_v20 = vsel %vm554_vm1, %v537_v7, %v552_v9 }
  0xcb   : > { %v1018_v6 = vsel %vm1008_vm6, %v974_v19, %v725_v35  ;;  %v618_v21 = vsel %vm385_vm2, %v583_v17, 0.0  ;;  %v1020_v35 = vsel %vm1008_vm6, %v977_v32, %v2484_v34 }
  0xcc   : > { %917 = vrot.lane.b32.xlu1 %v521_v33, %s1906_s9  ;;  %915 = vrot.lane.b32.xlu0 %v2424_v54, %s1906_s9  ;;  %v635_v23 = vpack.c.bf16 %v618_v21, %v568_v20 }
  0xce   : > { %v775_v36 = vpop.permute.xlu1 %774  ;;  %v773_v49 = vpop.permute.xlu0 %772 }
  0xcf   : > { %v1051_v22 = vsel %vm1041_vm7, %v1018_v6, %v773_v49  ;;  %v1053_v56 = vsel %vm1041_vm7, %v1020_v35, %v775_v36 }
  0xd0   : > { %692 = vrot.lane.b32.xlu1 %v2424_v54, %s1901_s21  ;;  %947 = vrot.lane.b32.xlu0 %v2444_v8, %s1907_s12  ;;  %v488_v54 = vsel %vm382_vm3, %v454_v47, 0.0  ;;  %v553_v47 = vrot.slane %v2515_v16, 1 }
  0xd1   : > { %v2520_v4 = vpack.c.bf16 %v439_v2, %v488_v54  ;;  %v523_v54 = vpack.c.bf16 %v2515_v16, %v2513_v13 }
  0xd2   : > { %v808_v60 = vpop.permute.xlu1 %807  ;;  %v806_v53 = vpop.permute.xlu0 %805  ;;  %v584_v7 = vsel %vm554_vm1, %v553_v47, %v538_v55 }
  0xd3   : > { %v1084_v10 = vsel %vm1074_vm8, %v1051_v22, %v806_v53  ;;  %v1086_v43 = vsel %vm1074_vm8, %v1053_v56, %v808_v60  ;;  %v620_v17 = vsel %vm385_vm2, %v584_v7, 0.0 }
  0xd4   : > { %694 = vrot.lane.b32.xlu1 %v521_v33, %s1901_s21  ;;  %949 = vrot.lane.b32.xlu0 %v634_v38, %s1907_s12 }
  0xd6   : > { %v841_v57 = vpop.permute.xlu1 %840  ;;  %v839_v63 = vpop.permute.xlu0 %838 }
  0xd7   : > { %v1117_v26 = vsel %vm1107_vm9, %v1084_v10, %v839_v63  ;;  %v1119_v50 = vsel %vm1107_vm9, %v1086_v43, %v841_v57 }
  0xd8   : > { %742 = vrot.lane.b32.xlu1 %v634_v38, %s1900_s20  ;;  %740 = vrot.lane.b32.xlu0 %v2444_v8, %s1900_s20  ;;  %v522_v8 = vpack.c.bf16 %v374_v45, %v373_v42  ;;  %v440_v42 = vsel %vm425_vm0, %v409_v1, %v424_v11  ;;  %v490_v45 = vsel %vm382_vm3, %v455_v37, 0.0 }
  0xd9   : > { %v2567_v36 = vpack.c.bf16 %v440_v42, %v490_v45 }
  0xda   : > { %v874_v5 = vpop.permute.xlu1 %873  ;;  %v872_v59 = vpop.permute.xlu0 %871 }
  0xdb   : > { %v1150_v40 = vsel %vm1140_vm10, %v1117_v26, %v872_v59  ;;  %v1152_v51 = vsel %vm1140_vm10, %v1119_v50, %v874_v5  ;;  %v569_v59 = vsel %vm554_vm1, %v538_v55, %v553_v47 }
  0xdc   : > { %790 = vrot.lane.b32.xlu1 %v2520_v4, %s1903_s6  ;;  %788 = vrot.lane.b32.xlu0 %v2465_v18, %s1903_s6  ;;  %v636_v19 = vpack.c.bf16 %v620_v17, %v569_v59 }
  0xde   : > { %v906_v24 = vpop.permute.xlu1 %905  ;;  %v904_v28 = vpop.permute.xlu0 %903 }
  0xdf   : > { %v1183_v27 = vsel %vm1173_vm11, %v1150_v40, %v904_v28  ;;  %v1185_v58 = vsel %vm1173_vm11, %v1152_v51, %v906_v24 }
  0xe0   : > { %823 = vrot.lane.b32.xlu1 %v522_v8, %s1902_s30  ;;  %821 = vrot.lane.b32.xlu0 %v521_v33, %s1902_s30  ;;  %v1889_v33 = vld [vmem:[%s2871_s2] ss:$0 sm:$0xff] }
  0xe1   : > { %v306_v39 = vmul.f32 %v1889_v33, %v267_v29  ;;  %v307_v34 = vmul.f32 %v1889_v33, %v268_v30 }
  0xe2   : > { %v681_v46 = vpop.permute.xlu1 %680  ;;  %v936_v48 = vpop.permute.xlu0 %935 }
  0xe3   : > { %v1216_v49 = vsel %vm1206_vm12, %v1183_v27, %v936_v48  ;;  %v345_v62 = vadd.f32 %v1890_v61, %v306_v39  ;;  %v980_v35 = vsel %vm959_vm5, %v2169_v25, %v681_v46 }
  0xe4   : > { %856 = vrot.lane.b32.xlu1 %v635_v23, %s1904_s7  ;;  %854 = vrot.lane.b32.xlu0 %v634_v38, %s1904_s7  ;;  %v346_v38 = vadd.f32 %v1890_v61, %v307_v34 }
  0xe5   : > { %1831 = vmatprep.mubr.msk.bf16.mxu0 %vm1266_vm13, %v1216_v49  ;;  %v377_v9 = vmax.f32 %v345_v62, 0.0 }
  0xe6   : > { %v683_v53 = vpop.permute.xlu1 %682  ;;  %v938_v60 = vpop.permute.xlu0 %937  ;;  %v378_v5 = vmax.f32 %v346_v38, 0.0 }
  0xe7   : > { %v1218_v2 = vsel %vm1206_vm12, %v1185_v58, %v938_v60  ;;  %v637_v1 = vrot.slane %v377_v9, 7  ;;  %v645_v37 = vrot.slane %v377_v9, 1  ;;  %v983_v46 = vsel %vm959_vm5, %v2195_v41, %v683_v53 }
  0xe8   : > { %889 = vrot.lane.b32.xlu1 %v2567_v36, %s1905_s8  ;;  %887 = vrot.lane.b32.xlu0 %v2520_v4, %s1905_s8  ;;  %v638_v11 = vrot.slane %v378_v5, 7  ;;  %v646_v10 = vrot.slane %v378_v5, 1  ;;  %v644_v40 = vpack.c.bf16 %v378_v5, %v377_v9 }
  0xe9   : > { %1832 = vmatmul.mubr.msk.bf16.gmra.mxu0 %vm1266_vm13, %v1218_v2 }
  0xea   : > { %v731_v57 = vpop.permute.xlu1 %730  ;;  %v729_v63 = vpop.permute.xlu0 %728  ;;  %v640_v21 = vsel %vm425_vm0, %v638_v11, %v637_v1  ;;  %v639_v22 = vsel %vm425_vm0, %v637_v1, %v638_v11  ;;  %v648_v26 = vsel %vm554_vm1, %v646_v10, %v645_v37 }
  0xeb   : > { %v641_v24 = vsel %vm382_vm3, %v640_v21, 0.0  ;;  %v1022_v42 = vsel %vm1008_vm6, %v980_v35, %v729_v63  ;;  %v650_v45 = vsel %vm385_vm2, %v648_v26, 0.0  ;;  %v1024_v39 = vsel %vm1008_vm6, %v983_v46, %v731_v57 }
  0xec   : > { %921 = vrot.lane.b32.xlu1 %v523_v54, %s1906_s9  ;;  %919 = vrot.lane.b32.xlu0 %v522_v8, %s1906_s9  ;;  %v643_v29 = vpack.c.bf16 %v639_v22, %v641_v24 }
  0xee   : > { %v779_v13 = vpop.permute.xlu1 %778  ;;  %v777_v16 = vpop.permute.xlu0 %776 }
  0xef   : > { %v1055_v56 = vsel %vm1041_vm7, %v1022_v42, %v777_v16  ;;  %v1057_v34 = vsel %vm1041_vm7, %v1024_v39, %v779_v13 }
  0xf0   : > { %696 = vrot.lane.b32.xlu1 %v522_v8, %s1901_s21  ;;  %951 = vrot.lane.b32.xlu0 %v635_v23, %s1907_s12 }
  0xf2   : > { %v812_v6 = vpop.permute.xlu1 %811  ;;  %v810_v20 = vpop.permute.xlu0 %809 }
  0xf3   : > { %v1088_v25 = vsel %vm1074_vm8, %v1055_v56, %v810_v20  ;;  %v1090_v51 = vsel %vm1074_vm8, %v1057_v34, %v812_v6 }
  0xf4   : > { %698 = vrot.lane.b32.xlu1 %v523_v54, %s1901_s21  ;;  %953 = vrot.lane.b32.xlu0 %v636_v19, %s1907_s12 }
  0xf6   : > { %v845_v28 = vpop.permute.xlu1 %844  ;;  %v843_v8 = vpop.permute.xlu0 %842 }
  0xf7   : > { %v1121_v33 = vsel %vm1107_vm9, %v1088_v25, %v843_v8  ;;  %v1123_v55 = vsel %vm1107_vm9, %v1090_v51, %v845_v28 }
  0xf8   : > { %746 = vrot.lane.b32.xlu1 %v636_v19, %s1900_s20  ;;  %744 = vrot.lane.b32.xlu0 %v635_v23, %s1900_s20  ;;  %v647_v23 = vsel %vm554_vm1, %v645_v37, %v646_v10 }
  0xf9   : > { %v651_v3 = vpack.c.bf16 %v650_v45, %v647_v23 }
  0xfa   : > { %v878_v30 = vpop.permute.xlu1 %877  ;;  %v876_v32 = vpop.permute.xlu0 %875 }
  0xfb   : > { %v1154_v15 = vsel %vm1140_vm10, %v1121_v33, %v876_v32  ;;  %v1156_v58 = vsel %vm1140_vm10, %v1123_v55, %v878_v30 }
  0xfc   : > { %794 = vrot.lane.b32.xlu1 %v643_v29, %s1903_s6  ;;  %792 = vrot.lane.b32.xlu0 %v2567_v36, %s1903_s6 }
  0xfe   : > { %v910_v27 = vpop.permute.xlu1 %909  ;;  %v908_v48 = vpop.permute.xlu0 %907 }
  0xff   : > { %v1187_v43 = vsel %vm1173_vm11, %v1154_v15, %v908_v48  ;;  %v1189_v53 = vsel %vm1173_vm11, %v1156_v58, %v910_v27 }
 0x100   : > { %827 = vrot.lane.b32.xlu1 %v644_v40, %s1902_s30  ;;  %825 = vrot.lane.b32.xlu0 %v523_v54, %s1902_s30  ;;  %s2711_s30 = scalar_lea.vmem %s2873_s4, %s1790_s24  ;;  %s1764_s24 = sshll.u32 %s2876_s19, 1 }
 0x102   : > { %v685_v49 = vpop.permute.xlu1 %684  ;;  %v940_v50 = vpop.permute.xlu0 %939 }
 0x103   : > { %v1220_v41 = vsel %vm1206_vm12, %v1187_v43, %v940_v50  ;;  %v986_v17 = vsel %vm959_vm5, %v2229_v12, %v685_v49 }
 0x104   : > { %860 = vrot.lane.b32.xlu1 %v651_v3, %s1904_s7  ;;  %858 = vrot.lane.b32.xlu0 %v636_v19, %s1904_s7 }
 0x105   : > { %1835 = vmatprep.mubr.msk.bf16.mxu0 %vm1266_vm13, %v1220_v41 }
 0x106   : > { %v687_v60 = vpop.permute.xlu1 %686  ;;  %v942_v47 = vpop.permute.xlu0 %941 }
 0x107   : > { %v1222_v61 = vsel %vm1206_vm12, %v1189_v53, %v942_v47 }
 0x108   : > { %893 = vrot.lane.b32.xlu1 %v1899_v0, %s1905_s8  ;;  %891 = vrot.lane.b32.xlu0 %v643_v29, %s1905_s8  ;;  %s235_s8 = scalar_lea.vmem %s2874_s5, %s1764_s24 }
 0x109   : > { %1836 = vmatmul.mubr.msk.bf16.gmra.mxu0 %vm1266_vm13, %v1222_v61 }
 0x10a   : > { %v735_v62 = vpop.permute.xlu1 %734  ;;  %v733_v38 = vpop.permute.xlu0 %732 }
 0x10b   : > { %v1026_v13 = vsel %vm1008_vm6, %v986_v17, %v733_v38 }
 0x10c   : > { %925 = vrot.lane.b32.xlu1 %v1899_v0, %s1906_s9  ;;  %923 = vrot.lane.b32.xlu0 %v644_v40, %s1906_s9 }
 0x10e   : > { %v783_v2 = vpop.permute.xlu1 %782  ;;  %v781_v54 = vpop.permute.xlu0 %780 }
 0x10f   : > { %v1059_v16 = vsel %vm1041_vm7, %v1026_v13, %v781_v54 }
 0x110   : > { %957 = vrot.lane.b32.xlu1 %v1899_v0, %s1907_s12  ;;  %955 = vrot.lane.b32.xlu0 %v651_v3, %s1907_s12  ;;  %v989_v0 = vsel %vm959_vm5, %v2255_v31, %v687_v60 }
 0x111   : > { %v1028_v20 = vsel %vm1008_vm6, %v989_v0, %v735_v62 }
 0x112   : > { %v816_v57 = vpop.permute.xlu1 %815  ;;  %v814_v63 = vpop.permute.xlu0 %813  ;;  %v1061_v22 = vsel %vm1041_vm7, %v1028_v20, %v783_v2 }
 0x113   : > { %v1092_v19 = vsel %vm1074_vm8, %v1059_v16, %v814_v63  ;;  %v1094_v8 = vsel %vm1074_vm8, %v1061_v22, %v816_v57 }
 0x116   : > { %v849_v7 = vpop.permute.xlu1 %848  ;;  %v847_v9 = vpop.permute.xlu0 %846 }
 0x117   : > { %v1125_v6 = vsel %vm1107_vm9, %v1092_v19, %v847_v9  ;;  %v1127_v10 = vsel %vm1107_vm9, %v1094_v8, %v849_v7 }
 0x11a   : > { %v882_v5 = vpop.permute.xlu1 %881  ;;  %v880_v59 = vpop.permute.xlu0 %879 }
 0x11b   : > { %v1158_v21 = vsel %vm1140_vm10, %v1125_v6, %v880_v59  ;;  %v1160_v31 = vsel %vm1140_vm10, %v1127_v10, %v882_v5 }
 0x11e   : > { %v914_v1 = vpop.permute.xlu1 %913  ;;  %v912_v11 = vpop.permute.xlu0 %911 }
 0x11f   : > { %v1191_v12 = vsel %vm1173_vm11, %v1158_v21, %v912_v11  ;;  %v1193_v29 = vsel %vm1173_vm11, %v1160_v31, %v914_v1 }
 0x122   : > { %v689_v24 = vpop.permute.xlu1 %688  ;;  %v944_v28 = vpop.permute.xlu0 %943 }
 0x123   : > { %v1224_v37 = vsel %vm1206_vm12, %v1191_v12, %v944_v28  ;;  %v992_v33 = vsel %vm959_vm5, %v2304_v14, %v689_v24 }
 0x124   : > { %1839 = vmatprep.mubr.msk.bf16.mxu1 %vm1266_vm13, %v1224_v37 }
 0x126   : > { %v691_v30 = vpop.permute.xlu1 %690  ;;  %v946_v32 = vpop.permute.xlu0 %945 }
 0x127   : > { %v1226_v26 = vsel %vm1206_vm12, %v1193_v29, %v946_v32  ;;  %v995_v49 = vsel %vm959_vm5, %v2356_v52, %v691_v30 }
 0x128   : > { %1840 = vmatmul.mubr.msk.bf16.vlgmr.msra.gmra.mxu1 %vm1266_vm13, %v1226_v26 }
 0x12a   : > { %v739_v35 = vpop.permute.xlu1 %738  ;;  %v737_v40 = vpop.permute.xlu0 %736 }
 0x12b   : > { %v1030_v3 = vsel %vm1008_vm6, %v992_v33, %v737_v40  ;;  %v1032_v51 = vsel %vm1008_vm6, %v995_v49, %v739_v35 }
 0x12e   : > { %v787_v42 = vpop.permute.xlu1 %786  ;;  %v785_v23 = vpop.permute.xlu0 %784 }
 0x12f   : > { %v1063_v39 = vsel %vm1041_vm7, %v1030_v3, %v785_v23  ;;  %v1065_v55 = vsel %vm1041_vm7, %v1032_v51, %v787_v42 }
 0x132   : > { %v820_v45 = vpop.permute.xlu1 %819  ;;  %v818_v56 = vpop.permute.xlu0 %817 }
 0x133   : > { %v1096_v43 = vsel %vm1074_vm8, %v1063_v39, %v818_v56  ;;  %v1098_v60 = vsel %vm1074_vm8, %v1065_v55, %v820_v45 }
 0x136   : > { %v853_v27 = vpop.permute.xlu1 %852  ;;  %v851_v48 = vpop.permute.xlu0 %850 }
 0x137   : > { %v1129_v50 = vsel %vm1107_vm9, %v1096_v43, %v851_v48  ;;  %v1131_v61 = vsel %vm1107_vm9, %v1098_v60, %v853_v27 }
 0x13a   : > { %v886_v25 = vpop.permute.xlu1 %885  ;;  %v884_v46 = vpop.permute.xlu0 %883 }
 0x13b   : > { %v1162_v41 = vsel %vm1140_vm10, %v1129_v50, %v884_v46  ;;  %v1164_v52 = vsel %vm1140_vm10, %v1131_v61, %v886_v25 }
 0x13e   : > { %v918_v15 = vpop.permute.xlu1 %917  ;;  %v916_v34 = vpop.permute.xlu0 %915 }
 0x13f   : > { %v1195_v14 = vsel %vm1173_vm11, %v1162_v41, %v916_v34  ;;  %v1197_v62 = vsel %vm1173_vm11, %v1164_v52, %v918_v15 }
 0x142   : > { %v693_v58 = vpop.permute.xlu1 %692  ;;  %v948_v53 = vpop.permute.xlu0 %947 }
 0x143   : > { %v1228_v47 = vsel %vm1206_vm12, %v1195_v14, %v948_v53  ;;  %v998_v11 = vsel %vm959_vm5, %v2411_v44, %v693_v58 }
 0x144   : > { %1843 = vmatprep.mubr.msk.bf16.mxu1 %vm1266_vm13, %v1228_v47 }
 0x146   : > { %v695_v38 = vpop.permute.xlu1 %694  ;;  %v950_v2 = vpop.permute.xlu0 %949 }
 0x147   : > { %v1230_v54 = vsel %vm1206_vm12, %v1197_v62, %v950_v2  ;;  %v1001_v22 = vsel %vm959_vm5, %v2465_v18, %v695_v38 }
 0x148   : > { %1844 = vmatmul.mubr.msk.bf16.gmra.mxu1 %vm1266_vm13, %v1230_v54 }
 0x14a   : > { %v743_v57 = vpop.permute.xlu1 %742  ;;  %v741_v63 = vpop.permute.xlu0 %740 }
 0x14b   : > { %v1034_v19 = vsel %vm1008_vm6, %v998_v11, %v741_v63  ;;  %v1036_v24 = vsel %vm1008_vm6, %v1001_v22, %v743_v57 }
 0x14e   : > { %v791_v7 = vpop.permute.xlu1 %790  ;;  %v789_v9 = vpop.permute.xlu0 %788 }
 0x14f   : > { %v1067_v0 = vsel %vm1041_vm7, %v1034_v19, %v789_v9  ;;  %v1069_v44 = vsel %vm1041_vm7, %v1036_v24, %v791_v7 }
 0x152   : > { %v824_v5 = vpop.permute.xlu1 %823  ;;  %v822_v59 = vpop.permute.xlu0 %821 }
 0x153   : > { %v1100_v21 = vsel %vm1074_vm8, %v1067_v0, %v822_v59  ;;  %v1102_v31 = vsel %vm1074_vm8, %v1069_v44, %v824_v5 }
 0x156   : > { %v857_v17 = vpop.permute.xlu1 %856  ;;  %v855_v13 = vpop.permute.xlu0 %854 }
 0x157   : > { %v1133_v12 = vsel %vm1107_vm9, %v1100_v21, %v855_v13  ;;  %v1135_v30 = vsel %vm1107_vm9, %v1102_v31, %v857_v17 }
 0x15a   : > { %v890_v16 = vpop.permute.xlu1 %889  ;;  %v888_v1 = vpop.permute.xlu0 %887 }
 0x15b   : > { %v1166_v28 = vsel %vm1140_vm10, %v1133_v12, %v888_v1  ;;  %v1168_v18 = vsel %vm1140_vm10, %v1135_v30, %v890_v16 }
 0x15e   : > { %v922_v6 = vpop.permute.xlu1 %921  ;;  %v920_v20 = vpop.permute.xlu0 %919 }
 0x15f   : > { %v1199_v8 = vsel %vm1173_vm11, %v1166_v28, %v920_v20  ;;  %v1201_v32 = vsel %vm1173_vm11, %v1168_v18, %v922_v6 }
 0x162   : > { %v697_v37 = vpop.permute.xlu1 %696  ;;  %v952_v10 = vpop.permute.xlu0 %951 }
 0x163   : > { %v1232_v29 = vsel %vm1206_vm12, %v1199_v8, %v952_v10  ;;  %v1004_v7 = vsel %vm959_vm5, %v2520_v4, %v697_v37 }
 0x164   : > { %1847 = vmatprep.mubr.msk.bf16.mxu1 %vm1266_vm13, %v1232_v29 }
 0x166   : > { %v699_v26 = vpop.permute.xlu1 %698  ;;  %v954_v35 = vpop.permute.xlu0 %953 }
 0x167   : > { %v1234_v40 = vsel %vm1206_vm12, %v1201_v32, %v954_v35  ;;  %v1007_v9 = vsel %vm959_vm5, %v2567_v36, %v699_v26 }
 0x168   : > { %1848 = vmatmul.mubr.msk.bf16.gmra.mxu1 %vm1266_vm13, %v1234_v40 }
 0x169   : > { %v1825_v42 = vpop.f32.mrf.mxu0 }
 0x16a   : > { %1466 = vst.msk [vmem:[%s2711_s30 + $0x10] sm:$0xff] %vm959_vm5, %v1825_v42  ;;  %v747_v23 = vpop.permute.xlu1 %746  ;;  %v745_v45 = vpop.permute.xlu0 %744  ;;  %v1567_v3 = vmul.f32 %v1825_v42, %v1825_v42  ;;  %v1499_v49 = vsel %vm959_vm5, %v1825_v42, 0.0 }
 0x16b   : > { %v1337_v56 = vpop.f32.mrf.mxu0  ;;  %v1040_v5 = vsel %vm1008_vm6, %v1007_v9, %v747_v23  ;;  %v1038_v59 = vsel %vm1008_vm6, %v1004_v7, %v745_v45 }
 0x16c   : > { %1464 = vst.msk [vmem:[%s2711_s30] sm:$0xff] %vm959_vm5, %v1337_v56  ;;  %v1565_v48 = vmul.f32 %v1337_v56, %v1337_v56  ;;  %v1496_v39 = vsel %vm959_vm5, %v1337_v56, 0.0  ;;  %v1600_v60 = vsel %vm959_vm5, %v1567_v3, 0.0 }
 0x16d   : > { %v1826_v27 = vpop.f32.mrf.mxu0 }
 0x16e   : > { %1467 = vst.msk [vmem:[%s2711_s30 + $0x18] sm:$0xff] %vm959_vm5, %v1826_v27  ;;  %v795_v25 = vpop.permute.xlu1 %794  ;;  %v793_v46 = vpop.permute.xlu0 %792  ;;  %v1597_v50 = vsel %vm959_vm5, %v1565_v48, 0.0  ;;  %v1568_v51 = vmul.f32 %v1826_v27, %v1826_v27  ;;  %v1501_v47 = vsel %vm959_vm5, %v1826_v27, 0.0 }
 0x16f   : > { %v1340_v33 = vpop.f32.mrf.mxu0  ;;  %v1073_v17 = vsel %vm1041_vm7, %v1040_v5, %v795_v25  ;;  %v1071_v13 = vsel %vm1041_vm7, %v1038_v59, %v793_v46 }
 0x170   : > { %1465 = vst.msk [vmem:[%s2711_s30 + $0x8] sm:$0xff] %vm959_vm5, %v1340_v33  ;;  %v1497_v15 = vsel %vm959_vm5, %v1340_v33, 0.0  ;;  %v1566_v34 = vmul.f32 %v1340_v33, %v1340_v33  ;;  %v1602_v62 = vsel %vm959_vm5, %v1568_v51, 0.0 }
 0x171   : > { %v1498_v43 = vadd.f32 %v1497_v15, %v1496_v39 }
 0x172   : > { %v1598_v41 = vsel %vm959_vm5, %v1566_v34, 0.0  ;;  %v828_v55 = vpop.permute.xlu1 %827  ;;  %v826_v14 = vpop.permute.xlu0 %825 }
 0x173   : > { %v1500_v58 = vadd.f32 %v1499_v49, %v1498_v43  ;;  %v1599_v53 = vadd.f32 %v1598_v41, %v1597_v50  ;;  %v1106_v11 = vsel %vm1074_vm8, %v1073_v17, %v828_v55  ;;  %v1104_v19 = vsel %vm1074_vm8, %v1071_v13, %v826_v14 }
 0x175   : > { %v1601_v61 = vadd.f32 %v1600_v60, %v1599_v53  ;;  %v1502_v52 = vadd.f32 %v1501_v47, %v1500_v58 }
 0x176   : > { %v861_v38 = vpop.permute.xlu1 %860  ;;  %v859_v2 = vpop.permute.xlu0 %858 }
 0x177   : > { %v1603_v54 = vadd.f32 %v1602_v62, %v1601_v61  ;;  %v1139_v4 = vsel %vm1107_vm9, %v1106_v11, %v861_v38  ;;  %v1137_v36 = vsel %vm1107_vm9, %v1104_v19, %v859_v2 }
 0x17a   : > { %v894_v57 = vpop.permute.xlu1 %893  ;;  %v892_v63 = vpop.permute.xlu0 %891 }
 0x17b   : > { %v1172_v0 = vsel %vm1140_vm10, %v1139_v4, %v894_v57  ;;  %v1170_v6 = vsel %vm1140_vm10, %v1137_v36, %v892_v63 }
 0x17e   : > { %v926_v16 = vpop.permute.xlu1 %925  ;;  %v924_v1 = vpop.permute.xlu0 %923 }
 0x17f   : > { %v1205_v20 = vsel %vm1173_vm11, %v1172_v0, %v926_v16  ;;  %v1203_v21 = vsel %vm1173_vm11, %v1170_v6, %v924_v1 }
 0x182   : > { %v958_v22 = vpop.permute.xlu1 %957  ;;  %v956_v12 = vpop.permute.xlu0 %955 }
 0x183   : > { %v1238_v24 = vsel %vm1206_vm12, %v1205_v20, %v958_v22  ;;  %v1236_v28 = vsel %vm1206_vm12, %v1203_v21, %v956_v12 }
 0x184   : > { %1851 = vmatprep.mubr.msk.bf16.mxu1 %vm1266_vm13, %v1236_v28 }
 0x185   : > { %1852 = vmatmul.mubr.msk.bf16.gmra.mxu1 %vm1266_vm13, %v1238_v24 }
 0x189   : > { %v1829_v44 = vpop.f32.mrf.mxu0 }
 0x18a   : > { %1470 = vst.msk [vmem:[%s2711_s30 + $0x30] sm:$0xff] %vm959_vm5, %v1829_v44  ;;  %v1571_v26 = vmul.f32 %v1829_v44, %v1829_v44  ;;  %v1507_v23 = vsel %vm959_vm5, %v1829_v44, 0.0 }
 0x18b   : > { %v1353_v8 = vpop.f32.mrf.mxu0 }
 0x18c   : > { %1468 = vst.msk [vmem:[%s2711_s30 + $0x20] sm:$0xff] %vm959_vm5, %v1353_v8  ;;  %v1503_v37 = vsel %vm959_vm5, %v1353_v8, 0.0  ;;  %v1569_v10 = vmul.f32 %v1353_v8, %v1353_v8  ;;  %v1608_v25 = vsel %vm959_vm5, %v1571_v26, 0.0 }
 0x18d   : > { %v1504_v31 = vadd.f32 %v1503_v37, %v1502_v52  ;;  %v1830_v29 = vpop.f32.mrf.mxu0 }
 0x18e   : > { %v1604_v30 = vsel %vm959_vm5, %v1569_v10, 0.0  ;;  %1471 = vst.msk [vmem:[%s2711_s30 + $0x38] sm:$0xff] %vm959_vm5, %v1830_v29  ;;  %v1572_v45 = vmul.f32 %v1830_v29, %v1830_v29  ;;  %v1509_v46 = vsel %vm959_vm5, %v1830_v29, 0.0 }
 0x18f   : > { %v1605_v18 = vadd.f32 %v1604_v30, %v1603_v54  ;;  %v1356_v32 = vpop.f32.mrf.mxu0 }
 0x190   : > { %1469 = vst.msk [vmem:[%s2711_s30 + $0x28] sm:$0xff] %vm959_vm5, %v1356_v32  ;;  %v1505_v35 = vsel %vm959_vm5, %v1356_v32, 0.0  ;;  %v1570_v40 = vmul.f32 %v1356_v32, %v1356_v32  ;;  %v1610_v39 = vsel %vm959_vm5, %v1572_v45, 0.0 }
 0x191   : > { %v1506_v42 = vadd.f32 %v1505_v35, %v1504_v31 }
 0x192   : > { %v1606_v56 = vsel %vm959_vm5, %v1570_v40, 0.0 }
 0x193   : > { %v1508_v27 = vadd.f32 %v1507_v23, %v1506_v42  ;;  %v1607_v48 = vadd.f32 %v1606_v56, %v1605_v18 }
 0x195   : > { %v1609_v33 = vadd.f32 %v1608_v25, %v1607_v48  ;;  %v1510_v3 = vadd.f32 %v1509_v46, %v1508_v27 }
 0x197   : > { %v1611_v15 = vadd.f32 %v1610_v39, %v1609_v33 }
 0x1a9   : > { %v1833_v34 = vpop.f32.mrf.mxu0 }
 0x1aa   : > { %1474 = vst.msk [vmem:[%s2711_s30 + $0x50] sm:$0xff] %vm959_vm5, %v1833_v34  ;;  %v1575_v53 = vmul.f32 %v1833_v34, %v1833_v34  ;;  %v1515_v52 = vsel %vm959_vm5, %v1833_v34, 0.0 }
 0x1ab   : > { %v1369_v43 = vpop.f32.mrf.mxu0 }
 0x1ac   : > { %1472 = vst.msk [vmem:[%s2711_s30 + $0x40] sm:$0xff] %vm959_vm5, %v1369_v43  ;;  %v1511_v49 = vsel %vm959_vm5, %v1369_v43, 0.0  ;;  %v1573_v50 = vmul.f32 %v1369_v43, %v1369_v43  ;;  %v1616_v57 = vsel %vm959_vm5, %v1575_v53, 0.0 }
 0x1ad   : > { %v1512_v51 = vadd.f32 %v1511_v49, %v1510_v3  ;;  %v1834_v41 = vpop.f32.mrf.mxu0 }
 0x1ae   : > { %v1612_v55 = vsel %vm959_vm5, %v1573_v50, 0.0  ;;  %1475 = vst.msk [vmem:[%s2711_s30 + $0x58] sm:$0xff] %vm959_vm5, %v1834_v41  ;;  %v1576_v62 = vmul.f32 %v1834_v41, %v1834_v41  ;;  %v1517_v63 = vsel %vm959_vm5, %v1834_v41, 0.0 }
 0x1af   : > { %v1613_v14 = vadd.f32 %v1612_v55, %v1611_v15  ;;  %v1372_v58 = vpop.f32.mrf.mxu0 }
 0x1b0   : > { %1473 = vst.msk [vmem:[%s2711_s30 + $0x48] sm:$0xff] %vm959_vm5, %v1372_v58  ;;  %v1513_v60 = vsel %vm959_vm5, %v1372_v58, 0.0  ;;  %v1574_v47 = vmul.f32 %v1372_v58, %v1372_v58  ;;  %v1618_v5 = vsel %vm959_vm5, %v1576_v62, 0.0 }
 0x1b1   : > { %v1514_v61 = vadd.f32 %v1513_v60, %v1512_v51 }
 0x1b2   : > { %v1614_v38 = vsel %vm959_vm5, %v1574_v47, 0.0 }
 0x1b3   : > { %v1516_v2 = vadd.f32 %v1515_v52, %v1514_v61  ;;  %v1615_v54 = vadd.f32 %v1614_v38, %v1613_v14 }
 0x1b5   : > { %v1617_v7 = vadd.f32 %v1616_v57, %v1615_v54  ;;  %v1518_v9 = vadd.f32 %v1517_v63, %v1516_v2 }
 0x1b7   : > { %v1619_v59 = vadd.f32 %v1618_v5, %v1617_v7 }
 0x1c9   : > { %v1837_v17 = vpop.f32.mrf.mxu0 }
 0x1ca   : > { %1478 = vst.msk [vmem:[%s2711_s30 + $0x70] sm:$0xff] %vm959_vm5, %v1837_v17  ;;  %v1579_v6 = vmul.f32 %v1837_v17, %v1837_v17  ;;  %v1523_v12 = vsel %vm959_vm5, %v1837_v17, 0.0 }
 0x1cb   : > { %v1385_v13 = vpop.f32.mrf.mxu0 }
 0x1cc   : > { %1476 = vst.msk [vmem:[%s2711_s30 + $0x60] sm:$0xff] %vm959_vm5, %v1385_v13  ;;  %v1519_v16 = vsel %vm959_vm5, %v1385_v13, 0.0  ;;  %v1577_v1 = vmul.f32 %v1385_v13, %v1385_v13  ;;  %v1624_v37 = vsel %vm959_vm5, %v1579_v6, 0.0 }
 0x1cd   : > { %v1520_v11 = vadd.f32 %v1519_v16, %v1518_v9  ;;  %v1838_v19 = vpop.f32.mrf.mxu0 }
 0x1ce   : > { %v1620_v4 = vsel %vm959_vm5, %v1577_v1, 0.0  ;;  %1479 = vst.msk [vmem:[%s2711_s30 + $0x78] sm:$0xff] %vm959_vm5, %v1838_v19  ;;  %v1580_v24 = vmul.f32 %v1838_v19, %v1838_v19  ;;  %v1525_v10 = vsel %vm959_vm5, %v1838_v19, 0.0 }
 0x1cf   : > { %v1621_v36 = vadd.f32 %v1620_v4, %v1619_v59  ;;  %v1388_v0 = vpop.f32.mrf.mxu0 }
 0x1d0   : > { %1477 = vst.msk [vmem:[%s2711_s30 + $0x68] sm:$0xff] %vm959_vm5, %v1388_v0  ;;  %v1521_v20 = vsel %vm959_vm5, %v1388_v0, 0.0  ;;  %v1578_v21 = vmul.f32 %v1388_v0, %v1388_v0  ;;  %v1626_v30 = vsel %vm959_vm5, %v1580_v24, 0.0 }
 0x1d1   : > { %v1522_v22 = vadd.f32 %v1521_v20, %v1520_v11 }
 0x1d2   : > { %v1622_v28 = vsel %vm959_vm5, %v1578_v21, 0.0 }
 0x1d3   : > { %v1524_v44 = vadd.f32 %v1523_v12, %v1522_v22  ;;  %v1623_v8 = vadd.f32 %v1622_v28, %v1621_v36 }
 0x1d5   : > { %v1625_v31 = vadd.f32 %v1624_v37, %v1623_v8  ;;  %v1526_v29 = vadd.f32 %v1525_v10, %v1524_v44 }
 0x1d7   : > { %v1627_v18 = vadd.f32 %v1626_v30, %v1625_v31 }
 0x1e8   : > { %v1841_v32 = vpop.f32.mrf.mxu1 }
 0x1e9   : > { %1482 = vst.msk [vmem:[%s2711_s30 + $0x90] sm:$0xff] %vm959_vm5, %v1841_v32  ;;  %v1583_v48 = vmul.f32 %v1841_v32, %v1841_v32  ;;  %v1531_v3 = vsel %vm959_vm5, %v1841_v32, 0.0 }
 0x1ea   : > { %v1401_v26 = vpop.f32.mrf.mxu1 }
 0x1eb   : > { %1480 = vst.msk [vmem:[%s2711_s30 + $0x80] sm:$0xff] %vm959_vm5, %v1401_v26  ;;  %v1527_v35 = vsel %vm959_vm5, %v1401_v26, 0.0  ;;  %v1581_v40 = vmul.f32 %v1401_v26, %v1401_v26  ;;  %v1632_v49 = vsel %vm959_vm5, %v1583_v48, 0.0 }
 0x1ec   : > { %v1528_v42 = vadd.f32 %v1527_v35, %v1526_v29  ;;  %v1842_v23 = vpop.f32.mrf.mxu1 }
 0x1ed   : > { %v1628_v45 = vsel %vm959_vm5, %v1581_v40, 0.0  ;;  %1483 = vst.msk [vmem:[%s2711_s30 + $0x98] sm:$0xff] %vm959_vm5, %v1842_v23  ;;  %v1584_v39 = vmul.f32 %v1842_v23, %v1842_v23  ;;  %v1533_v50 = vsel %vm959_vm5, %v1842_v23, 0.0 }
 0x1ee   : > { %v1629_v56 = vadd.f32 %v1628_v45, %v1627_v18  ;;  %v1404_v27 = vpop.f32.mrf.mxu1 }
 0x1ef   : > { %1481 = vst.msk [vmem:[%s2711_s30 + $0x88] sm:$0xff] %vm959_vm5, %v1404_v27  ;;  %v1529_v25 = vsel %vm959_vm5, %v1404_v27, 0.0  ;;  %v1582_v46 = vmul.f32 %v1404_v27, %v1404_v27  ;;  %v1634_v55 = vsel %vm959_vm5, %v1584_v39, 0.0 }
 0x1f0   : > { %v1530_v33 = vadd.f32 %v1529_v25, %v1528_v42 }
 0x1f1   : > { %v1630_v15 = vsel %vm959_vm5, %v1582_v46, 0.0 }
 0x1f2   : > { %v1532_v34 = vadd.f32 %v1531_v3, %v1530_v33  ;;  %v1631_v43 = vadd.f32 %v1630_v15, %v1629_v56 }
 0x1f4   : > { %v1633_v51 = vadd.f32 %v1632_v49, %v1631_v43  ;;  %v1534_v41 = vadd.f32 %v1533_v50, %v1532_v34 }
 0x1f6   : > { %v1635_v14 = vadd.f32 %v1634_v55, %v1633_v51 }
 0x208   : > { %v1845_v58 = vpop.f32.mrf.mxu1 }
 0x209   : > { %1486 = vst.msk [vmem:[%s2711_s30 + $0xb0] sm:$0xff] %vm959_vm5, %v1845_v58  ;;  %v1587_v13 = vmul.f32 %v1845_v58, %v1845_v58  ;;  %v1539_v1 = vsel %vm959_vm5, %v1845_v58, 0.0 }
 0x20a   : > { %v1417_v53 = vpop.f32.mrf.mxu1 }
 0x20b   : > { %1484 = vst.msk [vmem:[%s2711_s30 + $0xa0] sm:$0xff] %vm959_vm5, %v1417_v53  ;;  %v1585_v38 = vmul.f32 %v1417_v53, %v1417_v53  ;;  %v1535_v54 = vsel %vm959_vm5, %v1417_v53, 0.0  ;;  %v1640_v19 = vsel %vm959_vm5, %v1587_v13, 0.0 }
 0x20c   : > { %v1846_v60 = vpop.f32.mrf.mxu1  ;;  %v1536_v9 = vadd.f32 %v1535_v54, %v1534_v41 }
 0x20d   : > { %1487 = vst.msk [vmem:[%s2711_s30 + $0xb8] sm:$0xff] %vm959_vm5, %v1846_v60  ;;  %v1636_v63 = vsel %vm959_vm5, %v1585_v38, 0.0  ;;  %v1588_v4 = vmul.f32 %v1846_v60, %v1846_v60  ;;  %v1541_v6 = vsel %vm959_vm5, %v1846_v60, 0.0 }
 0x20e   : > { %v1420_v47 = vpop.f32.mrf.mxu1  ;;  %v1637_v59 = vadd.f32 %v1636_v63, %v1635_v14 }
 0x20f   : > { %1485 = vst.msk [vmem:[%s2711_s30 + $0xa8] sm:$0xff] %vm959_vm5, %v1420_v47  ;;  %v1586_v57 = vmul.f32 %v1420_v47, %v1420_v47  ;;  %v1537_v7 = vsel %vm959_vm5, %v1420_v47, 0.0  ;;  %v1642_v12 = vsel %vm959_vm5, %v1588_v4, 0.0 }
 0x210   : > { %v1538_v17 = vadd.f32 %v1537_v7, %v1536_v9 }
 0x211   : > { %v1638_v5 = vsel %vm959_vm5, %v1586_v57, 0.0 }
 0x212   : > { %v1639_v16 = vadd.f32 %v1638_v5, %v1637_v59  ;;  %v1540_v11 = vadd.f32 %v1539_v1, %v1538_v17 }
 0x214   : > { %v1641_v0 = vadd.f32 %v1640_v19, %v1639_v16  ;;  %v1542_v22 = vadd.f32 %v1541_v6, %v1540_v11 }
 0x216   : > { %v1643_v8 = vadd.f32 %v1642_v12, %v1641_v0 }
 0x228   : > { %v1849_v61 = vpop.f32.mrf.mxu1 }
 0x229   : > { %1490 = vst.msk [vmem:[%s2711_s30 + $0xd0] sm:$0xff] %vm959_vm5, %v1849_v61  ;;  %v1591_v29 = vmul.f32 %v1849_v61, %v1849_v61  ;;  %v1547_v18 = vsel %vm959_vm5, %v1849_v61, 0.0 }
 0x22a   : > { %v1433_v52 = vpop.f32.mrf.mxu1 }
 0x22b   : > { %1488 = vst.msk [vmem:[%s2711_s30 + $0xc0] sm:$0xff] %vm959_vm5, %v1433_v52  ;;  %v1589_v36 = vmul.f32 %v1433_v52, %v1433_v52  ;;  %v1543_v20 = vsel %vm959_vm5, %v1433_v52, 0.0  ;;  %v1648_v35 = vsel %vm959_vm5, %v1591_v29, 0.0 }
 0x22c   : > { %v1850_v62 = vpop.f32.mrf.mxu1  ;;  %v1544_v44 = vadd.f32 %v1543_v20, %v1542_v22 }
 0x22d   : > { %1491 = vst.msk [vmem:[%s2711_s30 + $0xd8] sm:$0xff] %vm959_vm5, %v1850_v62  ;;  %v1644_v24 = vsel %vm959_vm5, %v1589_v36, 0.0  ;;  %v1592_v40 = vmul.f32 %v1850_v62, %v1850_v62  ;;  %v1549_v45 = vsel %vm959_vm5, %v1850_v62, 0.0 }
 0x22e   : > { %v1436_v2 = vpop.f32.mrf.mxu1  ;;  %v1645_v10 = vadd.f32 %v1644_v24, %v1643_v8 }
 0x22f   : > { %1489 = vst.msk [vmem:[%s2711_s30 + $0xc8] sm:$0xff] %vm959_vm5, %v1436_v2  ;;  %v1590_v21 = vmul.f32 %v1436_v2, %v1436_v2  ;;  %v1545_v28 = vsel %vm959_vm5, %v1436_v2, 0.0  ;;  %v1650_v46 = vsel %vm959_vm5, %v1592_v40, 0.0 }
 0x230   : > { %v1546_v31 = vadd.f32 %v1545_v28, %v1544_v44 }
 0x231   : > { %v1646_v37 = vsel %vm959_vm5, %v1590_v21, 0.0 }
 0x232   : > { %v1647_v30 = vadd.f32 %v1646_v37, %v1645_v10  ;;  %v1548_v32 = vadd.f32 %v1547_v18, %v1546_v31 }
 0x234   : > { %v1649_v42 = vadd.f32 %v1648_v35, %v1647_v30  ;;  %v1550_v48 = vadd.f32 %v1549_v45, %v1548_v32 }
 0x236   : > { %v1651_v39 = vadd.f32 %v1650_v46, %v1649_v42 }
 0x245   : > { %v1853_v26 = vpop.f32.mrf.mxu1 }
 0x246   : > { %1494 = vst.msk [vmem:[%s2711_s30 + $0xf0] sm:$0xff] %vm959_vm5, %v1853_v26  ;;  %v1595_v34 = vmul.f32 %v1853_v26, %v1853_v26  ;;  %v1555_v41 = vsel %vm959_vm5, %v1853_v26, 0.0 }
 0x247   : > { %v1449_v23 = vpop.f32.mrf.mxu1 }
 0x248   : > { %1492 = vst.msk [vmem:[%s2711_s30 + $0xe0] sm:$0xff] %vm959_vm5, %v1449_v23  ;;  %v1551_v56 = vsel %vm959_vm5, %v1449_v23, 0.0  ;;  %v1593_v27 = vmul.f32 %v1449_v23, %v1449_v23  ;;  %v1656_v60 = vsel %vm959_vm5, %v1595_v34, 0.0 }
 0x249   : > { %v1854_v25 = vpop.f32.mrf.mxu1  ;;  %v1552_v3 = vadd.f32 %v1551_v56, %v1550_v48 }
 0x24a   : > { %v1652_v33 = vsel %vm959_vm5, %v1593_v27, 0.0  ;;  %1495 = vst.msk [vmem:[%s2711_s30 + $0xf8] sm:$0xff] %vm959_vm5, %v1854_v25  ;;  %v1596_v55 = vmul.f32 %v1854_v25, %v1854_v25  ;;  %v1557_v47 = vsel %vm959_vm5, %v1854_v25, 0.0 }
 0x24b   : > { %v1452_v15 = vpop.f32.mrf.mxu1  ;;  %v1653_v50 = vadd.f32 %v1652_v33, %v1651_v39 }
 0x24c   : > { %1493 = vst.msk [vmem:[%s2711_s30 + $0xe8] sm:$0xff] %vm959_vm5, %v1452_v15  ;;  %v1553_v43 = vsel %vm959_vm5, %v1452_v15, 0.0  ;;  %v1594_v49 = vmul.f32 %v1452_v15, %v1452_v15  ;;  %v1658_v62 = vsel %vm959_vm5, %v1596_v55, 0.0 }
 0x24d   : > { %v1554_v51 = vadd.f32 %v1553_v43, %v1552_v3 }
 0x24e   : > { %v1654_v14 = vsel %vm959_vm5, %v1594_v49, 0.0 }
 0x24f   : > { %v1556_v58 = vadd.f32 %v1555_v41, %v1554_v51  ;;  %v1655_v53 = vadd.f32 %v1654_v14, %v1653_v50 }
 0x251   : > { %v1558_v61 = vadd.f32 %v1557_v47, %v1556_v58  ;;  %v1657_v52 = vadd.f32 %v1656_v60, %v1655_v53 }
 0x253   : > { %v1559_v38 = vrot.slane %v1558_v61, 4  ;;  %v1659_v2 = vadd.f32 %v1658_v62, %v1657_v52 }
 0x255   : > { %v1560_v54 = vadd.f32 %v1559_v38, %v1558_v61  ;;  %v1660_v57 = vrot.slane %v1659_v2, 4 }
 0x257   : > { %v1561_v63 = vrot.slane %v1560_v54, 2  ;;  %v1661_v7 = vadd.f32 %v1660_v57, %v1659_v2 }
 0x259   : > { %v1562_v9 = vadd.f32 %v1561_v63, %v1560_v54  ;;  %v1662_v5 = vrot.slane %v1661_v7, 2 }
 0x25b   : > { %v1563_v59 = vrot.slane %v1562_v9, 1  ;;  %v1663_v17 = vadd.f32 %v1662_v5, %v1661_v7 }
 0x25d   : > { %v1564_v13 = vadd.f32 %v1563_v59, %v1562_v9  ;;  %v1664_v16 = vrot.slane %v1663_v17, 1 }
 0x25f   : > { %v1665_v1 = vadd.f32 %v1664_v16, %v1663_v17  ;;  %1667 = vst.msk [vmem:[%s235_s8] sm:$0x1] %vm1666_vm14, %v1564_v13 }
 0x261   : > { %1668 = vst.msk [vmem:[%s235_s8 + $0x1] sm:$0x1] %vm1666_vm14, %v1665_v1 }
 0x262 PF: > { %s16_s18 = sadd.s32 1, %s1897_s18  }
 0x263   : > { %p13_p4 = scmp.ge.s32.totalorder %s16_s18, 4  }
 0x265   :  { %15 = sbr.rel (!%p13_p4) target bundleno = 1 (0x1), region = 78 }

// kernel: residual_block_forward.3
= control target key start
LH: loop header
LB: loop body
LE: loop exit
PB: predicated region body
PF: predicated region fallthrough
CT: control target
= control target key end

     0   :  { %s2394_s21 = smov 0   ;;  %s3447_s0 = inlined_call_operand.vmem [shape: f32[2,16,16,4], index: 0, kind: input, shape index: {}]   ;;  %s3448_s1 = inlined_call_operand.vmem [shape: bf16[36,8], index: 1, kind: input, shape index: {}]   ;;  %s3449_s2 = inlined_call_operand.vmem [shape: bf16[4,8], index: 2, kind: input, shape index: {}]   ;;  %s3450_s3 = inlined_call_operand.vmem [shape: f32[2,16,16,8], index: 3, kind: output, shape index: {0}]   ;;  %s3451_s4 = inlined_call_operand.vmem [shape: f32[2,2,1,8], index: 4, kind: output, shape index: {1}]   ;;  %s3452_s5 = inlined_call_operand.vmem [shape: f32[2,16,16,8], index: 5, kind: output, shape index: {2}]   ;;  %s3453_s6 = inlined_call_operand.vmem [shape: f32[2,2,1,8], index: 6, kind: output, shape index: {3}]  }
   0x1 LB: > { %s2159_s22 = sadd.s32 4294967295, %s2348_s21   ;;  %p2163_p0 = scmp.ge.s32.totalorder %s2348_s21, 1  ;;  %s2348_s21 = sphi %s2394_s21, %s17_s21  }
   0x2   : > { %p219_p1 = scmp.lt.s32.totalorder %s2348_s21, 3 }
   0x4   : > { %p220_p2 = pnand %p2163_p0, %p219_p1 }
   0x5   : > { %s2351_s23 = smov (!%p220_p2), 8   ;;  %s2352_s24 = smov (!%p220_p2), 4  }
   0x6   : > { %223 = sbr.rel (%p220_p2) target bundleno = 605 (0x25d), region = 32  ;;  %p262_p3 = scmp.lt.s32.totalorder (!%p220_p2), %s2159_s22, 1 }
   0x7   : > { %s2353_s29 = smov (!%p220_p2), 16   ;;  %s2354_s30 = smov (!%p220_p2), 12  }
   0x8   : > { %s2355_s7 = smov (!%p220_p2), 20   ;;  %s2356_s8 = smov (!%p220_p2), 24  }
   0x9   : > { %s2357_s9 = smov (!%p220_p2), 28   ;;  %s2358_s12 = smov (!%p220_p2), 32  }
   0xb   : > { %v318_v0 = vlaneseq  ;;  %v2350_v1 = vmov 0.0|0.0   ;;  %s3455_s22 = smov (!%p262_p3, %s2159_s22), 1  ;;  %vm894_vm4 = vcmask 31744   ;;  %v2339_v50 = vld [vmem:[%s3448_s1 + $0x10] ss:$0 sps:$4 sm:$0x33]  }
   0xc   : > { %651 = vrot.lane.b32.xlu1 %v2350_v1, %s2351_s23  ;;  %603 = vrot.lane.b32.xlu0 %v2350_v1, %s2352_s24  ;;  %s2414_s25 = sshll.u32 %s3455_s22, 8  ;;  %vm1222_vm5 = vcmask 1041408   ;;  %v2340_v55 = vld [vmem:[%s3448_s1 + $0x8] sm:$0xff]   ;;  %v2341_v61 = vld [vmem:[%s3448_s1] sm:$0xff]   ;;  %vm943_vm6 = vcmask 64512   ;;  %vm976_vm7 = vcmask 97280  }
   0xd   : > { %v2406_v2 = vshrl.u32 %v318_v0, 7  ;;  %s2420_s28 = scalar_lea.vmem %s3447_s0, %s2414_s25  ;;  %2320 = vmatprep.subr.msk.bf16.mxu0 %vm1222_vm5, %v2339_v50  ;;  %v1224_v56 = vsel %vm1222_vm5, %v2339_v50, 0  ;;  %vm1009_vm8 = vcmask 130048   ;;  %vm1042_vm9 = vcmask 162816   ;;  %s3156_s27 = scalar_lea.vmem %s3452_s5, %s2414_s25 }
   0xe   : > { %v288_v4 = vld [vmem:[%s2420_s28 + $0x10] sm:$0xff]  ;;  %v289_v5 = vld [vmem:[%s2420_s28 + $0x18] sm:$0xff]  ;;  %v286_v6 = vld [vmem:[%s2420_s28] sm:$0xff]  ;;  %2249 = vmatpush3.bf16.msra.mxu0 %v1224_v56  ;;  %vm1075_vm10 = vcmask 195584   ;;  %vm1108_vm11 = vcmask 228352   ;;  %vm1141_vm12 = vcmask 261120  }
   0xf   : > { %v2411_v3 = vadd.s32 8, %v2406_v2  ;;  %vm360_vm0 = vcmp.lt.s32.totalorder %v2406_v2, 1  ;;  %vm489_vm2 = vcmp.lt.s32.totalorder %v2406_v2, 7  ;;  %vm321_vm3 = vcmp.ge.s32.totalorder %v2406_v2, 1  ;;  %v287_v8 = vld [vmem:[%s2420_s28 + $0x8] sm:$0xff]  ;;  %v290_v18 = vld [vmem:[%s2420_s28 + $0x20] sm:$0xff]  ;;  %2250 = vmatprep.subr.bf16.mxu0 %v2340_v55 }
  0x10   : > { %v2429_v7 = vpack.c.bf16 %v289_v5, %v288_v4  ;;  %v459_v9 = vrot.slane %v286_v6, 1  ;;  %v330_v10 = vrot.slane %v286_v6, 7  ;;  %v331_v11 = vrot.slane %v288_v4, 7  ;;  %v291_v19 = vld [vmem:[%s2420_s28 + $0x28] sm:$0xff]  ;;  %v292_v46 = vld [vmem:[%s2420_s28 + $0x30] sm:$0xff]  ;;  %v293_v47 = vld [vmem:[%s2420_s28 + $0x38] sm:$0xff] }
  0x11   : > { %vm324_vm1 = vcmp.lt.s32.totalorder %v2411_v3, 15  ;;  %v345_v12 = vrot.slane %v287_v8, 7  ;;  %v444_v13 = vpack.c.bf16 %v287_v8, %v286_v6  ;;  %v474_v14 = vrot.slane %v287_v8, 1  ;;  %v294_v62 = vld [vmem:[%s2420_s28 + $0x40] sm:$0xff]  ;;  %v295_v63 = vld [vmem:[%s2420_s28 + $0x48] sm:$0xff] }
  0x12   : > { %v346_v15 = vrot.slane %v289_v5, 7  ;;  %734 = vrot.lane.b32.xlu1 %v2429_v7, %s2353_s29  ;;  %v460_v16 = vrot.slane %v288_v4, 1  ;;  %v475_v17 = vrot.slane %v289_v5, 1  ;;  %v332_v30 = vrot.slane %v290_v18, 7  ;;  %2251 = vmatpush3.bf16.msra.mxu0 %v2340_v55  ;;  %v301_v55 = vld [vmem:[%s2420_s28 + $0x78] sm:$0xff] }
  0x13   : > { %605 = vrot.lane.b32.xlu0 %v444_v13, %s2352_s24  ;;  %v490_v20 = vsel %vm489_vm2, %v459_v9, %v474_v14  ;;  %v505_v21 = vsel %vm489_vm2, %v474_v14, %v459_v9  ;;  %v361_v26 = vsel %vm360_vm0, %v330_v10, %v345_v12  ;;  %v376_v27 = vsel %vm360_vm0, %v345_v12, %v330_v10 }
  0x14   : > { %v362_v22 = vsel %vm360_vm0, %v331_v11, %v346_v15  ;;  %v377_v23 = vsel %vm360_vm0, %v346_v15, %v331_v11  ;;  %v527_v24 = vsel %vm324_vm1, %v505_v21, 0.0  ;;  %2288 = vmatprep.mubr.msk.bf16.mxu1 %vm894_vm4, %v444_v13  ;;  %v397_v29 = vsel %vm321_vm3, %v376_v27, 0.0  ;;  %2252 = vmatprep.subr.bf16.mxu0 %v2341_v61  ;;  %v297_v21 = vld [vmem:[%s2420_s28 + $0x58] sm:$0xff] }
  0x15   : > { %v399_v25 = vsel %vm321_vm3, %v377_v23, 0.0  ;;  %v557_v28 = vpack.c.bf16 %v527_v24, %v490_v20  ;;  %v347_v31 = vrot.slane %v291_v19, 7  ;;  %v506_v32 = vsel %vm489_vm2, %v475_v17, %v460_v16  ;;  %v296_v20 = vld [vmem:[%s2420_s28 + $0x50] sm:$0xff] }
  0x16   : > { %v2460_v33 = vpack.c.bf16 %v362_v22, %v399_v25  ;;  %v2462_v34 = vpack.c.bf16 %v361_v26, %v397_v29  ;;  %v491_v35 = vsel %vm489_vm2, %v460_v16, %v475_v17  ;;  %v529_v36 = vsel %vm324_vm1, %v506_v32, 0.0  ;;  %2253 = vmatpush3.bf16.msra.mxu0 %v2341_v61  ;;  %v298_v32 = vld [vmem:[%s2420_s28 + $0x60] sm:$0xff] }
  0x17   : > { %653 = vrot.lane.b32.xlu1 %v557_v28, %s2351_s23  ;;  %732 = vrot.lane.b32.xlu0 %v444_v13, %s2353_s29  ;;  %v378_v37 = vsel %vm360_vm0, %v347_v31, %v332_v30  ;;  %v558_v38 = vpack.c.bf16 %v529_v36, %v491_v35  ;;  %v363_v39 = vsel %vm360_vm0, %v332_v30, %v347_v31  ;;  %v461_v42 = vrot.slane %v290_v18, 1  ;;  %v299_v35 = vld [vmem:[%s2420_s28 + $0x68] sm:$0xff] }
  0x18   : > { %v401_v40 = vsel %vm321_vm3, %v378_v37, 0.0  ;;  %v476_v43 = vrot.slane %v291_v19, 1  ;;  %v2486_v44 = vpack.c.bf16 %v291_v19, %v290_v18  ;;  %v333_v51 = vrot.slane %v292_v46, 7 }
  0x19   : > { %v2480_v41 = vpack.c.bf16 %v363_v39, %v401_v40  ;;  %v348_v52 = vrot.slane %v293_v47, 7  ;;  %v462_v59 = vrot.slane %v292_v46, 1  ;;  %v477_v60 = vrot.slane %v293_v47, 1 }
  0x1a   : > { %v507_v45 = vsel %vm489_vm2, %v476_v43, %v461_v42  ;;  %v492_v48 = vsel %vm489_vm2, %v461_v42, %v476_v43  ;;  %v334_v5 = vrot.slane %v294_v62, 7  ;;  %v349_v6 = vrot.slane %v295_v63, 7 }
  0x1b   : > { %701 = vrot.lane.b32.xlu1 %v2460_v33, %s2354_s30  ;;  %699 = vrot.lane.b32.xlu0 %v2462_v34, %s2354_s30  ;;  %v531_v49 = vsel %vm324_vm1, %v507_v45, 0.0  ;;  %v379_v54 = vsel %vm360_vm0, %v348_v52, %v333_v51  ;;  %v364_v57 = vsel %vm360_vm0, %v333_v51, %v348_v52  ;;  %v508_v4 = vsel %vm489_vm2, %v477_v60, %v462_v59 }
  0x1c   : > { %v559_v53 = vpack.c.bf16 %v531_v49, %v492_v48  ;;  %v403_v58 = vsel %vm321_vm3, %v379_v54, 0.0  ;;  %v2535_v8 = vpack.c.bf16 %v293_v47, %v292_v46  ;;  %v493_v9 = vsel %vm489_vm2, %v462_v59, %v477_v60  ;;  %v300_v54 = vld [vmem:[%s2420_s28 + $0x70] sm:$0xff] }
  0x1d   : > { %v2527_v0 = vpack.c.bf16 %v364_v57, %v403_v58  ;;  %v533_v10 = vsel %vm324_vm1, %v508_v4, 0.0  ;;  %v380_v11 = vsel %vm360_vm0, %v349_v6, %v334_v5  ;;  %v365_v13 = vsel %vm360_vm0, %v334_v5, %v349_v6  ;;  %v302_v6 = vld [vmem:[%s2420_s28 + $0x80] sm:$0xff] }
  0x1e   : > { %v560_v12 = vpack.c.bf16 %v533_v10, %v493_v9  ;;  %v405_v14 = vsel %vm321_vm3, %v380_v11, 0.0  ;;  %v463_v16 = vrot.slane %v294_v62, 1  ;;  %v478_v17 = vrot.slane %v295_v63, 1  ;;  %v303_v9 = vld [vmem:[%s2420_s28 + $0x88] sm:$0xff] }
  0x1f   : > { %767 = vrot.lane.b32.xlu1 %v558_v38, %s2355_s7  ;;  %765 = vrot.lane.b32.xlu0 %v557_v28, %s2355_s7  ;;  %v2553_v15 = vpack.c.bf16 %v365_v13, %v405_v14  ;;  %v2559_v18 = vpack.c.bf16 %v295_v63, %v294_v62  ;;  %v335_v24 = vrot.slane %v296_v20, 7  ;;  %v350_v25 = vrot.slane %v297_v21, 7 }
  0x20   : > { %v509_v19 = vsel %vm489_vm2, %v478_v17, %v463_v16  ;;  %v494_v22 = vsel %vm489_vm2, %v463_v16, %v478_v17  ;;  %v464_v30 = vrot.slane %v296_v20, 1  ;;  %v479_v31 = vrot.slane %v297_v21, 1 }
  0x21   : > { %v535_v23 = vsel %vm324_vm1, %v509_v19, 0.0  ;;  %v381_v27 = vsel %vm360_vm0, %v350_v25, %v335_v24  ;;  %v366_v28 = vsel %vm360_vm0, %v335_v24, %v350_v25  ;;  %v351_v39 = vrot.slane %v299_v35, 7 }
  0x22   : > { %v561_v26 = vpack.c.bf16 %v535_v23, %v494_v22  ;;  %v407_v29 = vsel %vm321_vm3, %v381_v27, 0.0  ;;  %v510_v37 = vsel %vm489_vm2, %v479_v31, %v464_v30  ;;  %v2597_v40 = vpack.c.bf16 %v297_v21, %v296_v20 }
  0x23   : > { %800 = vrot.lane.b32.xlu1 %v2480_v41, %s2356_s8  ;;  %798 = vrot.lane.b32.xlu0 %v2460_v33, %s2356_s8  ;;  %v2589_v36 = vpack.c.bf16 %v366_v28, %v407_v29  ;;  %v495_v42 = vsel %vm489_vm2, %v464_v30, %v479_v31  ;;  %v537_v43 = vsel %vm324_vm1, %v510_v37, 0.0  ;;  %v465_v50 = vrot.slane %v298_v32, 1 }
  0x24   : > { %v562_v46 = vpack.c.bf16 %v537_v43, %v495_v42  ;;  %v480_v51 = vrot.slane %v299_v35, 1  ;;  %v2621_v52 = vpack.c.bf16 %v299_v35, %v298_v32  ;;  %v337_v58 = vrot.slane %v300_v54, 7  ;;  %v305_v35 = vld [vmem:[%s2420_s28 + $0x98] sm:$0xff] }
  0x25   : > { %v352_v59 = vrot.slane %v301_v55, 7  ;;  %v466_v4 = vrot.slane %v300_v54, 1  ;;  %v481_v5 = vrot.slane %v301_v55, 1  ;;  %v353_v13 = vrot.slane %v303_v9, 7 }
  0x26   : > { %v496_v56 = vsel %vm489_vm2, %v465_v50, %v480_v51  ;;  %v2659_v14 = vpack.c.bf16 %v301_v55, %v300_v54  ;;  %v482_v27 = vrot.slane %v303_v9, 1  ;;  %v2683_v28 = vpack.c.bf16 %v303_v9, %v302_v6 }
  0x27   : > { %832 = vrot.lane.b32.xlu1 %v2486_v44, %s2357_s9  ;;  %830 = vrot.lane.b32.xlu0 %v2429_v7, %s2357_s9  ;;  %v383_v61 = vsel %vm360_vm0, %v352_v59, %v337_v58  ;;  %v368_v62 = vsel %vm360_vm0, %v337_v58, %v352_v59  ;;  %v512_v11 = vsel %vm489_vm2, %v481_v5, %v466_v4  ;;  %v2712_v58 = vld [vmem:[%s2420_s28 + $0xa0] sm:$0xff]  ;;  %v2715_v59 = vld [vmem:[%s2420_s28 + $0xa8] sm:$0xff]  ;;  %vm1189_vm13 = vcmask 293888  }
  0x28   : > { %v411_v63 = vsel %vm321_vm3, %v383_v61, 0.0  ;;  %v497_v16 = vsel %vm489_vm2, %v466_v4, %v481_v5  ;;  %v541_v17 = vsel %vm324_vm1, %v512_v11, 0.0  ;;  %v340_v5 = vrot.slane %v2712_v58, 7 }
  0x29   : > { %v2651_v10 = vpack.c.bf16 %v368_v62, %v411_v63  ;;  %v564_v20 = vpack.c.bf16 %v541_v17, %v497_v16  ;;  %vm1589_vm14 = vcmask 57344  }
  0x2b   : > { %607 = vrot.lane.b32.xlu1 %v2429_v7, %s2352_s24  ;;  %862 = vrot.lane.b32.xlu0 %v558_v38, %s2358_s12 }
  0x2f   : > { %609 = vrot.lane.b32.xlu1 %v2486_v44, %s2352_s24  ;;  %864 = vrot.lane.b32.xlu0 %v559_v53, %s2358_s12 }
  0x33   : > { %657 = vrot.lane.b32.xlu1 %v559_v53, %s2351_s23  ;;  %655 = vrot.lane.b32.xlu0 %v558_v38, %s2351_s23  ;;  %v336_v38 = vrot.slane %v298_v32, 7  ;;  %v304_v32 = vld [vmem:[%s2420_s28 + $0x90] sm:$0xff] }
  0x34   : > { %v339_v43 = vrot.slane %v304_v32, 7 }
  0x35   : > { %v382_v45 = vsel %vm360_vm0, %v351_v39, %v336_v38  ;;  %v367_v47 = vsel %vm360_vm0, %v336_v38, %v351_v39 }
  0x36   : > { %v409_v48 = vsel %vm321_vm3, %v382_v45, 0.0  ;;  %v354_v45 = vrot.slane %v305_v35, 7 }
  0x37   : > { %705 = vrot.lane.b32.xlu1 %v2527_v0, %s2354_s30  ;;  %703 = vrot.lane.b32.xlu0 %v2480_v41, %s2354_s30  ;;  %v2615_v49 = vpack.c.bf16 %v367_v47, %v409_v48 }
  0x3b   : > { %738 = vrot.lane.b32.xlu1 %v2535_v8, %s2353_s29  ;;  %736 = vrot.lane.b32.xlu0 %v2486_v44, %s2353_s29 }
  0x3f   : > { %771 = vrot.lane.b32.xlu1 %v560_v12, %s2355_s7  ;;  %769 = vrot.lane.b32.xlu0 %v559_v53, %s2355_s7  ;;  %v511_v53 = vsel %vm489_vm2, %v480_v51, %v465_v50  ;;  %v385_v50 = vsel %vm360_vm0, %v354_v45, %v339_v43  ;;  %v370_v51 = vsel %vm360_vm0, %v339_v43, %v354_v45 }
  0x40   : > { %v539_v57 = vsel %vm324_vm1, %v511_v53, 0.0  ;;  %v415_v53 = vsel %vm321_vm3, %v385_v50, 0.0  ;;  %v469_v50 = vrot.slane %v2712_v58, 1 }
  0x41   : > { %v563_v60 = vpack.c.bf16 %v539_v57, %v496_v56  ;;  %v468_v56 = vrot.slane %v304_v32, 1  ;;  %v483_v57 = vrot.slane %v305_v35, 1  ;;  %v2720_v61 = vpack.c.bf16 %v370_v51, %v415_v53 }
  0x42   : > { %v484_v51 = vrot.slane %v2715_v59, 1 }
  0x43   : > { %804 = vrot.lane.b32.xlu1 %v2553_v15, %s2356_s8  ;;  %802 = vrot.lane.b32.xlu0 %v2527_v0, %s2356_s8  ;;  %v514_v4 = vsel %vm489_vm2, %v483_v57, %v468_v56 }
  0x44   : > { %v545_v16 = vsel %vm324_vm1, %v514_v4, 0.0 }
  0x47   : > { %836 = vrot.lane.b32.xlu1 %v2559_v18, %s2357_s9  ;;  %834 = vrot.lane.b32.xlu0 %v2535_v8, %s2357_s9 }
  0x4b   : > { %611 = vrot.lane.b32.xlu1 %v2535_v8, %s2352_s24  ;;  %866 = vrot.lane.b32.xlu0 %v560_v12, %s2358_s12 }
  0x4f   : > { %613 = vrot.lane.b32.xlu1 %v2559_v18, %s2352_s24  ;;  %868 = vrot.lane.b32.xlu0 %v561_v26, %s2358_s12 }
  0x53   : > { %661 = vrot.lane.b32.xlu1 %v561_v26, %s2351_s23  ;;  %659 = vrot.lane.b32.xlu0 %v560_v12, %s2351_s23  ;;  %v338_v12 = vrot.slane %v302_v6, 7 }
  0x55   : > { %v384_v19 = vsel %vm360_vm0, %v353_v13, %v338_v12  ;;  %v369_v21 = vsel %vm360_vm0, %v338_v12, %v353_v13  ;;  %v2732_v12 = vpack.c.bf16 %v305_v35, %v304_v32  ;;  %v499_v13 = vsel %vm489_vm2, %v468_v56, %v483_v57  ;;  %v308_v57 = vld [vmem:[%s2420_s28 + $0xb0] sm:$0xff] }
  0x56   : > { %v413_v22 = vsel %vm321_vm3, %v384_v19, 0.0  ;;  %v515_v56 = vsel %vm489_vm2, %v484_v51, %v469_v50  ;;  %v341_v4 = vrot.slane %v308_v57, 7 }
  0x57   : > { %709 = vrot.lane.b32.xlu1 %v2589_v36, %s2354_s30  ;;  %707 = vrot.lane.b32.xlu0 %v2553_v15, %s2354_s30  ;;  %v2677_v25 = vpack.c.bf16 %v369_v21, %v413_v22 }
  0x5b   : > { %742 = vrot.lane.b32.xlu1 %v2597_v40, %s2353_s29  ;;  %740 = vrot.lane.b32.xlu0 %v2559_v18, %s2353_s29 }
  0x5f   : > { %775 = vrot.lane.b32.xlu1 %v562_v46, %s2355_s7  ;;  %773 = vrot.lane.b32.xlu0 %v561_v26, %s2355_s7  ;;  %v467_v26 = vrot.slane %v302_v6, 1  ;;  %v355_v6 = vrot.slane %v2715_v59, 7 }
  0x61   : > { %v513_v31 = vsel %vm489_vm2, %v482_v27, %v467_v26  ;;  %v498_v37 = vsel %vm489_vm2, %v467_v26, %v482_v27  ;;  %v386_v21 = vsel %vm360_vm0, %v355_v6, %v340_v5 }
  0x62   : > { %v543_v38 = vsel %vm324_vm1, %v513_v31, 0.0  ;;  %v417_v31 = vsel %vm321_vm3, %v386_v21, 0.0  ;;  %v470_v21 = vrot.slane %v308_v57, 1 }
  0x63   : > { %808 = vrot.lane.b32.xlu1 %v2615_v49, %s2356_s8  ;;  %806 = vrot.lane.b32.xlu0 %v2589_v36, %s2356_s8 }
  0x67   : > { %840 = vrot.lane.b32.xlu1 %v2621_v52, %s2357_s9  ;;  %838 = vrot.lane.b32.xlu0 %v2597_v40, %s2357_s9 }
  0x6b   : > { %615 = vrot.lane.b32.xlu1 %v2597_v40, %s2352_s24  ;;  %870 = vrot.lane.b32.xlu0 %v562_v46, %s2358_s12 }
  0x6f   : > { %617 = vrot.lane.b32.xlu1 %v2621_v52, %s2352_s24  ;;  %872 = vrot.lane.b32.xlu0 %v563_v60, %s2358_s12 }
  0x73   : > { %665 = vrot.lane.b32.xlu1 %v563_v60, %s2351_s23  ;;  %663 = vrot.lane.b32.xlu0 %v562_v46, %s2351_s23  ;;  %v565_v46 = vpack.c.bf16 %v543_v38, %v498_v37 }
  0x77   : > { %713 = vrot.lane.b32.xlu1 %v2651_v10, %s2354_s30  ;;  %711 = vrot.lane.b32.xlu0 %v2615_v49, %s2354_s30 }
  0x7b   : > { %746 = vrot.lane.b32.xlu1 %v2659_v14, %s2353_s29  ;;  %744 = vrot.lane.b32.xlu0 %v2621_v52, %s2353_s29 }
  0x7e   : > { %v652_v23 = vpop.permute.xlu1 %651  ;;  %v604_v24 = vpop.permute.xlu0 %603 }
  0x7f   : > { %779 = vrot.lane.b32.xlu1 %v564_v20, %s2355_s7  ;;  %777 = vrot.lane.b32.xlu0 %v563_v60, %s2355_s7  ;;  %v897_v60 = vsel %vm894_vm4, 0.0|0.0, %v604_v24 }
  0x80   : > { %v945_v9 = vsel %vm943_vm6, %v897_v60, %v652_v23  ;;  %v309_v60 = vld [vmem:[%s2420_s28 + $0xb8] sm:$0xff] }
  0x83   : > { %812 = vrot.lane.b32.xlu1 %v2677_v25, %s2356_s8  ;;  %810 = vrot.lane.b32.xlu0 %v2651_v10, %s2356_s8 }
  0x84   : > { %v2685_v29 = vpop.permute.xlu1 %734 }
  0x85   : > { %v606_v30 = vpop.permute.xlu0 %605 }
  0x86   : > { %v900_v17 = vsel %vm894_vm4, %v2462_v34, %v606_v30  ;;  %v566_v34 = vpack.c.bf16 %v545_v16, %v499_v13  ;;  %v371_v30 = vsel %vm360_vm0, %v340_v5, %v355_v6  ;;  %v356_v5 = vrot.slane %v309_v60, 7 }
  0x87   : > { %844 = vrot.lane.b32.xlu1 %v2683_v28, %s2357_s9  ;;  %842 = vrot.lane.b32.xlu0 %v2659_v14, %s2357_s9  ;;  %v2764_v43 = vpack.c.bf16 %v371_v30, %v417_v31 }
  0x88   : > { %v387_v13 = vsel %vm360_vm0, %v356_v5, %v341_v4  ;;  %v372_v16 = vsel %vm360_vm0, %v341_v4, %v356_v5 }
  0x89   : > { %v654_v39 = vpop.permute.xlu1 %653  ;;  %v733_v42 = vpop.permute.xlu0 %732 }
  0x8a   : > { %v947_v22 = vsel %vm943_vm6, %v900_v17, %v654_v39  ;;  %v419_v17 = vsel %vm321_vm3, %v387_v13, 0.0 }
  0x8b   : > { %619 = vrot.lane.b32.xlu1 %v2659_v14, %s2352_s24  ;;  %874 = vrot.lane.b32.xlu0 %v564_v20, %s2358_s12 }
  0x8d   : > { %v702_v47 = vpop.permute.xlu1 %701  ;;  %v700_v48 = vpop.permute.xlu0 %699 }
  0x8e   : > { %v978_v11 = vsel %vm976_vm7, %v945_v9, %v700_v48  ;;  %v980_v24 = vsel %vm976_vm7, %v947_v22, %v702_v47  ;;  %v485_v22 = vrot.slane %v309_v60, 1 }
  0x8f   : > { %621 = vrot.lane.b32.xlu1 %v2683_v28, %s2352_s24  ;;  %876 = vrot.lane.b32.xlu0 %v565_v46, %s2358_s12  ;;  %v1011_v23 = vsel %vm1009_vm8, %v978_v11, %v733_v42  ;;  %v1013_v38 = vsel %vm1009_vm8, %v980_v24, %v2685_v29  ;;  %v2811_v24 = vld [vmem:[%s2420_s28 + $0xc8] sm:$0xff] }
  0x91   : > { %v768_v54 = vpop.permute.xlu1 %767  ;;  %v766_v55 = vpop.permute.xlu0 %765 }
  0x92   : > { %v1044_v26 = vsel %vm1042_vm9, %v1011_v23, %v766_v55  ;;  %v1046_v42 = vsel %vm1042_vm9, %v1013_v38, %v768_v54  ;;  %v2808_v23 = vld [vmem:[%s2420_s28 + $0xc0] sm:$0xff] }
  0x93   : > { %669 = vrot.lane.b32.xlu1 %v565_v46, %s2351_s23  ;;  %667 = vrot.lane.b32.xlu0 %v564_v20, %s2351_s23  ;;  %v342_v38 = vrot.slane %v2808_v23, 7 }
  0x95   : > { %v801_v62 = vpop.permute.xlu1 %800  ;;  %v799_v63 = vpop.permute.xlu0 %798 }
  0x96   : > { %v1077_v27 = vsel %vm1075_vm10, %v1044_v26, %v799_v63  ;;  %v1079_v45 = vsel %vm1075_vm10, %v1046_v42, %v801_v62  ;;  %v500_v62 = vsel %vm489_vm2, %v469_v50, %v484_v51  ;;  %v1592_v26 = vld [vmem:[%s3449_s2] sm:$0x3]  ;;  %v2833_v42 = vpack.c.bf16 %v309_v60, %v308_v57 }
  0x97   : > { %717 = vrot.lane.b32.xlu1 %v2720_v61, %s2354_s30  ;;  %715 = vrot.lane.b32.xlu0 %v2677_v25, %s2354_s30  ;;  %v1642_v30 = vsel %vm1222_vm5, %v1592_v26, 0 }
  0x98   : > { %2321 = vmatprep.subr.msk.bf16.mxu1 %vm1222_vm5, %v1592_v26  ;;  %v313_v26 = vld [vmem:[%s2420_s28 + $0xd8] sm:$0xff] }
  0x99   : > { %v833_v19 = vpop.permute.xlu1 %832  ;;  %v831_v20 = vpop.permute.xlu0 %830  ;;  %2287 = vmatpush3.bf16.msra.mxu1 %v1642_v30 }
  0x9a   : > { %v1110_v32 = vsel %vm1108_vm11, %v1077_v27, %v831_v20  ;;  %v1112_v47 = vsel %vm1108_vm11, %v1079_v45, %v833_v19  ;;  %v2818_v27 = vpack.c.bf16 %v372_v16, %v419_v17  ;;  %v471_v17 = vrot.slane %v2808_v23, 1 }
  0x9b   : > { %750 = vrot.lane.b32.xlu1 %v2732_v12, %s2353_s29  ;;  %748 = vrot.lane.b32.xlu0 %v2683_v28, %s2353_s29 }
  0x9c   : > { %2289 = vmatmul.mubr.msk.bf16.vlgmr.msra.gmra.mxu1 %vm894_vm4, %v2429_v7 }
  0x9d   : > { %v2756_v35 = vpop.permute.xlu1 %607  ;;  %v863_v37 = vpop.permute.xlu0 %862  ;;  %2292 = vmatprep.mubr.msk.bf16.mxu1 %vm894_vm4, %v2486_v44 }
  0x9e   : > { %v1143_v39 = vsel %vm1141_vm12, %v1110_v32, %v863_v37  ;;  %v516_v37 = vsel %vm489_vm2, %v485_v22, %v470_v21 }
  0x9f   : > { %783 = vrot.lane.b32.xlu1 %v566_v34, %s2355_s7  ;;  %781 = vrot.lane.b32.xlu0 %v565_v46, %s2355_s7  ;;  %v2780_v46 = vpack.c.bf16 %v2715_v59, %v2712_v58  ;;  %v547_v58 = vsel %vm324_vm1, %v515_v56, 0.0 }
  0xa0   : > { %2254 = vmatprep.mubr.msk.bf16.mxu0 %vm1189_vm13, %v1143_v39  ;;  %v567_v6 = vpack.c.bf16 %v547_v58, %v500_v62  ;;  %v357_v39 = vrot.slane %v2811_v24, 7 }
  0xa1   : > { %v2769_v48 = vpop.permute.xlu1 %609  ;;  %v865_v29 = vpop.permute.xlu0 %864 }
  0xa2   : > { %v1145_v53 = vsel %vm1141_vm12, %v1112_v47, %v865_v29  ;;  %v501_v47 = vsel %vm489_vm2, %v470_v21, %v485_v22  ;;  %v549_v29 = vsel %vm324_vm1, %v516_v37, 0.0  ;;  %v388_v51 = vsel %vm360_vm0, %v357_v39, %v342_v38 }
  0xa3   : > { %816 = vrot.lane.b32.xlu1 %v2764_v43, %s2356_s8  ;;  %814 = vrot.lane.b32.xlu0 %v2720_v61, %s2356_s8  ;;  %v568_v7 = vpack.c.bf16 %v549_v29, %v501_v47  ;;  %v373_v44 = vsel %vm360_vm0, %v342_v38, %v357_v39  ;;  %v421_v62 = vsel %vm321_vm3, %v388_v51, 0.0  ;;  %v358_v37 = vrot.slane %v313_v26, 7  ;;  %v2930_v51 = vld [vmem:[%s2420_s28 + $0xe8] sm:$0xff] }
  0xa4   : > { %2255 = vmatmul.mubr.msk.bf16.vlgmr.msra.gmra.mxu0 %vm1189_vm13, %v1145_v53  ;;  %2293 = vmatmul.mubr.msk.bf16.gmra.mxu1 %vm894_vm4, %v2535_v8  ;;  %v2891_v8 = vpack.c.bf16 %v2811_v24, %v2808_v23 }
  0xa5   : > { %v658_v54 = vpop.permute.xlu1 %657  ;;  %v656_v55 = vpop.permute.xlu0 %655  ;;  %2296 = vmatprep.mubr.msk.bf16.mxu1 %vm894_vm4, %v2559_v18  ;;  %v312_v18 = vld [vmem:[%s2420_s28 + $0xd0] sm:$0xff] }
  0xa7   : > { %848 = vrot.lane.b32.xlu1 %v2780_v46, %s2357_s9  ;;  %846 = vrot.lane.b32.xlu0 %v2732_v12, %s2357_s9 }
  0xa9   : > { %v706_v59 = vpop.permute.xlu1 %705  ;;  %v704_v63 = vpop.permute.xlu0 %703 }
  0xab   : > { %623 = vrot.lane.b32.xlu1 %v2732_v12, %s2352_s24  ;;  %878 = vrot.lane.b32.xlu0 %v566_v34, %s2358_s12 }
  0xac   : > { %2297 = vmatmul.mubr.msk.bf16.gmra.mxu1 %vm894_vm4, %v2597_v40 }
  0xad   : > { %v739_v9 = vpop.permute.xlu1 %738  ;;  %v737_v11 = vpop.permute.xlu0 %736  ;;  %2300 = vmatprep.mubr.msk.bf16.mxu1 %vm894_vm4, %v2621_v52 }
  0xaf   : > { %625 = vrot.lane.b32.xlu1 %v2780_v46, %s2352_s24  ;;  %880 = vrot.lane.b32.xlu0 %v567_v6, %s2358_s12 }
  0xb1   : > { %v772_v19 = vpop.permute.xlu1 %771  ;;  %v770_v20 = vpop.permute.xlu0 %769 }
  0xb3   : > { %673 = vrot.lane.b32.xlu1 %v567_v6, %s2351_s23  ;;  %671 = vrot.lane.b32.xlu0 %v566_v34, %s2351_s23  ;;  %v903_v34 = vsel %vm894_vm4, %v2460_v33, %v2756_v35 }
  0xb4   : > { %v949_v45 = vsel %vm943_vm6, %v903_v34, %v656_v55  ;;  %v906_v55 = vsel %vm894_vm4, %v2480_v41, %v2769_v48  ;;  %2301 = vmatmul.mubr.msk.bf16.gmra.mxu1 %vm894_vm4, %v2659_v14 }
  0xb5   : > { %v805_v31 = vpop.permute.xlu1 %804  ;;  %v803_v32 = vpop.permute.xlu0 %802  ;;  %v982_v33 = vsel %vm976_vm7, %v949_v45, %v704_v63  ;;  %v951_v57 = vsel %vm943_vm6, %v906_v55, %v658_v54  ;;  %2304 = vmatprep.mubr.msk.bf16.mxu1 %vm894_vm4, %v2683_v28 }
  0xb6   : > { %v1015_v53 = vsel %vm1009_vm8, %v982_v33, %v737_v11  ;;  %v984_v41 = vsel %vm976_vm7, %v951_v57, %v706_v59  ;;  %v2871_v11 = vpack.c.bf16 %v373_v44, %v421_v62  ;;  %v472_v33 = vrot.slane %v312_v18, 1 }
  0xb7   : > { %721 = vrot.lane.b32.xlu1 %v2818_v27, %s2354_s30  ;;  %719 = vrot.lane.b32.xlu0 %v2764_v43, %s2354_s30  ;;  %v1048_v56 = vsel %vm1042_vm9, %v1015_v53, %v770_v20  ;;  %v1017_v4 = vsel %vm1009_vm8, %v984_v41, %v739_v9 }
  0xb8   : > { %v1081_v60 = vsel %vm1075_vm10, %v1048_v56, %v803_v32  ;;  %v1050_v54 = vsel %vm1042_vm9, %v1017_v4, %v772_v19  ;;  %v343_v32 = vrot.slane %v312_v18, 7 }
  0xb9   : > { %v837_v35 = vpop.permute.xlu1 %836  ;;  %v835_v50 = vpop.permute.xlu0 %834  ;;  %v1083_v13 = vsel %vm1075_vm10, %v1050_v54, %v805_v31 }
  0xba   : > { %v1114_v48 = vsel %vm1108_vm11, %v1081_v60, %v835_v50  ;;  %v1116_v59 = vsel %vm1108_vm11, %v1083_v13, %v837_v35  ;;  %v389_v40 = vsel %vm360_vm0, %v358_v37, %v343_v32  ;;  %v374_v52 = vsel %vm360_vm0, %v343_v32, %v358_v37  ;;  %v2927_v50 = vld [vmem:[%s2420_s28 + $0xe0] sm:$0xff] }
  0xbb   : > { %754 = vrot.lane.b32.xlu1 %v2833_v42, %s2353_s29  ;;  %752 = vrot.lane.b32.xlu0 %v2780_v46, %s2353_s29  ;;  %v423_v45 = vsel %vm321_vm3, %v389_v40, 0.0  ;;  %v487_v35 = vrot.slane %v313_v26, 1  ;;  %v344_v57 = vrot.slane %v2927_v50, 7  ;;  %v359_v60 = vrot.slane %v2930_v51, 7 }
  0xbc   : > { %v2934_v53 = vpack.c.bf16 %v374_v52, %v423_v45  ;;  %2305 = vmatmul.mubr.msk.bf16.gmra.mxu1 %vm894_vm4, %v2732_v12 }
  0xbd   : > { %v2864_v58 = vpop.permute.xlu1 %611  ;;  %v867_v63 = vpop.permute.xlu0 %866  ;;  %v518_v14 = vsel %vm489_vm2, %v487_v35, %v472_v33  ;;  %v503_v62 = vsel %vm489_vm2, %v472_v33, %v487_v35  ;;  %2308 = vmatprep.mubr.msk.bf16.mxu1 %vm894_vm4, %v2780_v46  ;;  %v375_v46 = vsel %vm360_vm0, %v344_v57, %v359_v60 }
  0xbe   : > { %v1147_v5 = vsel %vm1141_vm12, %v1114_v48, %v867_v63  ;;  %v909_v28 = vsel %vm894_vm4, %v2527_v0, %v2864_v58  ;;  %v553_v41 = vsel %vm324_vm1, %v518_v14, 0.0  ;;  %v390_v63 = vsel %vm360_vm0, %v359_v60, %v344_v57 }
  0xbf   : > { %787 = vrot.lane.b32.xlu1 %v568_v7, %s2355_s7  ;;  %785 = vrot.lane.b32.xlu0 %v567_v6, %s2355_s7  ;;  %v486_v6 = vrot.slane %v2811_v24, 1  ;;  %v570_v12 = vpack.c.bf16 %v553_v41, %v503_v62 }
  0xc0   : > { %2258 = vmatprep.mubr.msk.bf16.mxu0 %vm1189_vm13, %v1147_v5 }
  0xc1   : > { %v2878_v9 = vpop.permute.xlu1 %613  ;;  %v869_v16 = vpop.permute.xlu0 %868  ;;  %v517_v22 = vsel %vm489_vm2, %v486_v6, %v471_v17  ;;  %v502_v30 = vsel %vm489_vm2, %v471_v17, %v486_v6 }
  0xc2   : > { %v1149_v19 = vsel %vm1141_vm12, %v1116_v59, %v869_v16  ;;  %v551_v23 = vsel %vm324_vm1, %v517_v22, 0.0  ;;  %v912_v5 = vsel %vm894_vm4, %v2553_v15, %v2878_v9  ;;  %v425_v16 = vsel %vm321_vm3, %v390_v63, 0.0 }
  0xc3   : > { %820 = vrot.lane.b32.xlu1 %v2871_v11, %s2356_s8  ;;  %818 = vrot.lane.b32.xlu0 %v2818_v27, %s2356_s8  ;;  %v569_v38 = vpack.c.bf16 %v551_v23, %v502_v30  ;;  %v2980_v22 = vpack.c.bf16 %v375_v46, %v425_v16 }
  0xc4   : > { %2259 = vmatmul.mubr.msk.bf16.gmra.mxu0 %vm1189_vm13, %v1149_v19  ;;  %2309 = vmatmul.mubr.msk.bf16.gmra.mxu1 %vm894_vm4, %v2833_v42 }
  0xc5   : > { %v662_v20 = vpop.permute.xlu1 %661  ;;  %v660_v21 = vpop.permute.xlu0 %659  ;;  %2312 = vmatprep.mubr.msk.bf16.mxu1 %vm894_vm4, %v2891_v8 }
  0xc6   : > { %v953_v44 = vsel %vm943_vm6, %v909_v28, %v660_v21  ;;  %v955_v13 = vsel %vm943_vm6, %v912_v5, %v662_v20 }
  0xc7   : > { %852 = vrot.lane.b32.xlu1 %v2891_v8, %s2357_s9  ;;  %850 = vrot.lane.b32.xlu0 %v2833_v42, %s2357_s9 }
  0xc9   : > { %v710_v24 = vpop.permute.xlu1 %709  ;;  %v708_v31 = vpop.permute.xlu0 %707 }
  0xca   : > { %v986_v0 = vsel %vm976_vm7, %v953_v44, %v708_v31  ;;  %v988_v15 = vsel %vm976_vm7, %v955_v13, %v710_v24  ;;  %v473_v24 = vrot.slane %v2927_v50, 1  ;;  %v488_v31 = vrot.slane %v2930_v51, 1 }
  0xcb   : > { %627 = vrot.lane.b32.xlu1 %v2833_v42, %s2352_s24  ;;  %882 = vrot.lane.b32.xlu0 %v568_v7, %s2358_s12  ;;  %v458_v42 = vpack.c.bf16 %v2930_v51, %v2927_v50 }
  0xcc   : > { %v504_v40 = vsel %vm489_vm2, %v473_v24, %v488_v31 }
  0xcd   : > { %v743_v39 = vpop.permute.xlu1 %742  ;;  %v741_v34 = vpop.permute.xlu0 %740 }
  0xce   : > { %v1019_v4 = vsel %vm1009_vm8, %v986_v0, %v741_v34  ;;  %v1021_v19 = vsel %vm1009_vm8, %v988_v15, %v743_v39  ;;  %v519_v39 = vsel %vm489_vm2, %v488_v31, %v473_v24  ;;  %v316_v34 = vld [vmem:[%s2420_s28 + $0xf0] sm:$0xff] }
  0xcf   : > { %629 = vrot.lane.b32.xlu1 %v2891_v8, %s2352_s24  ;;  %884 = vrot.lane.b32.xlu0 %v569_v38, %s2358_s12  ;;  %v555_v52 = vsel %vm324_vm1, %v519_v39, 0.0 }
  0xd0   : > { %v571_v35 = vpack.c.bf16 %v555_v52, %v504_v40 }
  0xd1   : > { %v776_v47 = vpop.permute.xlu1 %775  ;;  %v774_v29 = vpop.permute.xlu0 %773 }
  0xd2   : > { %v1052_v54 = vsel %vm1042_vm9, %v1019_v4, %v774_v29  ;;  %v1054_v20 = vsel %vm1042_vm9, %v1021_v19, %v776_v47  ;;  %v572_v29 = vrot.slane %v316_v34, 7 }
  0xd3   : > { %677 = vrot.lane.b32.xlu1 %v569_v38, %s2351_s23  ;;  %675 = vrot.lane.b32.xlu0 %v568_v7, %s2351_s23  ;;  %v457_v7 = vpack.c.bf16 %v313_v26, %v312_v18 }
  0xd5   : > { %v809_v55 = vpop.permute.xlu1 %808  ;;  %v807_v56 = vpop.permute.xlu0 %806  ;;  %2313 = vmatmul.mubr.msk.bf16.gmra.mxu1 %vm894_vm4, %v457_v7 }
  0xd6   : > { %v1085_v59 = vsel %vm1075_vm10, %v1052_v54, %v807_v56  ;;  %v1087_v18 = vsel %vm1075_vm10, %v1054_v20, %v809_v55  ;;  %2316 = vmatprep.mubr.msk.bf16.mxu1 %vm894_vm4, %v458_v42 }
  0xd7   : > { %725 = vrot.lane.b32.xlu1 %v2934_v53, %s2354_s30  ;;  %723 = vrot.lane.b32.xlu0 %v2871_v11, %s2354_s30 }
  0xd9   : > { %v841_v48 = vpop.permute.xlu1 %840  ;;  %v839_v58 = vpop.permute.xlu0 %838 }
  0xda   : > { %v1118_v9 = vsel %vm1108_vm11, %v1085_v59, %v839_v58  ;;  %v1120_v26 = vsel %vm1108_vm11, %v1087_v18, %v841_v48 }
  0xdb   : > { %758 = vrot.lane.b32.xlu1 %v457_v7, %s2353_s29  ;;  %756 = vrot.lane.b32.xlu0 %v2891_v8, %s2353_s29  ;;  %v317_v8 = vld [vmem:[%s2420_s28 + $0xf8] sm:$0xff] }
  0xdc   : > { %v573_v33 = vrot.slane %v317_v8, 7  ;;  %v579_v56 = vpack.c.bf16 %v317_v8, %v316_v34  ;;  %v581_v44 = vrot.slane %v317_v8, 1 }
  0xdd   : > { %v616_v17 = vpop.permute.xlu1 %615  ;;  %v871_v6 = vpop.permute.xlu0 %870 }
  0xde   : > { %v1151_v21 = vsel %vm1141_vm12, %v1118_v9, %v871_v6  ;;  %v575_v55 = vsel %vm360_vm0, %v573_v33, %v572_v29  ;;  %v574_v14 = vsel %vm360_vm0, %v572_v29, %v573_v33  ;;  %2317 = vmatmul.mubr.msk.bf16.gmra.mxu1 %vm894_vm4, %v579_v56  ;;  %v915_v58 = vsel %vm894_vm4, %v2589_v36, %v616_v17 }
  0xdf   : > { %791 = vrot.lane.b32.xlu1 %v570_v12, %s2355_s7  ;;  %789 = vrot.lane.b32.xlu0 %v569_v38, %s2355_s7  ;;  %v576_v57 = vsel %vm321_vm3, %v575_v55, 0.0 }
  0xe0   : > { %2262 = vmatprep.mubr.msk.bf16.mxu0 %vm1189_vm13, %v1151_v21  ;;  %v578_v62 = vpack.c.bf16 %v574_v14, %v576_v57 }
  0xe1   : > { %v618_v30 = vpop.permute.xlu1 %617  ;;  %v873_v23 = vpop.permute.xlu0 %872 }
  0xe2   : > { %v1153_v32 = vsel %vm1141_vm12, %v1120_v26, %v873_v23  ;;  %v918_v36 = vsel %vm894_vm4, %v2615_v49, %v618_v30 }
  0xe3   : > { %824 = vrot.lane.b32.xlu1 %v2980_v22, %s2356_s8  ;;  %822 = vrot.lane.b32.xlu0 %v2934_v53, %s2356_s8 }
  0xe4   : > { %2263 = vmatmul.mubr.msk.bf16.gmra.mxu0 %vm1189_vm13, %v1153_v32 }
  0xe5   : > { %v666_v37 = vpop.permute.xlu1 %665  ;;  %v664_v38 = vpop.permute.xlu0 %663 }
  0xe6   : > { %v957_v63 = vsel %vm943_vm6, %v915_v58, %v664_v38  ;;  %v959_v16 = vsel %vm943_vm6, %v918_v36, %v666_v37 }
  0xe7   : > { %856 = vrot.lane.b32.xlu1 %v458_v42, %s2357_s9  ;;  %854 = vrot.lane.b32.xlu0 %v457_v7, %s2357_s9 }
  0xe9   : > { %v714_v45 = vpop.permute.xlu1 %713  ;;  %v712_v47 = vpop.permute.xlu0 %711 }
  0xea   : > { %v990_v54 = vsel %vm976_vm7, %v957_v63, %v712_v47  ;;  %v992_v15 = vsel %vm976_vm7, %v959_v16, %v714_v45 }
  0xeb   : > { %631 = vrot.lane.b32.xlu1 %v457_v7, %s2352_s24  ;;  %886 = vrot.lane.b32.xlu0 %v570_v12, %s2358_s12  ;;  %v580_v7 = vrot.slane %v316_v34, 1 }
  0xed   : > { %v747_v50 = vpop.permute.xlu1 %746  ;;  %v745_v51 = vpop.permute.xlu0 %744  ;;  %v583_v48 = vsel %vm489_vm2, %v581_v44, %v580_v7  ;;  %v582_v4 = vsel %vm489_vm2, %v580_v7, %v581_v44 }
  0xee   : > { %v585_v5 = vsel %vm324_vm1, %v583_v48, 0.0  ;;  %v1023_v59 = vsel %vm1009_vm8, %v990_v54, %v745_v51  ;;  %v1025_v19 = vsel %vm1009_vm8, %v992_v15, %v747_v50 }
  0xef   : > { %633 = vrot.lane.b32.xlu1 %v458_v42, %s2352_s24  ;;  %888 = vrot.lane.b32.xlu0 %v571_v35, %s2358_s12  ;;  %v586_v2 = vpack.c.bf16 %v585_v5, %v582_v4 }
  0xf1   : > { %v780_v60 = vpop.permute.xlu1 %779  ;;  %v778_v28 = vpop.permute.xlu0 %777 }
  0xf2   : > { %v1056_v46 = vsel %vm1042_vm9, %v1023_v59, %v778_v28  ;;  %v1058_v21 = vsel %vm1042_vm9, %v1025_v19, %v780_v60 }
  0xf3   : > { %681 = vrot.lane.b32.xlu1 %v571_v35, %s2351_s23  ;;  %679 = vrot.lane.b32.xlu0 %v570_v12, %s2351_s23  ;;  %s3129_s23 = scalar_lea.vmem %s3450_s3, %s2414_s25  ;;  %s2168_s25 = sshll.u32 %s3455_s22, 1 }
  0xf5   : > { %v813_v41 = vpop.permute.xlu1 %812  ;;  %v811_v0 = vpop.permute.xlu0 %810 }
  0xf6   : > { %v1089_v3 = vsel %vm1075_vm10, %v1056_v46, %v811_v0  ;;  %v1091_v20 = vsel %vm1075_vm10, %v1058_v21, %v813_v41 }
  0xf7   : > { %729 = vrot.lane.b32.xlu1 %v578_v62, %s2354_s30  ;;  %727 = vrot.lane.b32.xlu0 %v2980_v22, %s2354_s30  ;;  %s284_s30 = scalar_lea.vmem %s3453_s6, %s2168_s25 }
  0xf9   : > { %v845_v12 = vpop.permute.xlu1 %844  ;;  %v843_v13 = vpop.permute.xlu0 %842 }
  0xfa   : > { %v1122_v9 = vsel %vm1108_vm11, %v1089_v3, %v843_v13  ;;  %v1124_v18 = vsel %vm1108_vm11, %v1091_v20, %v845_v12 }
  0xfb   : > { %762 = vrot.lane.b32.xlu1 %v579_v56, %s2353_s29  ;;  %760 = vrot.lane.b32.xlu0 %v458_v42, %s2353_s29 }
  0xfd   : > { %v620_v17 = vpop.permute.xlu1 %619  ;;  %v875_v6 = vpop.permute.xlu0 %874 }
  0xfe   : > { %v1155_v49 = vsel %vm1141_vm12, %v1122_v9, %v875_v6  ;;  %v921_v52 = vsel %vm894_vm4, %v2651_v10, %v620_v17 }
  0xff   : > { %795 = vrot.lane.b32.xlu1 %v586_v2, %s2355_s7  ;;  %793 = vrot.lane.b32.xlu0 %v571_v35, %s2355_s7 }
 0x100   : > { %2266 = vmatprep.mubr.msk.bf16.mxu0 %vm1189_vm13, %v1155_v49 }
 0x101   : > { %v622_v26 = vpop.permute.xlu1 %621  ;;  %v877_v30 = vpop.permute.xlu0 %876 }
 0x102   : > { %v1157_v23 = vsel %vm1141_vm12, %v1124_v18, %v877_v30 }
 0x103   : > { %828 = vrot.lane.b32.xlu1 %v2350_v1, %s2356_s8  ;;  %826 = vrot.lane.b32.xlu0 %v578_v62, %s2356_s8 }
 0x104   : > { %2267 = vmatmul.mubr.msk.bf16.gmra.mxu0 %vm1189_vm13, %v1157_v23 }
 0x105   : > { %v670_v24 = vpop.permute.xlu1 %669  ;;  %v668_v31 = vpop.permute.xlu0 %667 }
 0x106   : > { %v961_v45 = vsel %vm943_vm6, %v921_v52, %v668_v31 }
 0x107   : > { %860 = vrot.lane.b32.xlu1 %v2350_v1, %s2357_s9  ;;  %858 = vrot.lane.b32.xlu0 %v579_v56, %s2357_s9  ;;  %s275_s9 = scalar_lea.vmem %s3451_s4, %s2168_s25 }
 0x109   : > { %v718_v32 = vpop.permute.xlu1 %717  ;;  %v716_v42 = vpop.permute.xlu0 %715 }
 0x10a   : > { %v994_v47 = vsel %vm976_vm7, %v961_v45, %v716_v42 }
 0x10b   : > { %892 = vrot.lane.b32.xlu1 %v2350_v1, %s2358_s12  ;;  %890 = vrot.lane.b32.xlu0 %v586_v2, %s2358_s12  ;;  %v924_v1 = vsel %vm894_vm4, %v2677_v25, %v622_v26 }
 0x10c   : > { %v963_v51 = vsel %vm943_vm6, %v924_v1, %v670_v24 }
 0x10d   : > { %v751_v37 = vpop.permute.xlu1 %750  ;;  %v749_v38 = vpop.permute.xlu0 %748  ;;  %v996_v56 = vsel %vm976_vm7, %v963_v51, %v718_v32 }
 0x10e   : > { %v1027_v35 = vsel %vm1009_vm8, %v994_v47, %v749_v38  ;;  %v1029_v60 = vsel %vm1009_vm8, %v996_v56, %v751_v37 }
 0x111   : > { %v784_v39 = vpop.permute.xlu1 %783  ;;  %v782_v34 = vpop.permute.xlu0 %781 }
 0x112   : > { %v1060_v50 = vsel %vm1042_vm9, %v1027_v35, %v782_v34  ;;  %v1062_v7 = vsel %vm1042_vm9, %v1029_v60, %v784_v39 }
 0x115   : > { %v817_v8 = vpop.permute.xlu1 %816  ;;  %v815_v40 = vpop.permute.xlu0 %814 }
 0x116   : > { %v1093_v55 = vsel %vm1075_vm10, %v1060_v50, %v815_v40  ;;  %v1095_v25 = vsel %vm1075_vm10, %v1062_v7, %v817_v8 }
 0x119   : > { %v849_v29 = vpop.permute.xlu1 %848  ;;  %v847_v33 = vpop.permute.xlu0 %846 }
 0x11a   : > { %v1126_v10 = vsel %vm1108_vm11, %v1093_v55, %v847_v33  ;;  %v1128_v44 = vsel %vm1108_vm11, %v1095_v25, %v849_v29 }
 0x11d   : > { %v624_v14 = vpop.permute.xlu1 %623  ;;  %v879_v57 = vpop.permute.xlu0 %878 }
 0x11e   : > { %v1159_v28 = vsel %vm1141_vm12, %v1126_v10, %v879_v57  ;;  %v927_v46 = vsel %vm894_vm4, %v2720_v61, %v624_v14 }
 0x11f   : > { %2270 = vmatprep.mubr.msk.bf16.mxu0 %vm1189_vm13, %v1159_v28 }
 0x121   : > { %v626_v62 = vpop.permute.xlu1 %625  ;;  %v881_v41 = vpop.permute.xlu0 %880 }
 0x122   : > { %v1161_v0 = vsel %vm1141_vm12, %v1128_v44, %v881_v41  ;;  %v930_v17 = vsel %vm894_vm4, %v2764_v43, %v626_v62 }
 0x123   : > { %2271 = vmatmul.mubr.msk.bf16.gmra.mxu0 %vm1189_vm13, %v1161_v0 }
 0x125   : > { %v674_v48 = vpop.permute.xlu1 %673  ;;  %v672_v58 = vpop.permute.xlu0 %671 }
 0x126   : > { %v965_v2 = vsel %vm943_vm6, %v927_v46, %v672_v58  ;;  %v967_v19 = vsel %vm943_vm6, %v930_v17, %v674_v48 }
 0x129   : > { %v722_v63 = vpop.permute.xlu1 %721  ;;  %v720_v4 = vpop.permute.xlu0 %719 }
 0x12a   : > { %v998_v16 = vsel %vm976_vm7, %v965_v2, %v720_v4  ;;  %v1000_v21 = vsel %vm976_vm7, %v967_v19, %v722_v63 }
 0x12d   : > { %v755_v5 = vpop.permute.xlu1 %754  ;;  %v753_v54 = vpop.permute.xlu0 %752 }
 0x12e   : > { %v1031_v9 = vsel %vm1009_vm8, %v998_v16, %v753_v54  ;;  %v1033_v26 = vsel %vm1009_vm8, %v1000_v21, %v755_v5 }
 0x131   : > { %v788_v12 = vpop.permute.xlu1 %787  ;;  %v786_v13 = vpop.permute.xlu0 %785 }
 0x132   : > { %v1064_v6 = vsel %vm1042_vm9, %v1031_v9, %v786_v13  ;;  %v1066_v23 = vsel %vm1042_vm9, %v1033_v26, %v788_v12 }
 0x135   : > { %v821_v59 = vpop.permute.xlu1 %820  ;;  %v819_v36 = vpop.permute.xlu0 %818 }
 0x136   : > { %v1097_v49 = vsel %vm1075_vm10, %v1064_v6, %v819_v36  ;;  %v1099_v43 = vsel %vm1075_vm10, %v1066_v23, %v821_v59 }
 0x139   : > { %v853_v3 = vpop.permute.xlu1 %852  ;;  %v851_v15 = vpop.permute.xlu0 %850 }
 0x13a   : > { %v1130_v61 = vsel %vm1108_vm11, %v1097_v49, %v851_v15  ;;  %v1132_v24 = vsel %vm1108_vm11, %v1099_v43, %v853_v3 }
 0x13d   : > { %v628_v20 = vpop.permute.xlu1 %627  ;;  %v883_v18 = vpop.permute.xlu0 %882 }
 0x13e   : > { %v1163_v30 = vsel %vm1141_vm12, %v1130_v61, %v883_v18  ;;  %v933_v33 = vsel %vm894_vm4, %v2818_v27, %v628_v20 }
 0x13f   : > { %2274 = vmatprep.mubr.msk.bf16.mxu0 %vm1189_vm13, %v1163_v30 }
 0x141   : > { %v630_v31 = vpop.permute.xlu1 %629  ;;  %v885_v32 = vpop.permute.xlu0 %884 }
 0x142   : > { %v1165_v42 = vsel %vm1141_vm12, %v1132_v24, %v885_v32  ;;  %v936_v56 = vsel %vm894_vm4, %v2871_v11, %v630_v31 }
 0x143   : > { %2275 = vmatmul.mubr.msk.bf16.gmra.mxu0 %vm1189_vm13, %v1165_v42 }
 0x145   : > { %v678_v37 = vpop.permute.xlu1 %677  ;;  %v676_v38 = vpop.permute.xlu0 %675 }
 0x146   : > { %v969_v35 = vsel %vm943_vm6, %v933_v33, %v676_v38  ;;  %v971_v14 = vsel %vm943_vm6, %v936_v56, %v678_v37 }
 0x149   : > { %v726_v39 = vpop.permute.xlu1 %725  ;;  %v724_v34 = vpop.permute.xlu0 %723 }
 0x14a   : > { %v1002_v1 = vsel %vm976_vm7, %v969_v35, %v724_v34  ;;  %v1004_v27 = vsel %vm976_vm7, %v971_v14, %v726_v39 }
 0x14d   : > { %v759_v8 = vpop.permute.xlu1 %758  ;;  %v757_v40 = vpop.permute.xlu0 %756 }
 0x14e   : > { %v1035_v55 = vsel %vm1009_vm8, %v1002_v1, %v757_v40  ;;  %v1037_v25 = vsel %vm1009_vm8, %v1004_v27, %v759_v8 }
 0x151   : > { %v792_v52 = vpop.permute.xlu1 %791  ;;  %v790_v45 = vpop.permute.xlu0 %789 }
 0x152   : > { %v1068_v10 = vsel %vm1042_vm9, %v1035_v55, %v790_v45  ;;  %v1070_v62 = vsel %vm1042_vm9, %v1037_v25, %v792_v52 }
 0x155   : > { %v825_v47 = vpop.permute.xlu1 %824  ;;  %v823_v29 = vpop.permute.xlu0 %822 }
 0x156   : > { %v1101_v57 = vsel %vm1075_vm10, %v1068_v10, %v823_v29  ;;  %v1103_v11 = vsel %vm1075_vm10, %v1070_v62, %v825_v47 }
 0x159   : > { %v857_v50 = vpop.permute.xlu1 %856  ;;  %v855_v51 = vpop.permute.xlu0 %854 }
 0x15a   : > { %v1134_v60 = vsel %vm1108_vm11, %v1101_v57, %v855_v51  ;;  %v1136_v41 = vsel %vm1108_vm11, %v1103_v11, %v857_v50 }
 0x15c   : > { %v2290_v52 = vpop.f32.mrf.mxu1 }
 0x15d   : > { %v632_v28 = vpop.permute.xlu1 %631  ;;  %v887_v7 = vpop.permute.xlu0 %886  ;;  %1807 = vst.msk [vmem:[%s3156_s27 + $0x10] sm:$0xff] %vm943_vm6, %v2290_v52  ;;  %v1840_v62 = vsel %vm943_vm6, %v2290_v52, 0.0 }
 0x15e   : > { %v1167_v44 = vsel %vm1141_vm12, %v1134_v60, %v887_v7  ;;  %v939_v39 = vsel %vm894_vm4, %v2934_v53, %v632_v28  ;;  %v1678_v1 = vpop.f32.mrf.mxu1  ;;  %v1908_v28 = vmul.f32 %v2290_v52, %v2290_v52 }
 0x15f   : > { %2278 = vmatprep.mubr.msk.bf16.mxu0 %vm1189_vm13, %v1167_v44  ;;  %1805 = vst.msk [vmem:[%s3156_s27] sm:$0xff] %vm943_vm6, %v1678_v1  ;;  %v1906_v51 = vmul.f32 %v1678_v1, %v1678_v1  ;;  %v1837_v7 = vsel %vm943_vm6, %v1678_v1, 0.0 }
 0x160   : > { %v2291_v10 = vpop.f32.mrf.mxu1 }
 0x161   : > { %v634_v0 = vpop.permute.xlu1 %633  ;;  %v889_v48 = vpop.permute.xlu0 %888  ;;  %1808 = vst.msk [vmem:[%s3156_s27 + $0x18] sm:$0xff] %vm943_vm6, %v2291_v10 }
 0x162   : > { %v1169_v58 = vsel %vm1141_vm12, %v1136_v41, %v889_v48  ;;  %v942_v34 = vsel %vm894_vm4, %v2980_v22, %v634_v0  ;;  %v1681_v11 = vpop.f32.mrf.mxu1  ;;  %v1938_v41 = vsel %vm943_vm6, %v1906_v51, 0.0  ;;  %v1909_v0 = vmul.f32 %v2291_v10, %v2291_v10 }
 0x163   : > { %2279 = vmatmul.mubr.msk.bf16.gmra.mxu0 %vm1189_vm13, %v1169_v58  ;;  %1806 = vst.msk [vmem:[%s3156_s27 + $0x8] sm:$0xff] %vm943_vm6, %v1681_v11  ;;  %v1838_v48 = vsel %vm943_vm6, %v1681_v11, 0.0  ;;  %v1907_v58 = vmul.f32 %v1681_v11, %v1681_v11 }
 0x164   : > { %v2256_v63 = vpop.f32.mrf.mxu0 }
 0x165   : > { %1389 = vst.msk [vmem:[%s3129_s23 + $0x10] sm:$0xff] %vm943_vm6, %v2256_v63  ;;  %v682_v4 = vpop.permute.xlu1 %681  ;;  %v680_v5 = vpop.permute.xlu0 %679  ;;  %v1490_v2 = vmul.f32 %v2256_v63, %v2256_v63  ;;  %v1422_v17 = vsel %vm943_vm6, %v2256_v63, 0.0  ;;  %v1839_v63 = vadd.f32 %v1838_v48, %v1837_v7 }
 0x166   : > { %v1260_v54 = vpop.f32.mrf.mxu0  ;;  %v975_v8 = vsel %vm943_vm6, %v942_v34, %v682_v4  ;;  %v973_v40 = vsel %vm943_vm6, %v939_v39, %v680_v5  ;;  %v2294_v4 = vpop.f32.mrf.mxu1  ;;  %v1941_v5 = vsel %vm943_vm6, %v1908_v28, 0.0 }
 0x167   : > { %1387 = vst.msk [vmem:[%s3129_s23] sm:$0xff] %vm943_vm6, %v1260_v54  ;;  %v1488_v13 = vmul.f32 %v1260_v54, %v1260_v54  ;;  %v1419_v16 = vsel %vm943_vm6, %v1260_v54, 0.0  ;;  %v1523_v26 = vsel %vm943_vm6, %v1490_v2, 0.0  ;;  %v1842_v54 = vsel %vm943_vm6, %v2291_v10, 0.0  ;;  %1811 = vst.msk [vmem:[%s3156_s27 + $0x30] sm:$0xff] %vm943_vm6, %v2294_v4 }
 0x168   : > { %v2257_v12 = vpop.f32.mrf.mxu0 }
 0x169   : > { %1390 = vst.msk [vmem:[%s3129_s23 + $0x18] sm:$0xff] %vm943_vm6, %v2257_v12  ;;  %v730_v59 = vpop.permute.xlu1 %729  ;;  %v728_v36 = vpop.permute.xlu0 %727  ;;  %v1520_v6 = vsel %vm943_vm6, %v1488_v13, 0.0  ;;  %v1491_v19 = vmul.f32 %v2257_v12, %v2257_v12  ;;  %v1424_v30 = vsel %vm943_vm6, %v2257_v12, 0.0  ;;  %v1939_v12 = vsel %vm943_vm6, %v1907_v58, 0.0 }
 0x16a   : > { %v1263_v46 = vpop.f32.mrf.mxu0  ;;  %v1008_v45 = vsel %vm976_vm7, %v975_v8, %v730_v59  ;;  %v1006_v47 = vsel %vm976_vm7, %v973_v40, %v728_v36  ;;  %v1841_v13 = vadd.f32 %v1840_v62, %v1839_v63  ;;  %v1940_v59 = vadd.f32 %v1939_v12, %v1938_v41  ;;  %v1694_v36 = vpop.f32.mrf.mxu1 }
 0x16b   : > { %1388 = vst.msk [vmem:[%s3129_s23 + $0x8] sm:$0xff] %vm943_vm6, %v1263_v46  ;;  %v1420_v3 = vsel %vm943_vm6, %v1263_v46, 0.0  ;;  %v1489_v15 = vmul.f32 %v1263_v46, %v1263_v46  ;;  %v1525_v24 = vsel %vm943_vm6, %v1491_v19, 0.0  ;;  %v1943_v46 = vsel %vm943_vm6, %v1909_v0, 0.0  ;;  %1809 = vst.msk [vmem:[%s3156_s27 + $0x20] sm:$0xff] %vm943_vm6, %v1694_v36 }
 0x16c   : > { %v1421_v9 = vadd.f32 %v1420_v3, %v1419_v16  ;;  %v1844_v2 = vsel %vm943_vm6, %v1694_v36, 0.0  ;;  %v1910_v16 = vmul.f32 %v1694_v36, %v1694_v36 }
 0x16d   : > { %v1521_v49 = vsel %vm943_vm6, %v1489_v15, 0.0  ;;  %v763_v21 = vpop.permute.xlu1 %762  ;;  %v761_v61 = vpop.permute.xlu0 %760  ;;  %v1942_v15 = vadd.f32 %v1941_v5, %v1940_v59 }
 0x16e   : > { %v1423_v20 = vadd.f32 %v1422_v17, %v1421_v9  ;;  %v1522_v18 = vadd.f32 %v1521_v49, %v1520_v6  ;;  %v1041_v35 = vsel %vm1009_vm8, %v1008_v45, %v763_v21  ;;  %v1039_v53 = vsel %vm1009_vm8, %v1006_v47, %v761_v61  ;;  %v2295_v6 = vpop.f32.mrf.mxu1 }
 0x16f   : > { %v1843_v9 = vadd.f32 %v1842_v54, %v1841_v13  ;;  %v1912_v17 = vmul.f32 %v2294_v4, %v2294_v4  ;;  %v1944_v21 = vadd.f32 %v1943_v46, %v1942_v15  ;;  %v1945_v61 = vsel %vm943_vm6, %v1910_v16, 0.0  ;;  %1812 = vst.msk [vmem:[%s3156_s27 + $0x38] sm:$0xff] %vm943_vm6, %v2295_v6 }
 0x170   : > { %v1524_v23 = vadd.f32 %v1523_v26, %v1522_v18  ;;  %v3147_v43 = vadd.f32 %v1424_v30, %v1423_v20  ;;  %v1697_v30 = vpop.f32.mrf.mxu1  ;;  %v1850_v47 = vsel %vm943_vm6, %v2295_v6, 0.0 }
 0x171   : > { %v796_v31 = vpop.permute.xlu1 %795  ;;  %v794_v32 = vpop.permute.xlu0 %793  ;;  %v1845_v49 = vadd.f32 %v1844_v2, %v1843_v9  ;;  %1810 = vst.msk [vmem:[%s3156_s27 + $0x28] sm:$0xff] %vm943_vm6, %v1697_v30  ;;  %v1949_v39 = vsel %vm943_vm6, %v1912_v17, 0.0  ;;  %v1946_v34 = vadd.f32 %v1945_v61, %v1944_v21 }
 0x172   : > { %v3150_v42 = vadd.f32 %v1525_v24, %v1524_v23  ;;  %v1074_v22 = vsel %vm1042_vm9, %v1041_v35, %v796_v31  ;;  %v1072_v50 = vsel %vm1042_vm9, %v1039_v53, %v794_v32  ;;  %v1848_v31 = vsel %vm943_vm6, %v2294_v4, 0.0  ;;  %v2298_v40 = vpop.f32.mrf.mxu1 }
 0x173   : > { %v1913_v32 = vmul.f32 %v2295_v6, %v2295_v6  ;;  %1815 = vst.msk [vmem:[%s3156_s27 + $0x50] sm:$0xff] %vm943_vm6, %v2298_v40  ;;  %v1856_v62 = vsel %vm943_vm6, %v2298_v40, 0.0  ;;  %v1916_v11 = vmul.f32 %v2298_v40, %v2298_v40 }
 0x175   : > { %v829_v37 = vpop.permute.xlu1 %828  ;;  %v827_v38 = vpop.permute.xlu0 %826  ;;  %v1957_v17 = vsel %vm943_vm6, %v1916_v11, 0.0 }
 0x176   : > { %v1107_v55 = vsel %vm1075_vm10, %v1074_v22, %v829_v37  ;;  %v1105_v56 = vsel %vm1075_vm10, %v1072_v50, %v827_v38  ;;  %v1846_v37 = vsel %vm943_vm6, %v1697_v30, 0.0  ;;  %v1710_v22 = vpop.f32.mrf.mxu1 }
 0x177   : > { %v1847_v8 = vadd.f32 %v1846_v37, %v1845_v49  ;;  %1813 = vst.msk [vmem:[%s3156_s27 + $0x40] sm:$0xff] %vm943_vm6, %v1710_v22  ;;  %v1852_v7 = vsel %vm943_vm6, %v1710_v22, 0.0 }
 0x179   : > { %v861_v29 = vpop.permute.xlu1 %860  ;;  %v859_v33 = vpop.permute.xlu0 %858  ;;  %v1849_v1 = vadd.f32 %v1848_v31, %v1847_v8 }
 0x17a   : > { %v1140_v14 = vsel %vm1108_vm11, %v1107_v55, %v861_v29  ;;  %v1138_v57 = vsel %vm1108_vm11, %v1105_v56, %v859_v33  ;;  %v1911_v29 = vmul.f32 %v1697_v30, %v1697_v30 }
 0x17c   : > { %v1947_v55 = vsel %vm943_vm6, %v1911_v29, 0.0 }
 0x17d   : > { %v893_v27 = vpop.permute.xlu1 %892  ;;  %v891_v60 = vpop.permute.xlu0 %890 }
 0x17e   : > { %v1173_v25 = vsel %vm1141_vm12, %v1140_v14, %v893_v27  ;;  %v1171_v44 = vsel %vm1141_vm12, %v1138_v57, %v891_v60  ;;  %v1948_v14 = vadd.f32 %v1947_v55, %v1946_v34  ;;  %v1851_v57 = vadd.f32 %v1850_v47, %v1849_v1  ;;  %v2299_v27 = vpop.f32.mrf.mxu1 }
 0x17f   : > { %2282 = vmatprep.mubr.msk.bf16.mxu0 %vm1189_vm13, %v1171_v44  ;;  %1816 = vst.msk [vmem:[%s3156_s27 + $0x58] sm:$0xff] %vm943_vm6, %v2299_v27  ;;  %v1858_v46 = vsel %vm943_vm6, %v2299_v27, 0.0  ;;  %v1917_v2 = vmul.f32 %v2299_v27, %v2299_v27 }
 0x180   : > { %2283 = vmatmul.mubr.msk.bf16.gmra.mxu0 %vm1189_vm13, %v1173_v25  ;;  %v1914_v25 = vmul.f32 %v1710_v22, %v1710_v22  ;;  %v1950_v44 = vadd.f32 %v1949_v39, %v1948_v14  ;;  %v1853_v41 = vadd.f32 %v1852_v7, %v1851_v57  ;;  %v1713_v0 = vpop.f32.mrf.mxu1 }
 0x181   : > { %1814 = vst.msk [vmem:[%s3156_s27 + $0x48] sm:$0xff] %vm943_vm6, %v1713_v0  ;;  %v1854_v4 = vsel %vm943_vm6, %v1713_v0, 0.0  ;;  %v1915_v13 = vmul.f32 %v1713_v0, %v1713_v0 }
 0x182   : > { %v1953_v63 = vsel %vm943_vm6, %v1914_v25, 0.0  ;;  %v1855_v12 = vadd.f32 %v1854_v4, %v1853_v41  ;;  %v2302_v59 = vpop.f32.mrf.mxu1 }
 0x183   : > { %1819 = vst.msk [vmem:[%s3156_s27 + $0x70] sm:$0xff] %vm943_vm6, %v2302_v59  ;;  %v1955_v15 = vsel %vm943_vm6, %v1915_v13, 0.0 }
 0x184   : > { %v2260_v3 = vpop.f32.mrf.mxu0  ;;  %v1726_v9 = vpop.f32.mrf.mxu1 }
 0x185   : > { %1393 = vst.msk [vmem:[%s3129_s23 + $0x30] sm:$0xff] %vm943_vm6, %v2260_v3  ;;  %v1494_v20 = vmul.f32 %v2260_v3, %v2260_v3  ;;  %1817 = vst.msk [vmem:[%s3156_s27 + $0x60] sm:$0xff] %vm943_vm6, %v1726_v9  ;;  %v1860_v6 = vsel %vm943_vm6, %v1726_v9, 0.0 }
 0x186   : > { %v1276_v19 = vpop.f32.mrf.mxu0  ;;  %v2303_v61 = vpop.f32.mrf.mxu1 }
 0x187   : > { %1391 = vst.msk [vmem:[%s3129_s23 + $0x20] sm:$0xff] %vm943_vm6, %v1276_v19  ;;  %v1426_v18 = vsel %vm943_vm6, %v1276_v19, 0.0  ;;  %v1492_v26 = vmul.f32 %v1276_v19, %v1276_v19  ;;  %v1531_v33 = vsel %vm943_vm6, %v1494_v20, 0.0  ;;  %v1918_v19 = vmul.f32 %v1726_v9, %v1726_v9  ;;  %1820 = vst.msk [vmem:[%s3156_s27 + $0x78] sm:$0xff] %vm943_vm6, %v2303_v61 }
 0x188   : > { %v1427_v23 = vadd.f32 %v1426_v18, %v3147_v43  ;;  %v2261_v24 = vpop.f32.mrf.mxu0  ;;  %v1430_v43 = vsel %vm943_vm6, %v2260_v3, 0.0  ;;  %v1857_v3 = vadd.f32 %v1856_v62, %v1855_v12  ;;  %v1959_v20 = vsel %vm943_vm6, %v1917_v2, 0.0 }
 0x189   : > { %v1527_v38 = vsel %vm943_vm6, %v1492_v26, 0.0  ;;  %1394 = vst.msk [vmem:[%s3129_s23 + $0x38] sm:$0xff] %vm943_vm6, %v2261_v24  ;;  %v1432_v50 = vsel %vm943_vm6, %v2261_v24, 0.0  ;;  %v1495_v56 = vmul.f32 %v2261_v24, %v2261_v24  ;;  %v1864_v26 = vsel %vm943_vm6, %v2302_v59, 0.0 }
 0x18a   : > { %v1528_v52 = vadd.f32 %v1527_v38, %v3150_v42  ;;  %v1279_v45 = vpop.f32.mrf.mxu0  ;;  %v1951_v42 = vsel %vm943_vm6, %v1913_v32, 0.0  ;;  %v1859_v21 = vadd.f32 %v1858_v46, %v1857_v3  ;;  %v1920_v24 = vmul.f32 %v2302_v59, %v2302_v59 }
 0x18b   : > { %1392 = vst.msk [vmem:[%s3129_s23 + $0x28] sm:$0xff] %vm943_vm6, %v1279_v45  ;;  %v1428_v35 = vsel %vm943_vm6, %v1279_v45, 0.0  ;;  %v1493_v53 = vmul.f32 %v1279_v45, %v1279_v45  ;;  %v1533_v5 = vsel %vm943_vm6, %v1495_v56, 0.0  ;;  %v1952_v54 = vadd.f32 %v1951_v42, %v1950_v44 }
 0x18c   : > { %v1429_v51 = vadd.f32 %v1428_v35, %v1427_v23  ;;  %v1861_v30 = vadd.f32 %v1860_v6, %v1859_v21  ;;  %v1729_v23 = vpop.f32.mrf.mxu1  ;;  %v1961_v31 = vsel %vm943_vm6, %v1918_v19, 0.0  ;;  %v1866_v8 = vsel %vm943_vm6, %v2303_v61, 0.0 }
 0x18d   : > { %v1529_v10 = vsel %vm943_vm6, %v1493_v53, 0.0  ;;  %v1954_v16 = vadd.f32 %v1953_v63, %v1952_v54  ;;  %1818 = vst.msk [vmem:[%s3156_s27 + $0x68] sm:$0xff] %vm943_vm6, %v1729_v23  ;;  %v1862_v32 = vsel %vm943_vm6, %v1729_v23, 0.0  ;;  %v1919_v37 = vmul.f32 %v1729_v23, %v1729_v23 }
 0x18e   : > { %v1431_v60 = vadd.f32 %v1430_v43, %v1429_v51  ;;  %v1530_v28 = vadd.f32 %v1529_v10, %v1528_v52  ;;  %v1863_v39 = vadd.f32 %v1862_v32, %v1861_v30  ;;  %v2306_v34 = vpop.f32.mrf.mxu1  ;;  %v1921_v40 = vmul.f32 %v2303_v61, %v2303_v61 }
 0x18f   : > { %v1956_v49 = vadd.f32 %v1955_v15, %v1954_v16  ;;  %v1963_v43 = vsel %vm943_vm6, %v1919_v37, 0.0  ;;  %1823 = vst.msk [vmem:[%s3156_s27 + $0x90] sm:$0xff] %vm943_vm6, %v2306_v34  ;;  %v1965_v29 = vsel %vm943_vm6, %v1920_v24, 0.0  ;;  %v1872_v42 = vsel %vm943_vm6, %v2306_v34, 0.0 }
 0x190   : > { %v1532_v48 = vadd.f32 %v1531_v33, %v1530_v28  ;;  %v3235_v58 = vadd.f32 %v1432_v50, %v1431_v60  ;;  %v1865_v45 = vadd.f32 %v1864_v26, %v1863_v39  ;;  %v1742_v47 = vpop.f32.mrf.mxu1  ;;  %v1967_v50 = vsel %vm943_vm6, %v1921_v40, 0.0 }
 0x191   : > { %v1958_v18 = vadd.f32 %v1957_v17, %v1956_v49  ;;  %1821 = vst.msk [vmem:[%s3156_s27 + $0x80] sm:$0xff] %vm943_vm6, %v1742_v47  ;;  %v1868_v33 = vsel %vm943_vm6, %v1742_v47, 0.0  ;;  %v1922_v35 = vmul.f32 %v1742_v47, %v1742_v47  ;;  %v1924_v10 = vmul.f32 %v2306_v34, %v2306_v34 }
 0x192   : > { %v3242_v36 = vadd.f32 %v1533_v5, %v1532_v48  ;;  %v1867_v1 = vadd.f32 %v1866_v8, %v1865_v45  ;;  %v2307_v22 = vpop.f32.mrf.mxu1 }
 0x193   : > { %v1960_v38 = vadd.f32 %v1959_v20, %v1958_v18  ;;  %1824 = vst.msk [vmem:[%s3156_s27 + $0x98] sm:$0xff] %vm943_vm6, %v2307_v22  ;;  %v1969_v14 = vsel %vm943_vm6, %v1922_v35, 0.0  ;;  %v1874_v25 = vsel %vm943_vm6, %v2307_v22, 0.0  ;;  %v1925_v44 = vmul.f32 %v2307_v22, %v2307_v22 }
 0x194   : > { %v1869_v55 = vadd.f32 %v1868_v33, %v1867_v1  ;;  %v1745_v56 = vpop.f32.mrf.mxu1  ;;  %v1973_v4 = vsel %vm943_vm6, %v1924_v10, 0.0 }
 0x195   : > { %v1962_v52 = vadd.f32 %v1961_v31, %v1960_v38  ;;  %1822 = vst.msk [vmem:[%s3156_s27 + $0x88] sm:$0xff] %vm943_vm6, %v1745_v56  ;;  %v1870_v57 = vsel %vm943_vm6, %v1745_v56, 0.0  ;;  %v1923_v27 = vmul.f32 %v1745_v56, %v1745_v56  ;;  %v1975_v2 = vsel %vm943_vm6, %v1925_v44, 0.0 }
 0x196   : > { %v1871_v28 = vadd.f32 %v1870_v57, %v1869_v55  ;;  %v2310_v7 = vpop.f32.mrf.mxu1 }
 0x197   : > { %v1964_v53 = vadd.f32 %v1963_v43, %v1962_v52  ;;  %v1971_v62 = vsel %vm943_vm6, %v1923_v27, 0.0  ;;  %1827 = vst.msk [vmem:[%s3156_s27 + $0xb0] sm:$0xff] %vm943_vm6, %v2310_v7  ;;  %v1928_v11 = vmul.f32 %v2310_v7, %v2310_v7  ;;  %v1880_v16 = vsel %vm943_vm6, %v2310_v7, 0.0 }
 0x198   : > { %v1873_v0 = vadd.f32 %v1872_v42, %v1871_v28  ;;  %v1758_v48 = vpop.f32.mrf.mxu1 }
 0x199   : > { %v1966_v51 = vadd.f32 %v1965_v29, %v1964_v53  ;;  %1825 = vst.msk [vmem:[%s3156_s27 + $0xa0] sm:$0xff] %vm943_vm6, %v1758_v48  ;;  %v1926_v5 = vmul.f32 %v1758_v48, %v1758_v48  ;;  %v1876_v13 = vsel %vm943_vm6, %v1758_v48, 0.0  ;;  %v1981_v3 = vsel %vm943_vm6, %v1928_v11, 0.0 }
 0x19a   : > { %v1875_v12 = vadd.f32 %v1874_v25, %v1873_v0  ;;  %v2311_v59 = vpop.f32.mrf.mxu1 }
 0x19b   : > { %v1968_v60 = vadd.f32 %v1967_v50, %v1966_v51  ;;  %1828 = vst.msk [vmem:[%s3156_s27 + $0xb8] sm:$0xff] %vm943_vm6, %v2311_v59  ;;  %v1977_v20 = vsel %vm943_vm6, %v1926_v5, 0.0  ;;  %v1929_v24 = vmul.f32 %v2311_v59, %v2311_v59  ;;  %v1882_v37 = vsel %vm943_vm6, %v2311_v59, 0.0 }
 0x19c   : > { %v1761_v19 = vpop.f32.mrf.mxu1  ;;  %v1877_v61 = vadd.f32 %v1876_v13, %v1875_v12 }
 0x19d   : > { %v1970_v41 = vadd.f32 %v1969_v14, %v1968_v60  ;;  %1826 = vst.msk [vmem:[%s3156_s27 + $0xa8] sm:$0xff] %vm943_vm6, %v1761_v19  ;;  %v1878_v18 = vsel %vm943_vm6, %v1761_v19, 0.0  ;;  %v1927_v39 = vmul.f32 %v1761_v19, %v1761_v19  ;;  %v1983_v53 = vsel %vm943_vm6, %v1929_v24, 0.0 }
 0x19e   : > { %v2314_v31 = vpop.f32.mrf.mxu1  ;;  %v1879_v38 = vadd.f32 %v1878_v18, %v1877_v61 }
 0x19f   : > { %v1972_v54 = vadd.f32 %v1971_v62, %v1970_v41  ;;  %1831 = vst.msk [vmem:[%s3156_s27 + $0xd0] sm:$0xff] %vm943_vm6, %v2314_v31  ;;  %v1979_v29 = vsel %vm943_vm6, %v1927_v39, 0.0  ;;  %v1888_v42 = vsel %vm943_vm6, %v2314_v31, 0.0  ;;  %v1932_v7 = vmul.f32 %v2314_v31, %v2314_v31 }
 0x1a0   : > { %v1774_v52 = vpop.f32.mrf.mxu1  ;;  %v1881_v47 = vadd.f32 %v1880_v16, %v1879_v38 }
 0x1a1   : > { %v1974_v6 = vadd.f32 %v1973_v4, %v1972_v54  ;;  %1829 = vst.msk [vmem:[%s3156_s27 + $0xc0] sm:$0xff] %vm943_vm6, %v1774_v52  ;;  %v1884_v14 = vsel %vm943_vm6, %v1774_v52, 0.0  ;;  %v1930_v57 = vmul.f32 %v1774_v52, %v1774_v52  ;;  %v1989_v59 = vsel %vm943_vm6, %v1932_v7, 0.0 }
 0x1a2   : > { %v2315_v22 = vpop.f32.mrf.mxu1  ;;  %v1883_v55 = vadd.f32 %v1882_v37, %v1881_v47 }
 0x1a3   : > { %v1976_v23 = vadd.f32 %v1975_v2, %v1974_v6  ;;  %1832 = vst.msk [vmem:[%s3156_s27 + $0xd8] sm:$0xff] %vm943_vm6, %v2315_v22  ;;  %v1985_v62 = vsel %vm943_vm6, %v1930_v57, 0.0  ;;  %v1890_v54 = vsel %vm943_vm6, %v2315_v22, 0.0 }
 0x1a4   : > { %v2264_v63 = vpop.f32.mrf.mxu0  ;;  %v1777_v27 = vpop.f32.mrf.mxu1  ;;  %v1885_v25 = vadd.f32 %v1884_v14, %v1883_v55 }
 0x1a5   : > { %1397 = vst.msk [vmem:[%s3129_s23 + $0x50] sm:$0xff] %vm943_vm6, %v2264_v63  ;;  %v1498_v15 = vmul.f32 %v2264_v63, %v2264_v63  ;;  %v1438_v26 = vsel %vm943_vm6, %v2264_v63, 0.0  ;;  %v1978_v43 = vadd.f32 %v1977_v20, %v1976_v23  ;;  %1830 = vst.msk [vmem:[%s3156_s27 + $0xc8] sm:$0xff] %vm943_vm6, %v1777_v27  ;;  %v1886_v11 = vsel %vm943_vm6, %v1777_v27, 0.0 }
 0x1a6   : > { %v1292_v46 = vpop.f32.mrf.mxu0  ;;  %v1931_v41 = vmul.f32 %v1777_v27, %v1777_v27  ;;  %v2318_v0 = vpop.f32.mrf.mxu1  ;;  %v1933_v63 = vmul.f32 %v2315_v22, %v2315_v22  ;;  %v1887_v4 = vadd.f32 %v1886_v11, %v1885_v25 }
 0x1a7   : > { %1395 = vst.msk [vmem:[%s3129_s23 + $0x40] sm:$0xff] %vm943_vm6, %v1292_v46  ;;  %v1434_v9 = vsel %vm943_vm6, %v1292_v46, 0.0  ;;  %v1496_v17 = vmul.f32 %v1292_v46, %v1292_v46  ;;  %v1539_v45 = vsel %vm943_vm6, %v1498_v15, 0.0  ;;  %v1980_v1 = vadd.f32 %v1979_v29, %v1978_v43  ;;  %1835 = vst.msk [vmem:[%s3156_s27 + $0xf0] sm:$0xff] %vm943_vm6, %v2318_v0 }
 0x1a8   : > { %v1435_v49 = vadd.f32 %v1434_v9, %v3235_v58  ;;  %v2265_v21 = vpop.f32.mrf.mxu0  ;;  %v1987_v12 = vsel %vm943_vm6, %v1931_v41, 0.0  ;;  %v1790_v13 = vpop.f32.mrf.mxu1  ;;  %v1889_v46 = vadd.f32 %v1888_v42, %v1887_v4  ;;  %v1991_v9 = vsel %vm943_vm6, %v1933_v63, 0.0 }
 0x1a9   : > { %v1535_v30 = vsel %vm943_vm6, %v1496_v17, 0.0  ;;  %1398 = vst.msk [vmem:[%s3129_s23 + $0x58] sm:$0xff] %vm943_vm6, %v2265_v21  ;;  %v1499_v34 = vmul.f32 %v2265_v21, %v2265_v21  ;;  %v1440_v33 = vsel %vm943_vm6, %v2265_v21, 0.0  ;;  %v1982_v10 = vadd.f32 %v1981_v3, %v1980_v1  ;;  %1833 = vst.msk [vmem:[%s3156_s27 + $0xe0] sm:$0xff] %vm943_vm6, %v1790_v13 }
 0x1aa   : > { %v1536_v58 = vadd.f32 %v1535_v30, %v3242_v36  ;;  %v1295_v32 = vpop.f32.mrf.mxu0  ;;  %v1934_v2 = vmul.f32 %v1790_v13, %v1790_v13  ;;  %v1892_v3 = vsel %vm943_vm6, %v1790_v13, 0.0  ;;  %v2319_v15 = vpop.f32.mrf.mxu1  ;;  %v1891_v17 = vadd.f32 %v1890_v54, %v1889_v46 }
 0x1ab   : > { %1396 = vst.msk [vmem:[%s3129_s23 + $0x48] sm:$0xff] %vm943_vm6, %v1295_v32  ;;  %v1436_v8 = vsel %vm943_vm6, %v1295_v32, 0.0  ;;  %v1497_v40 = vmul.f32 %v1295_v32, %v1295_v32  ;;  %v1541_v56 = vsel %vm943_vm6, %v1499_v34, 0.0  ;;  %v1984_v44 = vadd.f32 %v1983_v53, %v1982_v10  ;;  %1836 = vst.msk [vmem:[%s3156_s27 + $0xf8] sm:$0xff] %vm943_vm6, %v2319_v15 }
 0x1ac   : > { %v1437_v36 = vadd.f32 %v1436_v8, %v1435_v49  ;;  %v1936_v19 = vmul.f32 %v2318_v0, %v2318_v0  ;;  %v1793_v49 = vpop.f32.mrf.mxu1  ;;  %v1893_v21 = vadd.f32 %v1892_v3, %v1891_v17  ;;  %v1993_v61 = vsel %vm943_vm6, %v1934_v2, 0.0 }
 0x1ad   : > { %v1537_v35 = vsel %vm943_vm6, %v1497_v40, 0.0  ;;  %v1986_v5 = vadd.f32 %v1985_v62, %v1984_v44  ;;  %1834 = vst.msk [vmem:[%s3156_s27 + $0xe8] sm:$0xff] %vm943_vm6, %v1793_v49  ;;  %v1894_v20 = vsel %vm943_vm6, %v1793_v49, 0.0  ;;  %v1935_v18 = vmul.f32 %v1793_v49, %v1793_v49 }
 0x1ae   : > { %v1439_v50 = vadd.f32 %v1438_v26, %v1437_v36  ;;  %v1538_v51 = vadd.f32 %v1537_v35, %v1536_v58  ;;  %v1896_v26 = vsel %vm943_vm6, %v2318_v0, 0.0  ;;  %v1937_v23 = vmul.f32 %v2319_v15, %v2319_v15 }
 0x1af   : > { %v1988_v16 = vadd.f32 %v1987_v12, %v1986_v5  ;;  %v1895_v24 = vadd.f32 %v1894_v20, %v1893_v21  ;;  %v1995_v31 = vsel %vm943_vm6, %v1935_v18, 0.0  ;;  %v1898_v32 = vsel %vm943_vm6, %v2319_v15, 0.0 }
 0x1b0   : > { %v1540_v60 = vadd.f32 %v1539_v45, %v1538_v51  ;;  %v3322_v28 = vadd.f32 %v1440_v33, %v1439_v50  ;;  %v1997_v37 = vsel %vm943_vm6, %v1936_v19, 0.0  ;;  %v1999_v34 = vsel %vm943_vm6, %v1937_v23, 0.0 }
 0x1b1   : > { %v1990_v6 = vadd.f32 %v1989_v59, %v1988_v16  ;;  %v1897_v38 = vadd.f32 %v1896_v26, %v1895_v24 }
 0x1b2   : > { %v1542_v48 = vadd.f32 %v1541_v56, %v1540_v60 }
 0x1b3   : > { %v1992_v30 = vadd.f32 %v1991_v9, %v1990_v6  ;;  %v1899_v8 = vadd.f32 %v1898_v32, %v1897_v38 }
 0x1b5   : > { %v1994_v58 = vadd.f32 %v1993_v61, %v1992_v30  ;;  %v1900_v43 = vrot.slane %v1899_v8, 4 }
 0x1b7   : > { %v1996_v39 = vadd.f32 %v1995_v31, %v1994_v58  ;;  %v1901_v45 = vadd.f32 %v1900_v43, %v1899_v8 }
 0x1b9   : > { %v1998_v40 = vadd.f32 %v1997_v37, %v1996_v39  ;;  %v1902_v29 = vrot.slane %v1901_v45, 2 }
 0x1bb   : > { %v2000_v52 = vadd.f32 %v1999_v34, %v1998_v40  ;;  %v1903_v53 = vadd.f32 %v1902_v29, %v1901_v45 }
 0x1bd   : > { %v2001_v36 = vrot.slane %v2000_v52, 4  ;;  %v1904_v55 = vrot.slane %v1903_v53, 1 }
 0x1bf   : > { %v2002_v33 = vadd.f32 %v2001_v36, %v2000_v52  ;;  %v1905_v27 = vadd.f32 %v1904_v55, %v1903_v53 }
 0x1c1   : > { %v2003_v50 = vrot.slane %v2002_v33, 2  ;;  %2007 = vst.msk [vmem:[%s284_s30] sm:$0x1] %vm1589_vm14, %v1905_v27 }
 0x1c3   : > { %v2004_v10 = vadd.f32 %v2003_v50, %v2002_v33 }
 0x1c4   : > { %v2268_v47 = vpop.f32.mrf.mxu0 }
 0x1c5   : > { %1401 = vst.msk [vmem:[%s3129_s23 + $0x70] sm:$0xff] %vm943_vm6, %v2268_v47  ;;  %v1502_v60 = vmul.f32 %v2268_v47, %v2268_v47  ;;  %v2005_v25 = vrot.slane %v2004_v10, 1  ;;  %v1446_v62 = vsel %vm943_vm6, %v2268_v47, 0.0 }
 0x1c6   : > { %v1308_v35 = vpop.f32.mrf.mxu0 }
 0x1c7   : > { %1399 = vst.msk [vmem:[%s3129_s23 + $0x60] sm:$0xff] %vm943_vm6, %v1308_v35  ;;  %v1442_v1 = vsel %vm943_vm6, %v1308_v35, 0.0  ;;  %v1500_v22 = vmul.f32 %v1308_v35, %v1308_v35  ;;  %v2006_v0 = vadd.f32 %v2005_v25, %v2004_v10  ;;  %v1547_v4 = vsel %vm943_vm6, %v1502_v60, 0.0 }
 0x1c8   : > { %v1443_v51 = vadd.f32 %v1442_v1, %v3322_v28  ;;  %v2269_v42 = vpop.f32.mrf.mxu0 }
 0x1c9   : > { %v1543_v56 = vsel %vm943_vm6, %v1500_v22, 0.0  ;;  %1402 = vst.msk [vmem:[%s3129_s23 + $0x78] sm:$0xff] %vm943_vm6, %v2269_v42  ;;  %v1503_v11 = vmul.f32 %v2269_v42, %v2269_v42  ;;  %v1448_v5 = vsel %vm943_vm6, %v2269_v42, 0.0 }
 0x1ca   : > { %v1544_v14 = vadd.f32 %v1543_v56, %v1542_v48  ;;  %v1311_v57 = vpop.f32.mrf.mxu0  ;;  %2008 = vst.msk [vmem:[%s284_s30 + $0x1] sm:$0x1] %vm1589_vm14, %v2006_v0 }
 0x1cb   : > { %1400 = vst.msk [vmem:[%s3129_s23 + $0x68] sm:$0xff] %vm943_vm6, %v1311_v57  ;;  %v1444_v28 = vsel %vm943_vm6, %v1311_v57, 0.0  ;;  %v1501_v7 = vmul.f32 %v1311_v57, %v1311_v57  ;;  %v1549_v13 = vsel %vm943_vm6, %v1503_v11, 0.0 }
 0x1cc   : > { %v1445_v44 = vadd.f32 %v1444_v28, %v1443_v51 }
 0x1cd   : > { %v1545_v41 = vsel %vm943_vm6, %v1501_v7, 0.0 }
 0x1ce   : > { %v1447_v48 = vadd.f32 %v1446_v62, %v1445_v44  ;;  %v1546_v63 = vadd.f32 %v1545_v41, %v1544_v14 }
 0x1d0   : > { %v1548_v54 = vadd.f32 %v1547_v4, %v1546_v63  ;;  %v1449_v12 = vadd.f32 %v1448_v5, %v1447_v48 }
 0x1d2   : > { %v1550_v59 = vadd.f32 %v1549_v13, %v1548_v54 }
 0x1e3   : > { %v2272_v46 = vpop.f32.mrf.mxu0 }
 0x1e4   : > { %1405 = vst.msk [vmem:[%s3129_s23 + $0x90] sm:$0xff] %vm943_vm6, %v2272_v46  ;;  %v1506_v49 = vmul.f32 %v2272_v46, %v2272_v46  ;;  %v1454_v18 = vsel %vm943_vm6, %v2272_v46, 0.0 }
 0x1e5   : > { %v1324_v2 = vpop.f32.mrf.mxu0 }
 0x1e6   : > { %1403 = vst.msk [vmem:[%s3129_s23 + $0x80] sm:$0xff] %vm943_vm6, %v1324_v2  ;;  %v1450_v16 = vsel %vm943_vm6, %v1324_v2, 0.0  ;;  %v1504_v3 = vmul.f32 %v1324_v2, %v1324_v2  ;;  %v1555_v31 = vsel %vm943_vm6, %v1506_v49, 0.0 }
 0x1e7   : > { %v1451_v15 = vadd.f32 %v1450_v16, %v1449_v12  ;;  %v2273_v9 = vpop.f32.mrf.mxu0 }
 0x1e8   : > { %v1551_v17 = vsel %vm943_vm6, %v1504_v3, 0.0  ;;  %1406 = vst.msk [vmem:[%s3129_s23 + $0x98] sm:$0xff] %vm943_vm6, %v2273_v9  ;;  %v1507_v26 = vmul.f32 %v2273_v9, %v2273_v9  ;;  %v1456_v58 = vsel %vm943_vm6, %v2273_v9, 0.0 }
 0x1e9   : > { %v1552_v6 = vadd.f32 %v1551_v17, %v1550_v59  ;;  %v1327_v19 = vpop.f32.mrf.mxu0 }
 0x1ea   : > { %1404 = vst.msk [vmem:[%s3129_s23 + $0x88] sm:$0xff] %vm943_vm6, %v1327_v19  ;;  %v1452_v21 = vsel %vm943_vm6, %v1327_v19, 0.0  ;;  %v1505_v61 = vmul.f32 %v1327_v19, %v1327_v19  ;;  %v1557_v38 = vsel %vm943_vm6, %v1507_v26, 0.0 }
 0x1eb   : > { %v1453_v20 = vadd.f32 %v1452_v21, %v1451_v15 }
 0x1ec   : > { %v1553_v30 = vsel %vm943_vm6, %v1505_v61, 0.0 }
 0x1ed   : > { %v1455_v23 = vadd.f32 %v1454_v18, %v1453_v20  ;;  %v1554_v24 = vadd.f32 %v1553_v30, %v1552_v6 }
 0x1ef   : > { %v1556_v32 = vadd.f32 %v1555_v31, %v1554_v24  ;;  %v1457_v37 = vadd.f32 %v1456_v58, %v1455_v23 }
 0x1f1   : > { %v1558_v39 = vadd.f32 %v1557_v38, %v1556_v32 }
 0x203   : > { %v2276_v34 = vpop.f32.mrf.mxu0 }
 0x204   : > { %1409 = vst.msk [vmem:[%s3129_s23 + $0xb0] sm:$0xff] %vm943_vm6, %v2276_v34  ;;  %v1510_v55 = vmul.f32 %v2276_v34, %v2276_v34  ;;  %v1462_v10 = vsel %vm943_vm6, %v2276_v34, 0.0 }
 0x205   : > { %v1340_v8 = vpop.f32.mrf.mxu0 }
 0x206   : > { %1407 = vst.msk [vmem:[%s3129_s23 + $0xa0] sm:$0xff] %vm943_vm6, %v1340_v8  ;;  %v1508_v47 = vmul.f32 %v1340_v8, %v1340_v8  ;;  %v1458_v33 = vsel %vm943_vm6, %v1340_v8, 0.0  ;;  %v1563_v57 = vsel %vm943_vm6, %v1510_v55, 0.0 }
 0x207   : > { %v2277_v40 = vpop.f32.mrf.mxu0  ;;  %v1459_v22 = vadd.f32 %v1458_v33, %v1457_v37 }
 0x208   : > { %1410 = vst.msk [vmem:[%s3129_s23 + $0xb8] sm:$0xff] %vm943_vm6, %v2277_v40  ;;  %v1559_v53 = vsel %vm943_vm6, %v1508_v47, 0.0  ;;  %v1511_v27 = vmul.f32 %v2277_v40, %v2277_v40  ;;  %v1464_v7 = vsel %vm943_vm6, %v2277_v40, 0.0 }
 0x209   : > { %v1343_v43 = vpop.f32.mrf.mxu0  ;;  %v1560_v51 = vadd.f32 %v1559_v53, %v1558_v39 }
 0x20a   : > { %1408 = vst.msk [vmem:[%s3129_s23 + $0xa8] sm:$0xff] %vm943_vm6, %v1343_v43  ;;  %v1509_v35 = vmul.f32 %v1343_v43, %v1343_v43  ;;  %v1460_v1 = vsel %vm943_vm6, %v1343_v43, 0.0  ;;  %v1565_v11 = vsel %vm943_vm6, %v1511_v27, 0.0 }
 0x20b   : > { %v1461_v42 = vadd.f32 %v1460_v1, %v1459_v22 }
 0x20c   : > { %v1561_v50 = vsel %vm943_vm6, %v1509_v35, 0.0 }
 0x20d   : > { %v1562_v56 = vadd.f32 %v1561_v50, %v1560_v51  ;;  %v1463_v14 = vadd.f32 %v1462_v10, %v1461_v42 }
 0x20f   : > { %v1564_v28 = vadd.f32 %v1563_v57, %v1562_v56  ;;  %v1465_v62 = vadd.f32 %v1464_v7, %v1463_v14 }
 0x211   : > { %v1566_v63 = vadd.f32 %v1565_v11, %v1564_v28 }
 0x223   : > { %v2280_v52 = vpop.f32.mrf.mxu0 }
 0x224   : > { %1413 = vst.msk [vmem:[%s3129_s23 + $0xd0] sm:$0xff] %vm943_vm6, %v2280_v52  ;;  %v1514_v12 = vmul.f32 %v2280_v52, %v2280_v52  ;;  %v1470_v59 = vsel %vm943_vm6, %v2280_v52, 0.0 }
 0x225   : > { %v1356_v45 = vpop.f32.mrf.mxu0 }
 0x226   : > { %1411 = vst.msk [vmem:[%s3129_s23 + $0xc0] sm:$0xff] %vm943_vm6, %v1356_v45  ;;  %v1512_v60 = vmul.f32 %v1356_v45, %v1356_v45  ;;  %v1466_v25 = vsel %vm943_vm6, %v1356_v45, 0.0  ;;  %v1571_v16 = vsel %vm943_vm6, %v1514_v12, 0.0 }
 0x227   : > { %v2281_v36 = vpop.f32.mrf.mxu0  ;;  %v1467_v48 = vadd.f32 %v1466_v25, %v1465_v62 }
 0x228   : > { %1414 = vst.msk [vmem:[%s3129_s23 + $0xd8] sm:$0xff] %vm943_vm6, %v2281_v36  ;;  %v1567_v41 = vsel %vm943_vm6, %v1512_v60, 0.0  ;;  %v1515_v3 = vmul.f32 %v2281_v36, %v2281_v36  ;;  %v1472_v17 = vsel %vm943_vm6, %v2281_v36, 0.0 }
 0x229   : > { %v1359_v29 = vpop.f32.mrf.mxu0  ;;  %v1568_v5 = vadd.f32 %v1567_v41, %v1566_v63 }
 0x22a   : > { %1412 = vst.msk [vmem:[%s3129_s23 + $0xc8] sm:$0xff] %vm943_vm6, %v1359_v29  ;;  %v1513_v44 = vmul.f32 %v1359_v29, %v1359_v29  ;;  %v1468_v0 = vsel %vm943_vm6, %v1359_v29, 0.0  ;;  %v1573_v61 = vsel %vm943_vm6, %v1515_v3, 0.0 }
 0x22b   : > { %v1469_v54 = vadd.f32 %v1468_v0, %v1467_v48 }
 0x22c   : > { %v1569_v4 = vsel %vm943_vm6, %v1513_v44, 0.0 }
 0x22d   : > { %v1570_v13 = vadd.f32 %v1569_v4, %v1568_v5  ;;  %v1471_v46 = vadd.f32 %v1470_v59, %v1469_v54 }
 0x22f   : > { %v1572_v15 = vadd.f32 %v1571_v16, %v1570_v13  ;;  %v1473_v49 = vadd.f32 %v1472_v17, %v1471_v46 }
 0x231   : > { %v1574_v26 = vadd.f32 %v1573_v61, %v1572_v15 }
 0x240   : > { %v2284_v2 = vpop.f32.mrf.mxu0 }
 0x241   : > { %1417 = vst.msk [vmem:[%s3129_s23 + $0xf0] sm:$0xff] %vm943_vm6, %v2284_v2  ;;  %v1518_v23 = vmul.f32 %v2284_v2, %v2284_v2  ;;  %v1478_v37 = vsel %vm943_vm6, %v2284_v2, 0.0 }
 0x242   : > { %v1372_v9 = vpop.f32.mrf.mxu0 }
 0x243   : > { %1415 = vst.msk [vmem:[%s3129_s23 + $0xe0] sm:$0xff] %vm943_vm6, %v1372_v9  ;;  %v1474_v6 = vsel %vm943_vm6, %v1372_v9, 0.0  ;;  %v1516_v19 = vmul.f32 %v1372_v9, %v1372_v9  ;;  %v1579_v40 = vsel %vm943_vm6, %v1518_v23, 0.0 }
 0x244   : > { %v2285_v21 = vpop.f32.mrf.mxu0  ;;  %v1475_v18 = vadd.f32 %v1474_v6, %v1473_v49 }
 0x245   : > { %v1575_v20 = vsel %vm943_vm6, %v1516_v19, 0.0  ;;  %1418 = vst.msk [vmem:[%s3129_s23 + $0xf8] sm:$0xff] %vm943_vm6, %v2285_v21  ;;  %v1519_v38 = vmul.f32 %v2285_v21, %v2285_v21  ;;  %v1480_v43 = vsel %vm943_vm6, %v2285_v21, 0.0 }
 0x246   : > { %v1375_v30 = vpop.f32.mrf.mxu0  ;;  %v1576_v58 = vadd.f32 %v1575_v20, %v1574_v26 }
 0x247   : > { %1416 = vst.msk [vmem:[%s3129_s23 + $0xe8] sm:$0xff] %vm943_vm6, %v1375_v30  ;;  %v1476_v24 = vsel %vm943_vm6, %v1375_v30, 0.0  ;;  %v1517_v31 = vmul.f32 %v1375_v30, %v1375_v30  ;;  %v1581_v36 = vsel %vm943_vm6, %v1519_v38, 0.0 }
 0x248   : > { %v1477_v32 = vadd.f32 %v1476_v24, %v1475_v18 }
 0x249   : > { %v1577_v39 = vsel %vm943_vm6, %v1517_v31, 0.0 }
 0x24a   : > { %v1479_v34 = vadd.f32 %v1478_v37, %v1477_v32  ;;  %v1578_v8 = vadd.f32 %v1577_v39, %v1576_v58 }
 0x24c   : > { %v1481_v52 = vadd.f32 %v1480_v43, %v1479_v34  ;;  %v1580_v45 = vadd.f32 %v1579_v40, %v1578_v8 }
 0x24e   : > { %v1482_v47 = vrot.slane %v1481_v52, 4  ;;  %v1582_v29 = vadd.f32 %v1581_v36, %v1580_v45 }
 0x250   : > { %v1483_v33 = vadd.f32 %v1482_v47, %v1481_v52  ;;  %v1583_v35 = vrot.slane %v1582_v29, 4 }
 0x252   : > { %v1484_v53 = vrot.slane %v1483_v33, 2  ;;  %v1584_v1 = vadd.f32 %v1583_v35, %v1582_v29 }
 0x254   : > { %v1485_v22 = vadd.f32 %v1484_v53, %v1483_v33  ;;  %v1585_v50 = vrot.slane %v1584_v1, 2 }
 0x256   : > { %v1486_v51 = vrot.slane %v1485_v22, 1  ;;  %v1586_v42 = vadd.f32 %v1585_v50, %v1584_v1 }
 0x258   : > { %v1487_v55 = vadd.f32 %v1486_v51, %v1485_v22  ;;  %v1587_v56 = vrot.slane %v1586_v42, 1 }
 0x25a   : > { %v1588_v10 = vadd.f32 %v1587_v56, %v1586_v42  ;;  %1590 = vst.msk [vmem:[%s275_s9] sm:$0x1] %vm1589_vm14, %v1487_v55 }
 0x25c   : > { %1591 = vst.msk [vmem:[%s275_s9 + $0x1] sm:$0x1] %vm1589_vm14, %v1588_v10 }
 0x25d PF: > { %s17_s21 = sadd.s32 1, %s2348_s21  }
 0x25e   : > { %p14_p4 = scmp.ge.s32.totalorder %s17_s21, 4  }
 0x260   :  { %16 = sbr.rel (!%p14_p4) target bundleno = 1 (0x1), region = 98 }

</bundles_post_ra>
